<compile_context>
chip_gen: v7x
topology: tpu7x:2x2x1
jax: 0.10.0
libtpu: 0.0.40
codegen_flags: <defaults>
</compile_context>

<pallas_src>
import functools

import jax
import jax.numpy as jnp
import numpy as np
from jax import lax
from jax.experimental import pallas as pl
from jax.experimental.pallas import tpu as pltpu

# Synthetic config mirroring cfg.ANCHOR_SCALES / cfg.ANCHOR_RATIOS.
ANCHOR_SCALES = (8, 16, 32)
ANCHOR_RATIOS = (0.5, 1.0, 2.0)
NUM_ANCHORS = len(ANCHOR_SCALES) * len(ANCHOR_RATIOS)   # A = 9
HIDDEN = 512         # rpn_conv output channels (fixed by the module definition)
HEAD_LANES = 128     # fused head width: 2A + 4A = 54, zero padded to 128 lanes
OUT_LANES = 128      # lane-dense output slab width
TILE_H = 8           # output feature-map rows per grid step (tile = TILE_H * Wp rows)


def rpn_kernel(xp_ref, w1_ref, b1_ref, wh_ref, bh_ref, out_ref, *, th, wp, c, a):
    """One row-tile of the RPN head.

    xp_ref : (Hp+2, Wp+2, C)  zero-padded channels-last feature map (VMEM resident)
    w1_ref : (9*C, HIDDEN)    3x3 conv weight, row order (ky*3 + kx)*C + cin
    b1_ref : (1, HIDDEN)      conv bias
    wh_ref : (HIDDEN, 128)    fused head weight  [cls(2A) | bbox(4A) | zero pad]
    bh_ref : (1, 128)         fused head bias
    out_ref: (th*wp, 128)     lane-dense slab [scores(2A) | deltas(4A) | probs(2A) | pad]
    """
    rows = th * wp
    r0 = pl.multiple_of(pl.program_id(0) * th, th)

    # --- 3x3 conv (pad=1) + ReLU: 9 accumulated matmuls on shifted windows ---
    acc = None
    for ky in range(3):
        for kx in range(3):
            tap = xp_ref[pl.ds(r0 + ky, th), pl.ds(kx, wp), :].reshape(rows, c)
            wt = w1_ref[pl.ds((ky * 3 + kx) * c, c), :]
            d = jnp.dot(tap, wt, preferred_element_type=jnp.float32)
            acc = d if acc is None else acc + d
    hidden = jnp.maximum(acc + b1_ref[...], 0.0)

    # --- fused cls + bbox heads: one full-width MXU matmul ---
    heads = jnp.dot(hidden, wh_ref[...], preferred_element_type=jnp.float32)
    heads = heads + bh_ref[...]

    # --- pairwise softmax over channel pairs (j, A + j) ---
    # (equivalent to the PyTorch reshape(scores, 2) + softmax(dim=1))
    s0 = heads[:, 0:a]
    s1 = heads[:, a:2 * a]
    m = jnp.maximum(s0, s1)
    e0 = jnp.exp(s0 - m)
    e1 = jnp.exp(s1 - m)
    inv = pl.reciprocal(e0 + e1, approx=True)

    pad = jnp.zeros((rows, OUT_LANES - 8 * a), jnp.float32)
    out_ref[...] = jnp.concatenate(
        [heads[:, 0:6 * a],    # raw cls scores (2A) | bbox deltas (4A)
         e0 * inv,             # softmax probs, channels [0, A)
         e1 * inv,             # softmax probs, channels [A, 2A)
         pad], axis=-1)


def init_params(key, input_depth):
    """Deterministic synthetic parameters with the module's shapes (OIHW)."""
    A = NUM_ANCHORS
    k = jax.random.split(key, 6)
    w_conv = 0.01 * jax.random.normal(k[0], (HIDDEN, input_depth, 3, 3), jnp.float32)
    b_conv = 0.1 * jax.random.normal(k[1], (HIDDEN,), jnp.float32)
    w_cls = 0.01 * jax.random.normal(k[2], (2 * A, HIDDEN, 1, 1), jnp.float32)
    b_cls = 0.1 * jax.random.normal(k[3], (2 * A,), jnp.float32)
    w_bbox = 0.01 * jax.random.normal(k[4], (4 * A, HIDDEN, 1, 1), jnp.float32)
    b_bbox = 0.1 * jax.random.normal(k[5], (4 * A,), jnp.float32)

    # torch OIHW -> matmul layouts used by the kernel.
    w1 = jnp.transpose(w_conv, (2, 3, 1, 0)).reshape(9 * input_depth, HIDDEN)
    w_heads = jnp.concatenate(
        [jnp.transpose(w_cls[:, :, 0, 0], (1, 0)),                     # (HIDDEN, 2A)
         jnp.transpose(w_bbox[:, :, 0, 0], (1, 0)),                    # (HIDDEN, 4A)
         jnp.zeros((HIDDEN, HEAD_LANES - 6 * A), jnp.float32)], axis=1)
    b_heads = jnp.concatenate(
        [b_cls, b_bbox,
         jnp.zeros((HEAD_LANES - 6 * A,), jnp.float32)]).reshape(1, HEAD_LANES)
    return dict(
        w1=w1, b1=b_conv.reshape(1, HIDDEN), wh=w_heads, bh=b_heads,
        # torch-layout copies kept only for the pure-JAX reference check
        w_conv=w_conv, b_conv=b_conv, w_cls=w_cls, b_cls=b_cls,
        w_bbox=w_bbox, b_bbox=b_bbox,
    )


def rpn_forward(base_feat, img_info, gt_boxes, params):
    """Pallas implementation of RPN.forward (eval mode).

    base_feat: (1, C, H, W) float32, PyTorch NCHW convention.
    Returns (probs, scores, anchor_deltas, loss_cls, loss_bbox) in NCHW.
    """
    del img_info, gt_boxes  # only consumed by ProposalLayer / AnchorTargetLayer
    assert base_feat.shape[0] == 1, "Single batch only."
    _, C, H, W = base_feat.shape
    A = NUM_ANCHORS

    th = TILE_H
    Hp = pl.cdiv(H, th) * th      # pad rows so every grid step is a full tile
    Wp = pl.cdiv(W, 8) * 8        # pad cols to a sublane multiple

    # --- glue: NCHW -> channels-last with conv halo + tail padding ---
    x = jnp.transpose(base_feat[0], (1, 2, 0))                          # (H, W, C)
    xp = jnp.pad(x, ((1, 1 + Hp - H), (1, 1 + Wp - W), (0, 0)))         # (Hp+2, Wp+2, C)

    kernel = functools.partial(rpn_kernel, th=th, wp=Wp, c=C, a=A)

    slab = pl.pallas_call(
        kernel,
        out_shape=jax.ShapeDtypeStruct((Hp * Wp, OUT_LANES), jnp.float32),
        grid=(Hp // th,),
        in_specs=[
            # whole padded feature map kept VMEM-resident (read from HBM once)
            pl.BlockSpec(xp.shape, lambda i: (0, 0, 0)),
            pl.BlockSpec((9 * C, HIDDEN), lambda i: (0, 0)),        # w1
            pl.BlockSpec((1, HIDDEN), lambda i: (0, 0)),            # b1
            pl.BlockSpec((HIDDEN, HEAD_LANES), lambda i: (0, 0)),   # fused head W
            pl.BlockSpec((1, HEAD_LANES), lambda i: (0, 0)),        # fused head b
        ],
        out_specs=pl.BlockSpec((th * Wp, OUT_LANES), lambda i: (i, 0)),
        compiler_params=pltpu.CompilerParams(
            dimension_semantics=("parallel",),
            # keep headroom on v7x (64 MiB / TC); plenty on v5e/v6e (128 MiB)
            vmem_limit_bytes=48 << 20),
    )(xp, params['w1'], params['b1'], params['wh'], params['bh'])

    # --- glue: lane-dense slab -> PyTorch NCHW outputs ---
    slab = slab.reshape(Hp, Wp, OUT_LANES)[:H, :W, :]                    # (H, W, 128)
    scores = jnp.transpose(slab[:, :, 0:2 * A], (2, 0, 1))[None]         # (1, 2A, H, W)
    anchor_deltas = jnp.transpose(slab[:, :, 2 * A:6 * A], (2, 0, 1))[None]
    probs = jnp.transpose(slab[:, :, 6 * A:8 * A], (2, 0, 1))[None]      # (1, 2A, H, W)

    # TODO(synk): ProposalLayer (anchor generation + box decode + NMS) and
    # AnchorTargetLayer are data-dependent, dynamically shaped ops with no clean
    # Pallas equivalent; proposals are not produced here.
    rpn_loss_cls = jnp.float32(0.0)
    rpn_loss_bbox = jnp.float32(0.0)
    return probs, scores, anchor_deltas, rpn_loss_cls, rpn_loss_bbox


def reference_forward(base_feat, p):
    """Pure-JAX NCHW reference matching the PyTorch module semantics."""
    A = NUM_ANCHORS
    dn = ('NCHW', 'OIHW', 'NCHW')
    conv = lax.conv_general_dilated(base_feat, p['w_conv'], (1, 1),
                                    ((1, 1), (1, 1)), dimension_numbers=dn,
                                    precision=lax.Precision.HIGHEST)
    conv = jax.nn.relu(conv + p['b_conv'][None, :, None, None])
    scores = lax.conv_general_dilated(conv, p['w_cls'], (1, 1),
                                      ((0, 0), (0, 0)), dimension_numbers=dn,
                                      precision=lax.Precision.HIGHEST)
    scores = scores + p['b_cls'][None, :, None, None]
    N, _, H, W = scores.shape
    scores_reshape = scores.reshape(N, 2, A * H, W)
    probs = jax.nn.softmax(scores_reshape, axis=1).reshape(N, 2 * A, H, W)
    deltas = lax.conv_general_dilated(conv, p['w_bbox'], (1, 1),
                                      ((0, 0), (0, 0)), dimension_numbers=dn,
                                      precision=lax.Precision.HIGHEST)
    deltas = deltas + p['b_bbox'][None, :, None, None]
    return probs, scores, deltas


if __name__ == "__main__":
    key = jax.random.PRNGKey(0)
    k_feat, k_param = jax.random.split(key)

    C, H, W = 32, 16, 16
    base_feat = jax.random.normal(k_feat, (1, C, H, W), jnp.float32)
    img_info = jnp.array([H * 16.0, W * 16.0, 1.0], jnp.float32)
    gt_boxes = jnp.zeros((1, 6), jnp.float32)

    params = init_params(k_param, C)

    probs, scores, deltas, loss_cls, loss_bbox = rpn_forward(
        base_feat, img_info, gt_boxes, params)
    jax.block_until_ready((probs, scores, deltas))

    probs_ref, scores_ref, deltas_ref = reference_forward(base_feat, params)
    np.testing.assert_allclose(np.asarray(scores), np.asarray(scores_ref),
                               rtol=1e-3, atol=1e-3)
    np.testing.assert_allclose(np.asarray(probs), np.asarray(probs_ref),
                               rtol=1e-3, atol=1e-3)
    np.testing.assert_allclose(np.asarray(deltas), np.asarray(deltas_ref),
                               rtol=1e-3, atol=1e-3)

    print("KERNEL_OK")
</pallas_src>

<mosaic_0001>
module attributes {stable_mosaic.version = 11 : i64} {
  func.func @rpn_kernel(%arg0: i32, %arg1: memref<18x18x32xf32, #tpu.memory_space<vmem>>, %arg2: memref<288x512xf32, #tpu.memory_space<vmem>>, %arg3: memref<1x512xf32, #tpu.memory_space<vmem>>, %arg4: memref<512x128xf32, #tpu.memory_space<vmem>>, %arg5: memref<1x128xf32, #tpu.memory_space<vmem>>, %arg6: memref<128x128xf32, #tpu.memory_space<vmem>>) attributes {dimension_semantics = [#tpu.dimension_semantics<parallel>], iteration_bounds = array<i64: 2>, scalar_prefetch = 0 : i64, scratch_operands = 0 : i64, tpu.core_type = #tpu.core_type<tc>, window_params = [{pipeline_mode = #tpu.pipeline_mode<synchronous>, transform_indices = @transform_0, window_bounds = array<i64: 18, 18, 32>}, {pipeline_mode = #tpu.pipeline_mode<synchronous>, transform_indices = @transform_1, window_bounds = array<i64: 288, 512>}, {pipeline_mode = #tpu.pipeline_mode<synchronous>, transform_indices = @transform_2, window_bounds = array<i64: 1, 512>}, {pipeline_mode = #tpu.pipeline_mode<synchronous>, transform_indices = @transform_3, window_bounds = array<i64: 512, 128>}, {pipeline_mode = #tpu.pipeline_mode<synchronous>, transform_indices = @transform_4, window_bounds = array<i64: 1, 128>}, {transform_indices = @transform_5, window_bounds = array<i64: 128, 128>}]} {
    %c8_i32 = arith.constant 8 : i32
    %0 = arith.muli %arg0, %c8_i32 : i32
    %1 = tpu.assume_multiple %0, 8 : i32
    %c0_i32 = arith.constant 0 : i32
    %2 = arith.addi %1, %c0_i32 : i32
    %3 = arith.index_cast %2 : i32 to index
    %c0 = arith.constant 0 : index
    %c0_0 = arith.constant 0 : index
    %4 = vector.load %arg1[%3, %c0, %c0_0] : memref<18x18x32xf32, #tpu.memory_space<vmem>>, vector<8x16x32xf32>
    %5 = vector.shape_cast %4 : vector<8x16x32xf32> to vector<128x32xf32>
    %c0_1 = arith.constant 0 : index
    %c0_2 = arith.constant 0 : index
    %6 = vector.load %arg2[%c0_1, %c0_2] : memref<288x512xf32, #tpu.memory_space<vmem>>, vector<32x512xf32>
    %cst = arith.constant dense<0.000000e+00> : vector<128x512xf32>
    %7 = tpu.matmul %5, %6, %cst {dimension_numbers = #tpu.dot_dimension_numbers<[1], [0], [0], [1], [0, 0, 1, 1], [], []>} : vector<128x32xf32>, vector<32x512xf32>, vector<128x512xf32> -> vector<128x512xf32>
    %c0_i32_3 = arith.constant 0 : i32
    %8 = arith.addi %1, %c0_i32_3 : i32
    %9 = arith.index_cast %8 : i32 to index
    %c1 = arith.constant 1 : index
    %c0_4 = arith.constant 0 : index
    %10 = vector.load %arg1[%9, %c1, %c0_4] : memref<18x18x32xf32, #tpu.memory_space<vmem>>, vector<8x16x32xf32>
    %11 = vector.shape_cast %10 : vector<8x16x32xf32> to vector<128x32xf32>
    %c32 = arith.constant 32 : index
    %c0_5 = arith.constant 0 : index
    %12 = vector.load %arg2[%c32, %c0_5] : memref<288x512xf32, #tpu.memory_space<vmem>>, vector<32x512xf32>
    %cst_6 = arith.constant dense<0.000000e+00> : vector<128x512xf32>
    %13 = tpu.matmul %11, %12, %cst_6 {dimension_numbers = #tpu.dot_dimension_numbers<[1], [0], [0], [1], [0, 0, 1, 1], [], []>} : vector<128x32xf32>, vector<32x512xf32>, vector<128x512xf32> -> vector<128x512xf32>
    %14 = arith.addf %7, %13 : vector<128x512xf32>
    %c0_i32_7 = arith.constant 0 : i32
    %15 = arith.addi %1, %c0_i32_7 : i32
    %16 = arith.index_cast %15 : i32 to index
    %c2 = arith.constant 2 : index
    %c0_8 = arith.constant 0 : index
    %17 = vector.load %arg1[%16, %c2, %c0_8] : memref<18x18x32xf32, #tpu.memory_space<vmem>>, vector<8x16x32xf32>
    %18 = vector.shape_cast %17 : vector<8x16x32xf32> to vector<128x32xf32>
    %c64 = arith.constant 64 : index
    %c0_9 = arith.constant 0 : index
    %19 = vector.load %arg2[%c64, %c0_9] : memref<288x512xf32, #tpu.memory_space<vmem>>, vector<32x512xf32>
    %cst_10 = arith.constant dense<0.000000e+00> : vector<128x512xf32>
    %20 = tpu.matmul %18, %19, %cst_10 {dimension_numbers = #tpu.dot_dimension_numbers<[1], [0], [0], [1], [0, 0, 1, 1], [], []>} : vector<128x32xf32>, vector<32x512xf32>, vector<128x512xf32> -> vector<128x512xf32>
    %21 = arith.addf %14, %20 : vector<128x512xf32>
    %c1_i32 = arith.constant 1 : i32
    %22 = arith.addi %1, %c1_i32 : i32
    %23 = arith.index_cast %22 : i32 to index
    %c0_11 = arith.constant 0 : index
    %c0_12 = arith.constant 0 : index
    %24 = vector.load %arg1[%23, %c0_11, %c0_12] : memref<18x18x32xf32, #tpu.memory_space<vmem>>, vector<8x16x32xf32>
    %25 = vector.shape_cast %24 : vector<8x16x32xf32> to vector<128x32xf32>
    %c96 = arith.constant 96 : index
    %c0_13 = arith.constant 0 : index
    %26 = vector.load %arg2[%c96, %c0_13] : memref<288x512xf32, #tpu.memory_space<vmem>>, vector<32x512xf32>
    %cst_14 = arith.constant dense<0.000000e+00> : vector<128x512xf32>
    %27 = tpu.matmul %25, %26, %cst_14 {dimension_numbers = #tpu.dot_dimension_numbers<[1], [0], [0], [1], [0, 0, 1, 1], [], []>} : vector<128x32xf32>, vector<32x512xf32>, vector<128x512xf32> -> vector<128x512xf32>
    %28 = arith.addf %21, %27 : vector<128x512xf32>
    %c1_i32_15 = arith.constant 1 : i32
    %29 = arith.addi %1, %c1_i32_15 : i32
    %30 = arith.index_cast %29 : i32 to index
    %c1_16 = arith.constant 1 : index
    %c0_17 = arith.constant 0 : index
    %31 = vector.load %arg1[%30, %c1_16, %c0_17] : memref<18x18x32xf32, #tpu.memory_space<vmem>>, vector<8x16x32xf32>
    %32 = vector.shape_cast %31 : vector<8x16x32xf32> to vector<128x32xf32>
    %c128 = arith.constant 128 : index
    %c0_18 = arith.constant 0 : index
    %33 = vector.load %arg2[%c128, %c0_18] : memref<288x512xf32, #tpu.memory_space<vmem>>, vector<32x512xf32>
    %cst_19 = arith.constant dense<0.000000e+00> : vector<128x512xf32>
    %34 = tpu.matmul %32, %33, %cst_19 {dimension_numbers = #tpu.dot_dimension_numbers<[1], [0], [0], [1], [0, 0, 1, 1], [], []>} : vector<128x32xf32>, vector<32x512xf32>, vector<128x512xf32> -> vector<128x512xf32>
    %35 = arith.addf %28, %34 : vector<128x512xf32>
    %c1_i32_20 = arith.constant 1 : i32
    %36 = arith.addi %1, %c1_i32_20 : i32
    %37 = arith.index_cast %36 : i32 to index
    %c2_21 = arith.constant 2 : index
    %c0_22 = arith.constant 0 : index
    %38 = vector.load %arg1[%37, %c2_21, %c0_22] : memref<18x18x32xf32, #tpu.memory_space<vmem>>, vector<8x16x32xf32>
    %39 = vector.shape_cast %38 : vector<8x16x32xf32> to vector<128x32xf32>
    %c160 = arith.constant 160 : index
    %c0_23 = arith.constant 0 : index
    %40 = vector.load %arg2[%c160, %c0_23] : memref<288x512xf32, #tpu.memory_space<vmem>>, vector<32x512xf32>
    %cst_24 = arith.constant dense<0.000000e+00> : vector<128x512xf32>
    %41 = tpu.matmul %39, %40, %cst_24 {dimension_numbers = #tpu.dot_dimension_numbers<[1], [0], [0], [1], [0, 0, 1, 1], [], []>} : vector<128x32xf32>, vector<32x512xf32>, vector<128x512xf32> -> vector<128x512xf32>
    %42 = arith.addf %35, %41 : vector<128x512xf32>
    %c2_i32 = arith.constant 2 : i32
    %43 = arith.addi %1, %c2_i32 : i32
    %44 = arith.index_cast %43 : i32 to index
    %c0_25 = arith.constant 0 : index
    %c0_26 = arith.constant 0 : index
    %45 = vector.load %arg1[%44, %c0_25, %c0_26] : memref<18x18x32xf32, #tpu.memory_space<vmem>>, vector<8x16x32xf32>
    %46 = vector.shape_cast %45 : vector<8x16x32xf32> to vector<128x32xf32>
    %c192 = arith.constant 192 : index
    %c0_27 = arith.constant 0 : index
    %47 = vector.load %arg2[%c192, %c0_27] : memref<288x512xf32, #tpu.memory_space<vmem>>, vector<32x512xf32>
    %cst_28 = arith.constant dense<0.000000e+00> : vector<128x512xf32>
    %48 = tpu.matmul %46, %47, %cst_28 {dimension_numbers = #tpu.dot_dimension_numbers<[1], [0], [0], [1], [0, 0, 1, 1], [], []>} : vector<128x32xf32>, vector<32x512xf32>, vector<128x512xf32> -> vector<128x512xf32>
    %49 = arith.addf %42, %48 : vector<128x512xf32>
    %c2_i32_29 = arith.constant 2 : i32
    %50 = arith.addi %1, %c2_i32_29 : i32
    %51 = arith.index_cast %50 : i32 to index
    %c1_30 = arith.constant 1 : index
    %c0_31 = arith.constant 0 : index
    %52 = vector.load %arg1[%51, %c1_30, %c0_31] : memref<18x18x32xf32, #tpu.memory_space<vmem>>, vector<8x16x32xf32>
    %53 = vector.shape_cast %52 : vector<8x16x32xf32> to vector<128x32xf32>
    %c224 = arith.constant 224 : index
    %c0_32 = arith.constant 0 : index
    %54 = vector.load %arg2[%c224, %c0_32] : memref<288x512xf32, #tpu.memory_space<vmem>>, vector<32x512xf32>
    %cst_33 = arith.constant dense<0.000000e+00> : vector<128x512xf32>
    %55 = tpu.matmul %53, %54, %cst_33 {dimension_numbers = #tpu.dot_dimension_numbers<[1], [0], [0], [1], [0, 0, 1, 1], [], []>} : vector<128x32xf32>, vector<32x512xf32>, vector<128x512xf32> -> vector<128x512xf32>
    %56 = arith.addf %49, %55 : vector<128x512xf32>
    %c2_i32_34 = arith.constant 2 : i32
    %57 = arith.addi %1, %c2_i32_34 : i32
    %58 = arith.index_cast %57 : i32 to index
    %c2_35 = arith.constant 2 : index
    %c0_36 = arith.constant 0 : index
    %59 = vector.load %arg1[%58, %c2_35, %c0_36] : memref<18x18x32xf32, #tpu.memory_space<vmem>>, vector<8x16x32xf32>
    %60 = vector.shape_cast %59 : vector<8x16x32xf32> to vector<128x32xf32>
    %c256 = arith.constant 256 : index
    %c0_37 = arith.constant 0 : index
    %61 = vector.load %arg2[%c256, %c0_37] : memref<288x512xf32, #tpu.memory_space<vmem>>, vector<32x512xf32>
    %cst_38 = arith.constant dense<0.000000e+00> : vector<128x512xf32>
    %62 = tpu.matmul %60, %61, %cst_38 {dimension_numbers = #tpu.dot_dimension_numbers<[1], [0], [0], [1], [0, 0, 1, 1], [], []>} : vector<128x32xf32>, vector<32x512xf32>, vector<128x512xf32> -> vector<128x512xf32>
    %63 = arith.addf %56, %62 : vector<128x512xf32>
    %c0_39 = arith.constant 0 : index
    %c0_40 = arith.constant 0 : index
    %64 = vector.load %arg3[%c0_39, %c0_40] : memref<1x512xf32, #tpu.memory_space<vmem>>, vector<1x512xf32>
    %65 = vector.broadcast %64 : vector<1x512xf32> to vector<128x512xf32>
    %66 = arith.addf %63, %65 : vector<128x512xf32>
    %cst_41 = arith.constant 0.000000e+00 : f32
    %67 = vector.broadcast %cst_41 : f32 to vector<128x512xf32>
    %68 = arith.maximumf %66, %67 : vector<128x512xf32>
    %c0_42 = arith.constant 0 : index
    %c0_43 = arith.constant 0 : index
    %69 = vector.load %arg4[%c0_42, %c0_43] : memref<512x128xf32, #tpu.memory_space<vmem>>, vector<512x128xf32>
    %cst_44 = arith.constant dense<0.000000e+00> : vector<128x128xf32>
    %70 = tpu.matmul %68, %69, %cst_44 {dimension_numbers = #tpu.dot_dimension_numbers<[1], [0], [0], [1], [0, 0, 1, 1], [], []>} : vector<128x512xf32>, vector<512x128xf32>, vector<128x128xf32> -> vector<128x128xf32>
    %c0_45 = arith.constant 0 : index
    %c0_46 = arith.constant 0 : index
    %71 = vector.load %arg5[%c0_45, %c0_46] : memref<1x128xf32, #tpu.memory_space<vmem>>, vector<1x128xf32>
    %72 = vector.broadcast %71 : vector<1x128xf32> to vector<128x128xf32>
    %73 = arith.addf %70, %72 : vector<128x128xf32>
    %74 = vector.extract_strided_slice %73 {offsets = [0, 0], sizes = [128, 9], strides = [1, 1]} : vector<128x128xf32> to vector<128x9xf32>
    %75 = vector.extract_strided_slice %73 {offsets = [0, 9], sizes = [128, 9], strides = [1, 1]} : vector<128x128xf32> to vector<128x9xf32>
    %76 = arith.maximumf %74, %75 : vector<128x9xf32>
    %77 = arith.subf %74, %76 : vector<128x9xf32>
    %78 = math.exp %77 : vector<128x9xf32>
    %79 = arith.subf %75, %76 : vector<128x9xf32>
    %80 = math.exp %79 : vector<128x9xf32>
    %81 = arith.addf %78, %80 : vector<128x9xf32>
    %82 = tpu.reciprocal %81 {approx = true} : vector<128x9xf32> -> vector<128x9xf32>
    %cst_47 = arith.constant 0.000000e+00 : f32
    %83 = vector.broadcast %cst_47 : f32 to vector<128x56xf32>
    %84 = vector.extract_strided_slice %73 {offsets = [0, 0], sizes = [128, 54], strides = [1, 1]} : vector<128x128xf32> to vector<128x54xf32>
    %85 = arith.mulf %78, %82 : vector<128x9xf32>
    %86 = arith.mulf %80, %82 : vector<128x9xf32>
    %87 = tpu.concatenate %84, %85, %86, %83 in 1 : vector<128x54xf32>, vector<128x9xf32>, vector<128x9xf32>, vector<128x56xf32> -> vector<128x128xf32>
    %c0_48 = arith.constant 0 : index
    %c0_49 = arith.constant 0 : index
    %88 = vector.load %arg6[%c0_48, %c0_49] : memref<128x128xf32, #tpu.memory_space<vmem>>, vector<128x128xf32>
    tpu.vector_store %arg6[%c0_48, %c0_49], %87 {strides = array<i32>} : memref<128x128xf32, #tpu.memory_space<vmem>>, vector<128x128xf32>,
    return
  }
  func.func @transform_0(%arg0: i32) -> (i32, i32, i32) {
    %c0_i32 = arith.constant 0 : i32
    %c0_i32_0 = arith.constant 0 : i32
    %c0_i32_1 = arith.constant 0 : i32
    %c0_i32_2 = arith.constant 0 : i32
    return %c0_i32, %c0_i32_0, %c0_i32_1 : i32, i32, i32
  }
  func.func @transform_1(%arg0: i32) -> (i32, i32) {
    %c0_i32 = arith.constant 0 : i32
    %c0_i32_0 = arith.constant 0 : i32
    %c0_i32_1 = arith.constant 0 : i32
    return %c0_i32, %c0_i32_0 : i32, i32
  }
  func.func @transform_2(%arg0: i32) -> (i32, i32) {
    %c0_i32 = arith.constant 0 : i32
    %c0_i32_0 = arith.constant 0 : i32
    %c0_i32_1 = arith.constant 0 : i32
    return %c0_i32, %c0_i32_0 : i32, i32
  }
  func.func @transform_3(%arg0: i32) -> (i32, i32) {
    %c0_i32 = arith.constant 0 : i32
    %c0_i32_0 = arith.constant 0 : i32
    %c0_i32_1 = arith.constant 0 : i32
    return %c0_i32, %c0_i32_0 : i32, i32
  }
  func.func @transform_4(%arg0: i32) -> (i32, i32) {
    %c0_i32 = arith.constant 0 : i32
    %c0_i32_0 = arith.constant 0 : i32
    %c0_i32_1 = arith.constant 0 : i32
    return %c0_i32, %c0_i32_0 : i32, i32
  }
  func.func @transform_5(%arg0: i32) -> (i32, i32) {
    %c0_i32 = arith.constant 0 : i32
    %c0_i32_0 = arith.constant 0 : i32
    return %arg0, %c0_i32 : i32, i32
  }
}

</mosaic_0001>

<bundles_post_ra>
// kernel: tpu_custom_call.1
= control target key start
LH: loop header
LB: loop body
LE: loop exit
PB: predicated region body
PF: predicated region fallthrough
CT: control target
= control target key end

     0   :  { %s8930_s0 = inlined_call_operand.hbm [shape: f32[18,18,32], index: 0, kind: input, shape index: {}]   ;;  %s8931_s1 = inlined_call_operand.hbm [shape: f32[288,512], index: 1, kind: input, shape index: {}]   ;;  %s8932_s2 = inlined_call_operand.vmem [shape: f32[1,512], index: 2, kind: input, shape index: {}]   ;;  %s8933_s3 = inlined_call_operand.hbm [shape: f32[512,128], index: 3, kind: input, shape index: {}]   ;;  %s8934_s4 = inlined_call_operand.vmem [shape: f32[1,128], index: 4, kind: input, shape index: {}]   ;;  %s8935_s5 = inlined_call_operand.hbm [shape: f32[256,128], index: 5, kind: output, shape index: {}]  }
   0x1   :  { %8939 = sst [smem:[#allocation12_spill]] %s8931_s1 }
   0x2   :  { %10 = vsyncpa [#allocation3], 0 }
   0x3   :  { %11 = vsyncpa [#allocation6], 0 }
   0x4   :  { %12 = vsyncpa [#allocation4], 0 }
   0x5   :  { %14 = vsyncpa [#allocation4 + $0x1], 0  ;;  %s7230_s18 = smov 0   ;;  %s7232_s19 = smov 0  }
   0x6   :  { %s7234_s20 = smov 0   ;;  %s7236_s21 = smov 0  }
   0x7 LB: > { %s7251_s22 = sadd.s32 4294967295, %s7184_s21   ;;  %s5567_s23 = sadd.s32 4294967294, %s7184_s21   ;;  %s7184_s21 = sphi %s7236_s21, %s8956_s21   ;;  %s7180_s20 = sphi %s7234_s20, %s8955_s20   ;;  %s7176_s19 = sphi %s7232_s19, %s8954_s19   ;;  %s7172_s18 = sphi %s7230_s18, %s8953_s18  }
   0x8   : > { %s7255_s24 = sadd.s32 1, %s7184_s21   ;;  %s132_s25 = sadd.s32 1, %s7180_s20 }
   0x9   : > { %s129_s26 = ssub.s32 %s7184_s21, %s7255_s24  ;;  %p142_p0 = scmp.ne.s32.totalorder %s7180_s20, %s7176_s19 }
   0xa   : > { %p130_p1 = scmp.eq.s32.totalorder %s129_s26, 0  ;;  %p143_p2 = scmp.eq.s32.totalorder %s7251_s22, 1 }
   0xb   : > { %p148_p3 = scmp.ne.s32.totalorder %s7176_s19, %s7172_s18  ;;  %p149_p4 = scmp.eq.s32.totalorder %s5567_s23, 1 }
   0xc   : > { %s7266_s27 = scalar_select %p130_p1, %s7180_s20, %s132_s25  }
   0xd   : > { %p7268_p5 = por %p143_p2, %p142_p0  ;;  %p7272_p6 = por %p149_p4, %p148_p3 }
   0xe   : > { %p5568_p7 = scmp.ge.s32.totalorder %s7184_s21, 1  ;;  %p156_p8 = scmp.lt.s32.totalorder %s7184_s21, 3 }
   0xf   : > { %s8940_s28 = scalar_select %p7268_p5, 1, 0 }
  0x10   : > { %s8941_s29 = scalar_select %p7272_p6, 1, 0 }
  0x11   : > { %p8936_p9 = scmp.eq.s32.totalorder %s7251_s22, 0  ;;  %p7279_p10 = pnand %p5568_p7, %p156_p8 }
  0x12   : > { %s7186_s6 = smov [#allocation5]   ;;  %s7187_s9 = smov [#allocation2]  }
  0x13   : > { %s8942_s30 = scalar_select %p7279_p10, 1, 0 }
  0x14   : > { %s181_s7 = sshll.u32 %s7186_s6, 4  ;;  %p6868_p11 = pneg %p7279_p10  ;;  %s182_s7 = int_to_ptr.vmem [resolvable:$true] %s181_s7 }
  0x15   : > { %s168_s10 = sshll.u32 %s7187_s9, 4  ;;  %s8944_s1 = sld [smem:[#allocation12_spill]]  ;;  %s7291_s10 = int_to_ptr.vmem [resolvable:$true] %s168_s10 }
  0x16   : > { %p7287_p12 = pnand %p8936_p9, %p6868_p11 }
  0x18   : > { %p7301_p0 = pneg %p7287_p12 }
  0x1b   : > { %s7030_s13 = scalar_lea.hbm %s8944_s1, 18432 }
  0x1c   : > { %p7031_p13 = scmp.ne.s32.totalorder %s8944_s1, %s7030_s13  ;;  %p7037_p3 = scmp.lt.u32.totalorder %s7030_s13, %s8944_s1 }
  0x1e   : > { %p7033_p1 = pnand %p7301_p0, %p7031_p13 }
  0x20   : > { %p7034_p2 = pneg %p7033_p1 }
  0x22   : > { %p7039_p4 = pnand %p7037_p3, %p7034_p2 }
  0x24   : > { %7042 = shalt.err (!%p7039_p4)
}
  0x25   : > { %s7043_s25 = scalar_lea.vmem %s182_s7, 18432  ;;  %p7051_p9 = scmp.lt.s32.totalorder %s182_s7, %s182_s7 }
  0x26   : > { %p7044_p7 = scmp.ne.s32.totalorder %s182_s7, %s7043_s25  ;;  %p7052_p6 = scmp.lt.s32.totalorder %s7043_s25, %s7043_s25 }
  0x28   : > { %p7046_p8 = pnand %p7044_p7, %p7301_p0  ;;  %p7053_p5 = por %p7052_p6, %p7051_p9 }
  0x2a   : > { %p7047_p11 = pneg %p7046_p8 }
  0x2c   : > { %p7054_p10 = pnand %p7053_p5, %p7047_p11 }
  0x2e   : > { %7057 = shalt.err (!%p7054_p10)
}
  0x2f   : > { %s7188_s26 = smov 512   ;;  %s7189_s6 = smov 32  }
  0x30   : > { %6874 = dma.hbm_to_vmem [thread:$0]  (!%p7287_p12), %s8944_s1, 18432, %s182_s7, [#allocation6], %s7188_s26, %s7188_s26, %s7189_s6  }
  0x31   : > { %s7058_s14 = scalar_lea.hbm %s8930_s0, 6912 }
  0x32   : > { %p7059_p13 = scmp.ne.s32.totalorder %s8930_s0, %s7058_s14  ;;  %p7065_p9 = scmp.lt.u32.totalorder %s7058_s14, %s8930_s0 }
  0x34   : > { %p7061_p5 = pnand %p7059_p13, %p7301_p0 }
  0x36   : > { %p7062_p6 = pneg %p7061_p5 }
  0x38   : > { %p7067_p10 = pnand %p7065_p9, %p7062_p6 }
  0x3a   : > { %7070 = shalt.err (!%p7067_p10)
}
  0x3b   : > { %s7071_s7 = scalar_lea.vmem %s7291_s10, 6912  ;;  %p7079_p4 = scmp.lt.s32.totalorder %s7291_s10, %s7291_s10 }
  0x3c   : > { %p7072_p1 = scmp.ne.s32.totalorder %s7291_s10, %s7071_s7  ;;  %p7080_p7 = scmp.lt.s32.totalorder %s7071_s7, %s7071_s7 }
  0x3e   : > { %p7074_p2 = pnand %p7072_p1, %p7301_p0  ;;  %p7081_p8 = por %p7080_p7, %p7079_p4 }
  0x40   : > { %p7075_p3 = pneg %p7074_p2 }
  0x42   : > { %p7082_p11 = pnand %p7081_p8, %p7075_p3 }
  0x44   : > { %7085 = shalt.err (!%p7082_p11)
}
  0x45   : > { %s7190_s26 = smov 128   ;;  %s7191_s6 = smov 8  }
  0x46   : > { %6871 = dma.hbm_to_vmem [thread:$0]  (!%p7287_p12), %s8930_s0, 6912, %s7291_s10, [#allocation3], %s7190_s26, %s7190_s26, %s7191_s6  }
  0x47   : > { %s7192_s12 = smov [#allocation7]   ;;  %s7086_s17 = scalar_lea.hbm %s8933_s3, 8192 }
  0x48   : > { %s197_s13 = sshll.u32 %s7192_s12, 4  ;;  %p7087_p13 = scmp.ne.s32.totalorder %s8933_s3, %s7086_s17  ;;  %s198_s13 = int_to_ptr.vmem [resolvable:$true] %s197_s13 }
  0x49   : > { %p7093_p9 = scmp.lt.u32.totalorder %s7086_s17, %s8933_s3 }
  0x4a   : > { %p7089_p5 = pnand %p7087_p13, %p7301_p0 }
  0x4c   : > { %p7090_p6 = pneg %p7089_p5 }
  0x4e   : > { %p7095_p10 = pnand %p7093_p9, %p7090_p6 }
  0x50   : > { %7098 = shalt.err (!%p7095_p10)
}
  0x51   : > { %s7099_s10 = scalar_lea.vmem %s198_s13, 8192  ;;  %p7107_p4 = scmp.lt.s32.totalorder %s198_s13, %s198_s13 }
  0x52   : > { %p7100_p1 = scmp.ne.s32.totalorder %s198_s13, %s7099_s10  ;;  %p7108_p7 = scmp.lt.s32.totalorder %s7099_s10, %s7099_s10 }
  0x54   : > { %p7102_p2 = pnand %p7100_p1, %p7301_p0  ;;  %p7109_p8 = por %p7108_p7, %p7107_p4 }
  0x56   : > { %p7103_p3 = pneg %p7102_p2 }
  0x58   : > { %p7110_p11 = pnand %p7109_p8, %p7103_p3 }
  0x5a   : > { %7113 = shalt.err (!%p7110_p11)
}
  0x5b   : > { %6877 = dma.hbm_to_vmem [thread:$0]  (!%p7287_p12), %s8933_s3, 8192, %s198_s13, [#allocation6], %s7190_s26, %s7190_s26, %s7191_s6  }
  0x5c   : > { %p8946_p13 = scmp.ne.s32.totalorder %s8942_s30, 0 }
  0x5d   : > { %p8947_p5 = scmp.eq.s32.totalorder (!%p8946_p13), %s7251_s22, 0 }
  0x5e   : > { %216 = sbr.rel (%p8946_p13) target bundleno = 1751 (0x6d7), region = 40 }
  0x65   : > { %7159 = dma.done.wait (%p8947_p5), [#allocation3], 6912   ;;  %p8948_p0 = pmov %p8947_p5 }
  0x67   : > { %7161 = vsyncadd (%p8948_p0), [#allocation3], 4294960384  ;;  %p8949_p6 = pmov %p8948_p0 }
  0x68   : > { %p8950_p9 = pmov %p8948_p0 }
  0x69   : > { %7163 = dma.done.wait (%p8949_p6), [#allocation6], 26624  }
  0x6a   : > { %7165 = vsyncadd (%p8950_p9), [#allocation6], 4294940672  ;;  %v7193_v0 = vmov 0.0   ;;  %v300_v1 = vld [vmem:[#allocation5 + $0x88] sm:$0xff]  ;;  %v302_v3 = vld [vmem:[#allocation5 + $0x98] sm:$0xff]  ;;  %s5578_s1 = smul.u32 192, %s7251_s22 }
  0x6b   : > { %428 = vmatprep.mubr.f32.mxu0 %v7193_v0  ;;  %589 = vmatprep.mubr.f32.mxu1 %v7193_v0  ;;  %v304_v2 = vld [vmem:[#allocation5 + $0xa8] sm:$0xff]  ;;  %v306_v5 = vld [vmem:[#allocation5 + $0xb8] sm:$0xff]  ;;  %v299_v6 = vld [vmem:[#allocation5 + $0x80] sm:$0xff]  ;;  %vm315_vm0 = vcmask 261120   ;;  %s7194_s12 = smov 119   ;;  %s7195_s13 = smov 9  }
  0x6c   : > { %v6134_v4 = vpack.c.bf16 %v304_v2, %v300_v1  ;;  %v303_v7 = vld [vmem:[#allocation5 + $0xa0] sm:$0xff]  ;;  %v6142_v8 = vpack.c.bf16 %v306_v5, %v302_v3  ;;  %v301_v10 = vld [vmem:[#allocation5 + $0x90] sm:$0xff]  ;;  %v308_v12 = vld [vmem:[#allocation5 + $0xc8] sm:$0xff]  ;;  %s7373_s30 = scalar_lea.vmem [#allocation2], %s5578_s1  ;;  %s7196_s14 = smov 54   ;;  %vm5395_vm1 = vcmask 441344  }
  0x6d   : > { %v6136_v9 = vpack.c.bf16 %v303_v7, %v299_v6  ;;  %v305_v11 = vld [vmem:[#allocation5 + $0xb0] sm:$0xff]  ;;  %v312_v14 = vld [vmem:[#allocation5 + $0xe8] sm:$0xff]  ;;  %v310_v15 = vld [vmem:[#allocation5 + $0xd8] sm:$0xff]  ;;  %s244_s15 = sand.u32 1, %s7176_s19   ;;  %vm5412_vm2 = vcmask 515072   ;;  %vm5429_vm3 = vcmask 588800  }
  0x6e   : > { %6135 = vmatprep.subr.bf16.mxu0 %v6134_v4  ;;  %v6144_v13 = vpack.c.bf16 %v305_v11, %v301_v10  ;;  %v314_v16 = vld [vmem:[#allocation5 + $0xf8] sm:$0xff]  ;;  %6143 = vmatprep.subr.bf16.mxu1 %v6142_v8  ;;  %v6138_v17 = vpack.c.bf16 %v312_v14, %v308_v12  ;;  %v307_v19 = vld [vmem:[#allocation5 + $0xc0] sm:$0xff]  ;;  %v309_v21 = vld [vmem:[#allocation5 + $0xd0] sm:$0xff]  ;;  %s5576_s17 = sshll.u32 %s244_s15, 7  ;;  %s5973_s25 = sshll.u32 %s7251_s22, 11 }
  0x6f   : > { %6137 = vmatpush1.bf16.msra.mxu0 %v6136_v9  ;;  %v6146_v18 = vpack.c.bf16 %v314_v16, %v310_v15  ;;  %v311_v20 = vld [vmem:[#allocation5 + $0xe0] sm:$0xff]  ;;  %v313_v23 = vld [vmem:[#allocation5 + $0xf0] sm:$0xff]  ;;  %v268_v24 = vld [vmem:[#allocation5 + $0x8] sm:$0xff]  ;;  %s8793_s23 = scalar_lea.vmem [#allocation8], %s5576_s17  ;;  %s8880_s11 = scalar_lea.hbm %s8935_s5, %s5973_s25 }
  0x70   : > { %6145 = vmatpush1.bf16.msra.mxu1 %v6144_v13  ;;  %v6140_v22 = vpack.c.bf16 %v311_v20, %v307_v19  ;;  %6139 = vmatprep.subr.bf16.mxu0 %v6138_v17  ;;  %v6148_v25 = vpack.c.bf16 %v313_v23, %v309_v21  ;;  %v272_v26 = vld [vmem:[#allocation5 + $0x28] sm:$0xff]  ;;  %v267_v27 = vld [vmem:[#allocation5] sm:$0xff]  ;;  %v270_v30 = vld [vmem:[#allocation5 + $0x18] sm:$0xff]  ;;  %s5476_s7 = sshll.u32 %s8793_s23, 4  ;;  %s8889_s22 = scalar_lea.sflag [#allocation4], %s244_s15  ;;  %s8882_s7 = int_to_ptr.vmem [resolvable:$true] %s5476_s7 }
  0x71   : > { %6147 = vmatprep.subr.bf16.mxu1 %v6146_v18  ;;  %v271_v28 = vld [vmem:[#allocation5 + $0x20] sm:$0xff]  ;;  %v6150_v29 = vpack.c.bf16 %v272_v26, %v268_v24  ;;  %v274_v31 = vld [vmem:[#allocation5 + $0x38] sm:$0xff]  ;;  %v269_v32 = vld [vmem:[#allocation5 + $0x10] sm:$0xff]  ;;  %s7114_s1 = scalar_lea.vmem %s8882_s7, 2048  ;;  %p8951_p10 = scmp.ne.s32.totalorder %s8940_s28, 0 }
  0x72   : > { %v283_v33 = vld [vmem:[%s7373_s30 + $0x1] sm:$0xff]  ;;  %v6152_v34 = vpack.c.bf16 %v271_v28, %v267_v27  ;;  %v6158_v35 = vpack.c.bf16 %v274_v31, %v270_v30  ;;  %v284_v38 = vld [vmem:[%s7373_s30 + $0x9] sm:$0xff]  ;;  %v276_v39 = vld [vmem:[#allocation5 + $0x48] sm:$0xff]  ;;  %p7115_p12 = scmp.ne.s32.totalorder %s8882_s7, %s7114_s1 }
  0x73   : > { %6141 = vmatpush1.bf16.msra.mxu0 %v6140_v22  ;;  %v273_v36 = vld [vmem:[#allocation5 + $0x30] sm:$0xff]  ;;  %v280_v40 = vld [vmem:[#allocation5 + $0x68] sm:$0xff]  ;;  %v275_v41 = vld [vmem:[#allocation5 + $0x40] sm:$0xff] }
  0x74   : > { %6149 = vmatpush1.bf16.msra.mxu1 %v6148_v25  ;;  %6151 = vmatprep.subr.bf16.mxu0 %v6150_v29  ;;  %v6160_v37 = vpack.c.bf16 %v273_v36, %v269_v32  ;;  %v6154_v42 = vpack.c.bf16 %v280_v40, %v276_v39  ;;  %v279_v43 = vld [vmem:[#allocation5 + $0x60] sm:$0xff]  ;;  %v278_v44 = vld [vmem:[#allocation5 + $0x58] sm:$0xff]  ;;  %v277_v48 = vld [vmem:[#allocation5 + $0x50] sm:$0xff]  ;;  %p7116_p1 = pnand %p7115_p12, %p8951_p10 }
  0x75   : > { %6159 = vmatprep.subr.bf16.mxu1 %v6158_v35  ;;  %v282_v45 = vld [vmem:[#allocation5 + $0x78] sm:$0xff]  ;;  %v6156_v46 = vpack.c.bf16 %v279_v43, %v275_v41  ;;  %v281_v49 = vld [vmem:[#allocation5 + $0x70] sm:$0xff]  ;;  %v1073_v52 = vld [vmem:[#allocation5 + $0x108] sm:$0xff] }
  0x76   : > { %5579 = vmatmul.mubr.msk.f32.vlgmr.msra.gmra.mrb[0].mxu0 %vm315_vm0, %v283_v33  ;;  %v6162_v47 = vpack.c.bf16 %v282_v45, %v278_v44  ;;  %v6164_v50 = vpack.c.bf16 %v281_v49, %v277_v48  ;;  %v7385_v51 = vld [vmem:[%s7373_s30 + $0x19] sm:$0xff]  ;;  %v1075_v55 = vld [vmem:[#allocation5 + $0x118] sm:$0xff]  ;;  %v7403_v59 = vld [vmem:[%s7373_s30 + $0x31] sm:$0xff]  ;;  %p7117_p2 = pneg %p7116_p1 }
  0x77   : > { %5595 = vmatmul.mubr.msk.f32.vlgmr.msra.gmra.mrb[0].mxu1 %vm315_vm0, %v283_v33  ;;  %6153 = vmatpush1.bf16.msra.mxu0 %v6152_v34  ;;  %v1077_v53 = vld [vmem:[#allocation5 + $0x128] sm:$0xff]  ;;  %v1079_v56 = vld [vmem:[#allocation5 + $0x138] sm:$0xff]  ;;  %v1072_v8 = vld [vmem:[#allocation5 + $0x100] sm:$0xff] }
  0x78   : > { %434 = vmatprep.mubr.f32.mxu0 %v7193_v0  ;;  %595 = vmatprep.mubr.f32.mxu1 %v7193_v0  ;;  %v6166_v54 = vpack.c.bf16 %v1077_v53, %v1073_v52  ;;  %v6174_v57 = vpack.c.bf16 %v1079_v56, %v1075_v55  ;;  %v7394_v58 = vld [vmem:[%s7373_s30 + $0x21] sm:$0xff]  ;;  %v7412_v60 = vld [vmem:[%s7373_s30 + $0x39] sm:$0xff]  ;;  %v7421_v61 = vld [vmem:[%s7373_s30 + $0x49] sm:$0xff] }
  0x79   : > { %6161 = vmatpush1.bf16.msra.mxu1 %v6160_v37  ;;  %6155 = vmatprep.subr.bf16.mxu0 %v6154_v42  ;;  %v7430_v62 = vld [vmem:[%s7373_s30 + $0x51] sm:$0xff]  ;;  %v7439_v63 = vld [vmem:[%s7373_s30 + $0x61] sm:$0xff]  ;;  %v7448_v1 = vld [vmem:[%s7373_s30 + $0x69] sm:$0xff] }
  0x7a   : > { %5580 = vmatmul.mubr.msk.f32.gmra.mrb[2].mxu0 %vm315_vm0, %v284_v38  ;;  %6163 = vmatprep.subr.bf16.mxu1 %v6162_v47  ;;  %v7457_v2 = vld [vmem:[%s7373_s30 + $0x79] sm:$0xff]  ;;  %v7466_v3 = vld [vmem:[%s7373_s30 + $0x81] sm:$0xff]  ;;  %v7475_v4 = vld [vmem:[%s7373_s30 + $0x91] sm:$0xff] }
  0x7b   : > { %5596 = vmatmul.mubr.msk.f32.gmra.mrb[2].mxu1 %vm315_vm0, %v284_v38  ;;  %440 = vmatprep.mubr.f32.mxu0 %v7193_v0  ;;  %v7484_v5 = vld [vmem:[%s7373_s30 + $0x99] sm:$0xff]  ;;  %v7493_v6 = vld [vmem:[%s7373_s30 + $0xa9] sm:$0xff]  ;;  %v7502_v7 = vld [vmem:[%s7373_s30 + $0xb1] sm:$0xff] }
  0x7c   : > { %601 = vmatprep.mubr.f32.mxu1 %v7193_v0  ;;  %6157 = vmatpush1.bf16.msra.mxu0 %v6156_v46  ;;  %v1076_v9 = vld [vmem:[#allocation5 + $0x120] sm:$0xff]  ;;  %v1074_v10 = vld [vmem:[#allocation5 + $0x110] sm:$0xff]  ;;  %v1081_v12 = vld [vmem:[#allocation5 + $0x148] sm:$0xff] }
  0x7d   : > { %6165 = vmatpush1.bf16.msra.mxu1 %v6164_v50  ;;  %6167 = vmatprep.subr.bf16.mxu0 %v6166_v54  ;;  %v1078_v11 = vld [vmem:[#allocation5 + $0x130] sm:$0xff]  ;;  %v1085_v13 = vld [vmem:[#allocation5 + $0x168] sm:$0xff]  ;;  %v6168_v15 = vpack.c.bf16 %v1076_v9, %v1072_v8  ;;  %v1083_v16 = vld [vmem:[#allocation5 + $0x158] sm:$0xff] }
  0x7e   : > { %5581 = vmatmul.mubr.msk.f32.gmra.mrb[4].mxu0 %vm315_vm0, %v7385_v51  ;;  %6175 = vmatprep.subr.bf16.mxu1 %v6174_v57  ;;  %v251_v14 = vld [vmem:[%s7373_s30] sm:$0xff]  ;;  %v1087_v17 = vld [vmem:[#allocation5 + $0x178] sm:$0xff]  ;;  %v6176_v18 = vpack.c.bf16 %v1078_v11, %v1074_v10  ;;  %v6170_v19 = vpack.c.bf16 %v1085_v13, %v1081_v12  ;;  %v1080_v20 = vld [vmem:[#allocation5 + $0x140] sm:$0xff] }
  0x7f   : > { %5597 = vmatmul.mubr.msk.f32.gmra.mrb[4].mxu1 %vm315_vm0, %v7385_v51  ;;  %446 = vmatprep.mubr.f32.mxu0 %v7193_v0  ;;  %v1084_v21 = vld [vmem:[#allocation5 + $0x160] sm:$0xff]  ;;  %v1082_v22 = vld [vmem:[#allocation5 + $0x150] sm:$0xff]  ;;  %v6178_v23 = vpack.c.bf16 %v1087_v17, %v1083_v16  ;;  %v1542_v25 = vld [vmem:[#allocation5 + $0x188] sm:$0xff] }
  0x80   : > { %607 = vmatprep.mubr.f32.mxu1 %v7193_v0  ;;  %v1086_v24 = vld [vmem:[#allocation5 + $0x170] sm:$0xff]  ;;  %v1546_v26 = vld [vmem:[#allocation5 + $0x1a8] sm:$0xff]  ;;  %v252_v27 = vld [vmem:[%s7373_s30 + $0x8] sm:$0xff]  ;;  %v6172_v30 = vpack.c.bf16 %v1084_v21, %v1080_v20 }
  0x81   : > { %v1544_v28 = vld [vmem:[#allocation5 + $0x198] sm:$0xff]  ;;  %v6180_v31 = vpack.c.bf16 %v1086_v24, %v1082_v22  ;;  %v6182_v32 = vpack.c.bf16 %v1546_v26, %v1542_v25  ;;  %v7521_v34 = vld [vmem:[%s7373_s30 + $0x18] sm:$0xff]  ;;  %v7530_v35 = vld [vmem:[%s7373_s30 + $0x20] sm:$0xff] }
  0x82   : > { %5582 = vmatmul.mubr.msk.f32.gmra.mrb[6].mxu0 %vm315_vm0, %v7394_v58  ;;  %v1548_v29 = vld [vmem:[#allocation5 + $0x1b8] sm:$0xff]  ;;  %v7539_v36 = vld [vmem:[%s7373_s30 + $0x30] sm:$0xff]  ;;  %v7548_v37 = vld [vmem:[%s7373_s30 + $0x38] sm:$0xff] }
  0x83   : > { %5598 = vmatmul.mubr.msk.f32.gmra.mrb[6].mxu1 %vm315_vm0, %v7394_v58  ;;  %452 = vmatprep.mubr.f32.mxu0 %v7193_v0  ;;  %v6190_v33 = vpack.c.bf16 %v1548_v29, %v1544_v28  ;;  %v7557_v38 = vld [vmem:[%s7373_s30 + $0x48] sm:$0xff]  ;;  %v7566_v39 = vld [vmem:[%s7373_s30 + $0x50] sm:$0xff]  ;;  %v7575_v40 = vld [vmem:[%s7373_s30 + $0x60] sm:$0xff] }
  0x84   : > { %613 = vmatprep.mubr.f32.mxu1 %v7193_v0  ;;  %v7584_v41 = vld [vmem:[%s7373_s30 + $0x68] sm:$0xff]  ;;  %v7593_v42 = vld [vmem:[%s7373_s30 + $0x78] sm:$0xff]  ;;  %v7602_v43 = vld [vmem:[%s7373_s30 + $0x80] sm:$0xff] }
  0x85   : > { %v7611_v44 = vld [vmem:[%s7373_s30 + $0x90] sm:$0xff]  ;;  %v7620_v45 = vld [vmem:[%s7373_s30 + $0x98] sm:$0xff]  ;;  %v7629_v46 = vld [vmem:[%s7373_s30 + $0xa8] sm:$0xff] }
  0x86   : > { %5583 = vmatmul.mubr.msk.f32.gmra.mrb[8].mxu0 %vm315_vm0, %v7403_v59  ;;  %v7638_v47 = vld [vmem:[%s7373_s30 + $0xb0] sm:$0xff]  ;;  %v1543_v50 = vld [vmem:[#allocation5 + $0x190] sm:$0xff]  ;;  %v1550_v53 = vld [vmem:[#allocation5 + $0x1c8] sm:$0xff] }
  0x87   : > { %5599 = vmatmul.mubr.msk.f32.gmra.mrb[8].mxu1 %vm315_vm0, %v7403_v59  ;;  %458 = vmatprep.mubr.f32.mxu0 %v7193_v0  ;;  %v1541_v48 = vld [vmem:[#allocation5 + $0x180] sm:$0xff]  ;;  %v1547_v52 = vld [vmem:[#allocation5 + $0x1b0] sm:$0xff]  ;;  %v1554_v54 = vld [vmem:[#allocation5 + $0x1e8] sm:$0xff] }
  0x88   : > { %619 = vmatprep.mubr.f32.mxu1 %v7193_v0  ;;  %v1545_v49 = vld [vmem:[#allocation5 + $0x1a0] sm:$0xff]  ;;  %v1056_v55 = vld [vmem:[%s7373_s30 + $0x2] sm:$0xff]  ;;  %v6192_v9 = vpack.c.bf16 %v1547_v52, %v1543_v50  ;;  %v6186_v10 = vpack.c.bf16 %v1554_v54, %v1550_v53  ;;  %v2008_v16 = vld [vmem:[#allocation5 + $0x208] sm:$0xff] }
  0x89   : > { %v6184_v56 = vpack.c.bf16 %v1545_v49, %v1541_v48  ;;  %v1552_v57 = vld [vmem:[#allocation5 + $0x1d8] sm:$0xff]  ;;  %v1549_v11 = vld [vmem:[#allocation5 + $0x1c0] sm:$0xff]  ;;  %v1551_v13 = vld [vmem:[#allocation5 + $0x1d0] sm:$0xff] }
  0x8a   : > { %5584 = vmatmul.mubr.msk.f32.gmra.mrb[10].mxu0 %vm315_vm0, %v7412_v60  ;;  %v1556_v8 = vld [vmem:[#allocation5 + $0x1f8] sm:$0xff]  ;;  %v1553_v12 = vld [vmem:[#allocation5 + $0x1e0] sm:$0xff]  ;;  %v2012_v17 = vld [vmem:[#allocation5 + $0x228] sm:$0xff] }
  0x8b   : > { %5600 = vmatmul.mubr.msk.f32.gmra.mrb[10].mxu1 %vm315_vm0, %v7412_v60  ;;  %464 = vmatprep.mubr.f32.mxu0 %v7193_v0  ;;  %v2014_v20 = vld [vmem:[#allocation5 + $0x238] sm:$0xff]  ;;  %v6188_v21 = vpack.c.bf16 %v1553_v12, %v1549_v11  ;;  %v7657_v25 = vld [vmem:[%s7373_s30 + $0x1a] sm:$0xff]  ;;  %v7747_v49 = vld [vmem:[%s7373_s30 + $0x92] sm:$0xff] }
  0x8c   : > { %625 = vmatprep.mubr.f32.mxu1 %v7193_v0  ;;  %v7666_v26 = vld [vmem:[%s7373_s30 + $0x22] sm:$0xff]  ;;  %v7684_v28 = vld [vmem:[%s7373_s30 + $0x3a] sm:$0xff]  ;;  %v7693_v29 = vld [vmem:[%s7373_s30 + $0x4a] sm:$0xff] }
  0x8d   : > { %v7738_v48 = vld [vmem:[%s7373_s30 + $0x82] sm:$0xff]  ;;  %v7756_v50 = vld [vmem:[%s7373_s30 + $0x9a] sm:$0xff]  ;;  %v7765_v52 = vld [vmem:[%s7373_s30 + $0xaa] sm:$0xff] }
  0x8e   : > { %5585 = vmatmul.mubr.msk.f32.gmra.mrb[12].mxu0 %vm315_vm0, %v7421_v61  ;;  %v7774_v53 = vld [vmem:[%s7373_s30 + $0xb2] sm:$0xff]  ;;  %v2018_v11 = vld [vmem:[#allocation5 + $0x258] sm:$0xff] }
  0x8f   : > { %5601 = vmatmul.mubr.msk.f32.gmra.mrb[12].mxu1 %vm315_vm0, %v7421_v61  ;;  %470 = vmatprep.mubr.f32.mxu0 %v7193_v0  ;;  %v2007_v54 = vld [vmem:[#allocation5 + $0x200] sm:$0xff]  ;;  %v2022_v12 = vld [vmem:[#allocation5 + $0x278] sm:$0xff] }
  0x90   : > { %631 = vmatprep.mubr.f32.mxu1 %v7193_v0 }
  0x92   : > { %5586 = vmatmul.mubr.msk.f32.gmra.mrb[14].mxu0 %vm315_vm0, %v7430_v62 }
  0x93   : > { %5602 = vmatmul.mubr.msk.f32.gmra.mrb[14].mxu1 %vm315_vm0, %v7430_v62  ;;  %476 = vmatprep.mubr.f32.mxu0 %v7193_v0 }
  0x94   : > { %637 = vmatprep.mubr.f32.mxu1 %v7193_v0 }
  0x96   : > { %5587 = vmatmul.mubr.msk.f32.gmra.mrb[16].mxu0 %vm315_vm0, %v7439_v63 }
  0x97   : > { %5603 = vmatmul.mubr.msk.f32.gmra.mrb[16].mxu1 %vm315_vm0, %v7439_v63  ;;  %482 = vmatprep.mubr.f32.mxu0 %v7193_v0 }
  0x98   : > { %643 = vmatprep.mubr.f32.mxu1 %v7193_v0 }
  0x9a   : > { %5588 = vmatmul.mubr.msk.f32.gmra.mrb[18].mxu0 %vm315_vm0, %v7448_v1 }
  0x9b   : > { %5604 = vmatmul.mubr.msk.f32.gmra.mrb[18].mxu1 %vm315_vm0, %v7448_v1  ;;  %488 = vmatprep.mubr.f32.mxu0 %v7193_v0 }
  0x9c   : > { %649 = vmatprep.mubr.f32.mxu1 %v7193_v0 }
  0x9e   : > { %5589 = vmatmul.mubr.msk.f32.gmra.mrb[20].mxu0 %vm315_vm0, %v7457_v2 }
  0x9f   : > { %5605 = vmatmul.mubr.msk.f32.gmra.mrb[20].mxu1 %vm315_vm0, %v7457_v2  ;;  %494 = vmatprep.mubr.f32.mxu0 %v7193_v0 }
  0xa0   : > { %655 = vmatprep.mubr.f32.mxu1 %v7193_v0 }
  0xa2   : > { %5590 = vmatmul.mubr.msk.f32.gmra.mrb[22].mxu0 %vm315_vm0, %v7466_v3 }
  0xa3   : > { %5606 = vmatmul.mubr.msk.f32.gmra.mrb[22].mxu1 %vm315_vm0, %v7466_v3  ;;  %500 = vmatprep.mubr.f32.mxu0 %v7193_v0 }
  0xa4   : > { %661 = vmatprep.mubr.f32.mxu1 %v7193_v0 }
  0xa6   : > { %5591 = vmatmul.mubr.msk.f32.gmra.mrb[24].mxu0 %vm315_vm0, %v7475_v4 }
  0xa7   : > { %5607 = vmatmul.mubr.msk.f32.gmra.mrb[24].mxu1 %vm315_vm0, %v7475_v4  ;;  %506 = vmatprep.mubr.f32.mxu0 %v7193_v0 }
  0xa8   : > { %667 = vmatprep.mubr.f32.mxu1 %v7193_v0 }
  0xaa   : > { %5592 = vmatmul.mubr.msk.f32.gmra.mrb[26].mxu0 %vm315_vm0, %v7484_v5 }
  0xab   : > { %5608 = vmatmul.mubr.msk.f32.gmra.mrb[26].mxu1 %vm315_vm0, %v7484_v5  ;;  %512 = vmatprep.mubr.f32.mxu0 %v7193_v0 }
  0xac   : > { %673 = vmatprep.mubr.f32.mxu1 %v7193_v0 }
  0xae   : > { %5593 = vmatmul.mubr.msk.f32.gmra.mrb[28].mxu0 %vm315_vm0, %v7493_v6 }
  0xaf   : > { %5609 = vmatmul.mubr.msk.f32.gmra.mrb[28].mxu1 %vm315_vm0, %v7493_v6  ;;  %518 = vmatprep.mubr.f32.mxu0 %v7193_v0 }
  0xb0   : > { %679 = vmatprep.mubr.f32.mxu1 %v7193_v0 }
  0xb2   : > { %5594 = vmatmul.mubr.msk.f32.gmra.mrb[30].mxu0 %vm315_vm0, %v7502_v7 }
  0xb3   : > { %5610 = vmatmul.mubr.msk.f32.gmra.mrb[30].mxu1 %vm315_vm0, %v7502_v7  ;;  %798 = vmatprep.mubr.f32.mxu0 %v7193_v0 }
  0xb4   : > { %959 = vmatprep.mubr.f32.mxu1 %v7193_v0 }
  0xb6   : > { %5611 = vmatmul.mubr.msk.f32.vlgmr.msra.gmra.mrb[0].mxu0 %vm315_vm0, %v251_v14 }
  0xb7   : > { %5627 = vmatmul.mubr.msk.f32.vlgmr.msra.gmra.mrb[0].mxu1 %vm315_vm0, %v251_v14  ;;  %6169 = vmatpush1.bf16.msra.mxu0 %v6168_v15  ;;  %v6194_v14 = vpack.c.bf16 %v1556_v8, %v1552_v57  ;;  %v1555_v15 = vld [vmem:[#allocation5 + $0x1f0] sm:$0xff]  ;;  %v2016_v8 = vld [vmem:[#allocation5 + $0x248] sm:$0xff] }
  0xb8   : > { %804 = vmatprep.mubr.f32.mxu0 %v7193_v0  ;;  %965 = vmatprep.mubr.f32.mxu1 %v7193_v0  ;;  %v6196_v22 = vpack.c.bf16 %v1555_v15, %v1551_v13  ;;  %v2013_v57 = vld [vmem:[#allocation5 + $0x230] sm:$0xff]  ;;  %v2015_v15 = vld [vmem:[#allocation5 + $0x240] sm:$0xff] }
  0xb9   : > { %6177 = vmatpush1.bf16.msra.mxu1 %v6176_v18  ;;  %6171 = vmatprep.subr.bf16.mxu0 %v6170_v19  ;;  %v1057_v18 = vld [vmem:[%s7373_s30 + $0xa] sm:$0xff] }
  0xba   : > { %5612 = vmatmul.mubr.msk.f32.gmra.mrb[2].mxu0 %vm315_vm0, %v252_v27  ;;  %6179 = vmatprep.subr.bf16.mxu1 %v6178_v23  ;;  %v2010_v19 = vld [vmem:[#allocation5 + $0x218] sm:$0xff]  ;;  %v6198_v23 = vpack.c.bf16 %v2012_v17, %v2008_v16  ;;  %v2019_v16 = vld [vmem:[#allocation5 + $0x260] sm:$0xff]  ;;  %v2017_v17 = vld [vmem:[#allocation5 + $0x250] sm:$0xff] }
  0xbb   : > { %5628 = vmatmul.mubr.msk.f32.gmra.mrb[2].mxu1 %vm315_vm0, %v252_v27  ;;  %810 = vmatprep.mubr.f32.mxu0 %v7193_v0  ;;  %v6206_v24 = vpack.c.bf16 %v2014_v20, %v2010_v19  ;;  %v7675_v27 = vld [vmem:[%s7373_s30 + $0x32] sm:$0xff]  ;;  %v2021_v19 = vld [vmem:[#allocation5 + $0x270] sm:$0xff] }
  0xbc   : > { %971 = vmatprep.mubr.f32.mxu1 %v7193_v0  ;;  %6173 = vmatpush1.bf16.msra.mxu0 %v6172_v30  ;;  %v7702_v30 = vld [vmem:[%s7373_s30 + $0x52] sm:$0xff] }
  0xbd   : > { %6181 = vmatpush1.bf16.msra.mxu1 %v6180_v31  ;;  %6183 = vmatprep.subr.bf16.mxu0 %v6182_v32  ;;  %v7711_v31 = vld [vmem:[%s7373_s30 + $0x62] sm:$0xff]  ;;  %v7720_v32 = vld [vmem:[%s7373_s30 + $0x6a] sm:$0xff]  ;;  %v2474_v20 = vld [vmem:[#allocation5 + $0x288] sm:$0xff] }
  0xbe   : > { %5613 = vmatmul.mubr.msk.f32.gmra.mrb[4].mxu0 %vm315_vm0, %v7521_v34  ;;  %6191 = vmatprep.subr.bf16.mxu1 %v6190_v33  ;;  %v7729_v33 = vld [vmem:[%s7373_s30 + $0x7a] sm:$0xff] }
  0xbf   : > { %5629 = vmatmul.mubr.msk.f32.gmra.mrb[4].mxu1 %vm315_vm0, %v7521_v34  ;;  %816 = vmatprep.mubr.f32.mxu0 %v7193_v0 }
  0xc0   : > { %977 = vmatprep.mubr.f32.mxu1 %v7193_v0 }
  0xc2   : > { %5614 = vmatmul.mubr.msk.f32.gmra.mrb[6].mxu0 %vm315_vm0, %v7530_v35 }
  0xc3   : > { %5630 = vmatmul.mubr.msk.f32.gmra.mrb[6].mxu1 %vm315_vm0, %v7530_v35  ;;  %822 = vmatprep.mubr.f32.mxu0 %v7193_v0 }
  0xc4   : > { %983 = vmatprep.mubr.f32.mxu1 %v7193_v0 }
  0xc6   : > { %5615 = vmatmul.mubr.msk.f32.gmra.mrb[8].mxu0 %vm315_vm0, %v7539_v36 }
  0xc7   : > { %5631 = vmatmul.mubr.msk.f32.gmra.mrb[8].mxu1 %vm315_vm0, %v7539_v36  ;;  %828 = vmatprep.mubr.f32.mxu0 %v7193_v0 }
  0xc8   : > { %989 = vmatprep.mubr.f32.mxu1 %v7193_v0 }
  0xca   : > { %5616 = vmatmul.mubr.msk.f32.gmra.mrb[10].mxu0 %vm315_vm0, %v7548_v37 }
  0xcb   : > { %5632 = vmatmul.mubr.msk.f32.gmra.mrb[10].mxu1 %vm315_vm0, %v7548_v37  ;;  %834 = vmatprep.mubr.f32.mxu0 %v7193_v0 }
  0xcc   : > { %995 = vmatprep.mubr.f32.mxu1 %v7193_v0 }
  0xce   : > { %5617 = vmatmul.mubr.msk.f32.gmra.mrb[12].mxu0 %vm315_vm0, %v7557_v38 }
  0xcf   : > { %5633 = vmatmul.mubr.msk.f32.gmra.mrb[12].mxu1 %vm315_vm0, %v7557_v38  ;;  %840 = vmatprep.mubr.f32.mxu0 %v7193_v0 }
  0xd0   : > { %1001 = vmatprep.mubr.f32.mxu1 %v7193_v0 }
  0xd2   : > { %5618 = vmatmul.mubr.msk.f32.gmra.mrb[14].mxu0 %vm315_vm0, %v7566_v39 }
  0xd3   : > { %5634 = vmatmul.mubr.msk.f32.gmra.mrb[14].mxu1 %vm315_vm0, %v7566_v39  ;;  %846 = vmatprep.mubr.f32.mxu0 %v7193_v0 }
  0xd4   : > { %1007 = vmatprep.mubr.f32.mxu1 %v7193_v0 }
  0xd6   : > { %5619 = vmatmul.mubr.msk.f32.gmra.mrb[16].mxu0 %vm315_vm0, %v7575_v40 }
  0xd7   : > { %5635 = vmatmul.mubr.msk.f32.gmra.mrb[16].mxu1 %vm315_vm0, %v7575_v40  ;;  %852 = vmatprep.mubr.f32.mxu0 %v7193_v0 }
  0xd8   : > { %1013 = vmatprep.mubr.f32.mxu1 %v7193_v0 }
  0xda   : > { %5620 = vmatmul.mubr.msk.f32.gmra.mrb[18].mxu0 %vm315_vm0, %v7584_v41 }
  0xdb   : > { %5636 = vmatmul.mubr.msk.f32.gmra.mrb[18].mxu1 %vm315_vm0, %v7584_v41  ;;  %858 = vmatprep.mubr.f32.mxu0 %v7193_v0 }
  0xdc   : > { %1019 = vmatprep.mubr.f32.mxu1 %v7193_v0 }
  0xde   : > { %5621 = vmatmul.mubr.msk.f32.gmra.mrb[20].mxu0 %vm315_vm0, %v7593_v42 }
  0xdf   : > { %5637 = vmatmul.mubr.msk.f32.gmra.mrb[20].mxu1 %vm315_vm0, %v7593_v42  ;;  %864 = vmatprep.mubr.f32.mxu0 %v7193_v0 }
  0xe0   : > { %1025 = vmatprep.mubr.f32.mxu1 %v7193_v0 }
  0xe2   : > { %5622 = vmatmul.mubr.msk.f32.gmra.mrb[22].mxu0 %vm315_vm0, %v7602_v43 }
  0xe3   : > { %5638 = vmatmul.mubr.msk.f32.gmra.mrb[22].mxu1 %vm315_vm0, %v7602_v43  ;;  %870 = vmatprep.mubr.f32.mxu0 %v7193_v0 }
  0xe4   : > { %1031 = vmatprep.mubr.f32.mxu1 %v7193_v0 }
  0xe6   : > { %5623 = vmatmul.mubr.msk.f32.gmra.mrb[24].mxu0 %vm315_vm0, %v7611_v44 }
  0xe7   : > { %5639 = vmatmul.mubr.msk.f32.gmra.mrb[24].mxu1 %vm315_vm0, %v7611_v44  ;;  %876 = vmatprep.mubr.f32.mxu0 %v7193_v0 }
  0xe8   : > { %1037 = vmatprep.mubr.f32.mxu1 %v7193_v0 }
  0xea   : > { %5624 = vmatmul.mubr.msk.f32.gmra.mrb[26].mxu0 %vm315_vm0, %v7620_v45 }
  0xeb   : > { %5640 = vmatmul.mubr.msk.f32.gmra.mrb[26].mxu1 %vm315_vm0, %v7620_v45  ;;  %882 = vmatprep.mubr.f32.mxu0 %v7193_v0 }
  0xec   : > { %1043 = vmatprep.mubr.f32.mxu1 %v7193_v0 }
  0xee   : > { %5625 = vmatmul.mubr.msk.f32.gmra.mrb[28].mxu0 %vm315_vm0, %v7629_v46 }
  0xef   : > { %5641 = vmatmul.mubr.msk.f32.gmra.mrb[28].mxu1 %vm315_vm0, %v7629_v46  ;;  %888 = vmatprep.mubr.f32.mxu0 %v7193_v0 }
  0xf0   : > { %1049 = vmatprep.mubr.f32.mxu1 %v7193_v0 }
  0xf2   : > { %5626 = vmatmul.mubr.msk.f32.gmra.mrb[30].mxu0 %vm315_vm0, %v7638_v47 }
  0xf3   : > { %5642 = vmatmul.mubr.msk.f32.gmra.mrb[30].mxu1 %vm315_vm0, %v7638_v47  ;;  %1200 = vmatprep.mubr.f32.mxu0 %v7193_v0 }
  0xf4   : > { %1361 = vmatprep.mubr.f32.mxu1 %v7193_v0 }
  0xf6   : > { %5643 = vmatmul.mubr.msk.f32.vlgmr.msra.gmra.mrb[0].mxu0 %vm315_vm0, %v1056_v55 }
  0xf7   : > { %5659 = vmatmul.mubr.msk.f32.vlgmr.msra.gmra.mrb[0].mxu1 %vm315_vm0, %v1056_v55  ;;  %6185 = vmatpush1.bf16.msra.mxu0 %v6184_v56  ;;  %v2011_v55 = vld [vmem:[#allocation5 + $0x220] sm:$0xff]  ;;  %v2009_v56 = vld [vmem:[#allocation5 + $0x210] sm:$0xff] }
  0xf8   : > { %1206 = vmatprep.mubr.f32.mxu0 %v7193_v0  ;;  %1367 = vmatprep.mubr.f32.mxu1 %v7193_v0  ;;  %v6208_v13 = vpack.c.bf16 %v2013_v57, %v2009_v56  ;;  %v2485_v57 = vld [vmem:[#allocation5 + $0x2e0] sm:$0xff] }
  0xf9   : > { %6193 = vmatpush1.bf16.msra.mxu1 %v6192_v9  ;;  %6187 = vmatprep.subr.bf16.mxu0 %v6186_v10  ;;  %v2020_v9 = vld [vmem:[#allocation5 + $0x268] sm:$0xff]  ;;  %v6200_v10 = vpack.c.bf16 %v2011_v55, %v2007_v54  ;;  %v6212_v54 = vpack.c.bf16 %v2021_v19, %v2017_v17  ;;  %v2954_v19 = vld [vmem:[#allocation5 + $0x360] sm:$0xff] }
  0xfa   : > { %5644 = vmatmul.mubr.msk.f32.gmra.mrb[2].mxu0 %vm315_vm0, %v1057_v18  ;;  %6195 = vmatprep.subr.bf16.mxu1 %v6194_v14  ;;  %v6202_v14 = vpack.c.bf16 %v2020_v9, %v2016_v8  ;;  %v2483_v8 = vld [vmem:[#allocation5 + $0x2d0] sm:$0xff] }
  0xfb   : > { %5660 = vmatmul.mubr.msk.f32.gmra.mrb[2].mxu1 %vm315_vm0, %v1057_v18  ;;  %1212 = vmatprep.mubr.f32.mxu0 %v7193_v0  ;;  %v6210_v18 = vpack.c.bf16 %v2022_v12, %v2018_v11  ;;  %v2943_v11 = vld [vmem:[#allocation5 + $0x308] sm:$0xff] }
  0xfc   : > { %1373 = vmatprep.mubr.f32.mxu1 %v7193_v0  ;;  %6189 = vmatpush1.bf16.msra.mxu0 %v6188_v21  ;;  %v2478_v21 = vld [vmem:[#allocation5 + $0x2a8] sm:$0xff] }
  0xfd   : > { %6197 = vmatpush1.bf16.msra.mxu1 %v6196_v22  ;;  %6199 = vmatprep.subr.bf16.mxu0 %v6198_v23  ;;  %v2476_v22 = vld [vmem:[#allocation5 + $0x298] sm:$0xff]  ;;  %v6214_v55 = vpack.c.bf16 %v2478_v21, %v2474_v20  ;;  %v2947_v12 = vld [vmem:[#allocation5 + $0x328] sm:$0xff]  ;;  %v2952_v20 = vld [vmem:[#allocation5 + $0x350] sm:$0xff] }
  0xfe   : > { %5645 = vmatmul.mubr.msk.f32.gmra.mrb[4].mxu0 %vm315_vm0, %v7657_v25  ;;  %6207 = vmatprep.subr.bf16.mxu1 %v6206_v24  ;;  %v2480_v23 = vld [vmem:[#allocation5 + $0x2b8] sm:$0xff]  ;;  %v6204_v24 = vpack.c.bf16 %v2019_v16, %v2015_v15  ;;  %v6230_v17 = vpack.c.bf16 %v2947_v12, %v2943_v11 }
  0xff   : > { %5661 = vmatmul.mubr.msk.f32.gmra.mrb[4].mxu1 %vm315_vm0, %v7657_v25  ;;  %1218 = vmatprep.mubr.f32.mxu0 %v7193_v0  ;;  %v6222_v56 = vpack.c.bf16 %v2480_v23, %v2476_v22  ;;  %v2956_v22 = vld [vmem:[#allocation5 + $0x370] sm:$0xff]  ;;  %v3409_v23 = vld [vmem:[#allocation5 + $0x388] sm:$0xff]  ;;  %v5825_v12 = vld [vmem:[%s7373_s30 + $0x48] sm:$0xff] }
 0x100   : > { %1379 = vmatprep.mubr.f32.mxu1 %v7193_v0 }
 0x102   : > { %5646 = vmatmul.mubr.msk.f32.gmra.mrb[6].mxu0 %vm315_vm0, %v7666_v26 }
 0x103   : > { %5662 = vmatmul.mubr.msk.f32.gmra.mrb[6].mxu1 %vm315_vm0, %v7666_v26  ;;  %1224 = vmatprep.mubr.f32.mxu0 %v7193_v0 }
 0x104   : > { %1385 = vmatprep.mubr.f32.mxu1 %v7193_v0 }
 0x106   : > { %5647 = vmatmul.mubr.msk.f32.gmra.mrb[8].mxu0 %vm315_vm0, %v7675_v27 }
 0x107   : > { %5663 = vmatmul.mubr.msk.f32.gmra.mrb[8].mxu1 %vm315_vm0, %v7675_v27  ;;  %1230 = vmatprep.mubr.f32.mxu0 %v7193_v0 }
 0x108   : > { %1391 = vmatprep.mubr.f32.mxu1 %v7193_v0 }
 0x10a   : > { %5648 = vmatmul.mubr.msk.f32.gmra.mrb[10].mxu0 %vm315_vm0, %v7684_v28 }
 0x10b   : > { %5664 = vmatmul.mubr.msk.f32.gmra.mrb[10].mxu1 %vm315_vm0, %v7684_v28  ;;  %1236 = vmatprep.mubr.f32.mxu0 %v7193_v0 }
 0x10c   : > { %1397 = vmatprep.mubr.f32.mxu1 %v7193_v0 }
 0x10e   : > { %5649 = vmatmul.mubr.msk.f32.gmra.mrb[12].mxu0 %vm315_vm0, %v7693_v29 }
 0x10f   : > { %5665 = vmatmul.mubr.msk.f32.gmra.mrb[12].mxu1 %vm315_vm0, %v7693_v29  ;;  %1242 = vmatprep.mubr.f32.mxu0 %v7193_v0 }
 0x110   : > { %1403 = vmatprep.mubr.f32.mxu1 %v7193_v0 }
 0x112   : > { %5650 = vmatmul.mubr.msk.f32.gmra.mrb[14].mxu0 %vm315_vm0, %v7702_v30 }
 0x113   : > { %5666 = vmatmul.mubr.msk.f32.gmra.mrb[14].mxu1 %vm315_vm0, %v7702_v30  ;;  %1248 = vmatprep.mubr.f32.mxu0 %v7193_v0 }
 0x114   : > { %1409 = vmatprep.mubr.f32.mxu1 %v7193_v0 }
 0x116   : > { %5651 = vmatmul.mubr.msk.f32.gmra.mrb[16].mxu0 %vm315_vm0, %v7711_v31 }
 0x117   : > { %5667 = vmatmul.mubr.msk.f32.gmra.mrb[16].mxu1 %vm315_vm0, %v7711_v31  ;;  %1254 = vmatprep.mubr.f32.mxu0 %v7193_v0 }
 0x118   : > { %1415 = vmatprep.mubr.f32.mxu1 %v7193_v0 }
 0x11a   : > { %5652 = vmatmul.mubr.msk.f32.gmra.mrb[18].mxu0 %vm315_vm0, %v7720_v32 }
 0x11b   : > { %5668 = vmatmul.mubr.msk.f32.gmra.mrb[18].mxu1 %vm315_vm0, %v7720_v32  ;;  %1260 = vmatprep.mubr.f32.mxu0 %v7193_v0 }
 0x11c   : > { %1421 = vmatprep.mubr.f32.mxu1 %v7193_v0 }
 0x11e   : > { %5653 = vmatmul.mubr.msk.f32.gmra.mrb[20].mxu0 %vm315_vm0, %v7729_v33 }
 0x11f   : > { %5669 = vmatmul.mubr.msk.f32.gmra.mrb[20].mxu1 %vm315_vm0, %v7729_v33  ;;  %1266 = vmatprep.mubr.f32.mxu0 %v7193_v0 }
 0x120   : > { %1427 = vmatprep.mubr.f32.mxu1 %v7193_v0 }
 0x122   : > { %5654 = vmatmul.mubr.msk.f32.gmra.mrb[22].mxu0 %vm315_vm0, %v7738_v48 }
 0x123   : > { %5670 = vmatmul.mubr.msk.f32.gmra.mrb[22].mxu1 %vm315_vm0, %v7738_v48  ;;  %1272 = vmatprep.mubr.f32.mxu0 %v7193_v0 }
 0x124   : > { %1433 = vmatprep.mubr.f32.mxu1 %v7193_v0 }
 0x126   : > { %5655 = vmatmul.mubr.msk.f32.gmra.mrb[24].mxu0 %vm315_vm0, %v7747_v49 }
 0x127   : > { %5671 = vmatmul.mubr.msk.f32.gmra.mrb[24].mxu1 %vm315_vm0, %v7747_v49  ;;  %1278 = vmatprep.mubr.f32.mxu0 %v7193_v0 }
 0x128   : > { %1439 = vmatprep.mubr.f32.mxu1 %v7193_v0 }
 0x12a   : > { %5656 = vmatmul.mubr.msk.f32.gmra.mrb[26].mxu0 %vm315_vm0, %v7756_v50 }
 0x12b   : > { %5672 = vmatmul.mubr.msk.f32.gmra.mrb[26].mxu1 %vm315_vm0, %v7756_v50  ;;  %1284 = vmatprep.mubr.f32.mxu0 %v7193_v0 }
 0x12c   : > { %1445 = vmatprep.mubr.f32.mxu1 %v7193_v0 }
 0x12e   : > { %5657 = vmatmul.mubr.msk.f32.gmra.mrb[28].mxu0 %vm315_vm0, %v7765_v52 }
 0x12f   : > { %5673 = vmatmul.mubr.msk.f32.gmra.mrb[28].mxu1 %vm315_vm0, %v7765_v52  ;;  %1290 = vmatprep.mubr.f32.mxu0 %v7193_v0 }
 0x130   : > { %1451 = vmatprep.mubr.f32.mxu1 %v7193_v0 }
 0x132   : > { %5658 = vmatmul.mubr.msk.f32.gmra.mrb[30].mxu0 %vm315_vm0, %v7774_v53 }
 0x133   : > { %5674 = vmatmul.mubr.msk.f32.gmra.mrb[30].mxu1 %vm315_vm0, %v7774_v53  ;;  %1669 = vmatprep.mubr.f32.mxu0 %v7193_v0 }
 0x134   : > { %1830 = vmatprep.mubr.f32.mxu1 %v7193_v0 }
 0x136   : > { %5693 = vmatmul.mubr.msk.f32.vlgmr.msra.gmra.mrb[0].mxu0 %vm315_vm0, %v7521_v34 }
 0x137   : > { %5709 = vmatmul.mubr.msk.f32.vlgmr.msra.gmra.mrb[0].mxu1 %vm315_vm0, %v7521_v34  ;;  %6201 = vmatpush1.bf16.msra.mxu0 %v6200_v10  ;;  %v7867_v34 = vld [vmem:[%s7373_s30 + $0xc0] sm:$0xff] }
 0x138   : > { %1675 = vmatprep.mubr.f32.mxu0 %v7193_v0  ;;  %1836 = vmatprep.mubr.f32.mxu1 %v7193_v0  ;;  %v2487_v10 = vld [vmem:[#allocation5 + $0x2f0] sm:$0xff] }
 0x139   : > { %6209 = vmatpush1.bf16.msra.mxu1 %v6208_v13  ;;  %6203 = vmatprep.subr.bf16.mxu0 %v6202_v14  ;;  %v2945_v13 = vld [vmem:[#allocation5 + $0x318] sm:$0xff]  ;;  %v6228_v16 = vpack.c.bf16 %v2487_v10, %v2483_v8 }
 0x13a   : > { %5694 = vmatmul.mubr.msk.f32.gmra.mrb[2].mxu0 %vm315_vm0, %v7530_v35  ;;  %6211 = vmatprep.subr.bf16.mxu1 %v6210_v18  ;;  %v2949_v14 = vld [vmem:[#allocation5 + $0x338] sm:$0xff] }
 0x13b   : > { %5710 = vmatmul.mubr.msk.f32.gmra.mrb[2].mxu1 %vm315_vm0, %v7530_v35  ;;  %1681 = vmatprep.mubr.f32.mxu0 %v7193_v0  ;;  %v7876_v35 = vld [vmem:[%s7373_s30 + $0xc8] sm:$0xff]  ;;  %v6238_v18 = vpack.c.bf16 %v2949_v14, %v2945_v13  ;;  %v5826_v13 = vld [vmem:[%s7373_s30 + $0x50] sm:$0xff]  ;;  %v5827_v14 = vld [vmem:[%s7373_s30 + $0x60] sm:$0xff] }
 0x13c   : > { %1842 = vmatprep.mubr.f32.mxu1 %v7193_v0  ;;  %6205 = vmatpush1.bf16.msra.mxu0 %v6204_v24  ;;  %v3413_v24 = vld [vmem:[#allocation5 + $0x3a8] sm:$0xff] }
 0x13d   : > { %6213 = vmatpush1.bf16.msra.mxu1 %v6212_v54  ;;  %6215 = vmatprep.subr.bf16.mxu0 %v6214_v55  ;;  %v3411_v54 = vld [vmem:[#allocation5 + $0x398] sm:$0xff] }
 0x13e   : > { %5695 = vmatmul.mubr.msk.f32.gmra.mrb[4].mxu0 %vm315_vm0, %v7539_v36  ;;  %6223 = vmatprep.subr.bf16.mxu1 %v6222_v56  ;;  %v3415_v55 = vld [vmem:[#allocation5 + $0x3b8] sm:$0xff] }
 0x13f   : > { %5711 = vmatmul.mubr.msk.f32.gmra.mrb[4].mxu1 %vm315_vm0, %v7539_v36  ;;  %1687 = vmatprep.mubr.f32.mxu0 %v7193_v0  ;;  %v2473_v36 = vld [vmem:[#allocation5 + $0x280] sm:$0xff] }
 0x140   : > { %1848 = vmatprep.mubr.f32.mxu1 %v7193_v0 }
 0x142   : > { %5696 = vmatmul.mubr.msk.f32.gmra.mrb[6].mxu0 %vm315_vm0, %v7548_v37 }
 0x143   : > { %5712 = vmatmul.mubr.msk.f32.gmra.mrb[6].mxu1 %vm315_vm0, %v7548_v37  ;;  %1693 = vmatprep.mubr.f32.mxu0 %v7193_v0  ;;  %v2477_v37 = vld [vmem:[#allocation5 + $0x2a0] sm:$0xff] }
 0x144   : > { %1854 = vmatprep.mubr.f32.mxu1 %v7193_v0 }
 0x146   : > { %5697 = vmatmul.mubr.msk.f32.gmra.mrb[8].mxu0 %vm315_vm0, %v7557_v38 }
 0x147   : > { %5713 = vmatmul.mubr.msk.f32.gmra.mrb[8].mxu1 %vm315_vm0, %v7557_v38  ;;  %1699 = vmatprep.mubr.f32.mxu0 %v7193_v0  ;;  %v2475_v38 = vld [vmem:[#allocation5 + $0x290] sm:$0xff] }
 0x148   : > { %1860 = vmatprep.mubr.f32.mxu1 %v7193_v0 }
 0x14a   : > { %5698 = vmatmul.mubr.msk.f32.gmra.mrb[10].mxu0 %vm315_vm0, %v7566_v39 }
 0x14b   : > { %5714 = vmatmul.mubr.msk.f32.gmra.mrb[10].mxu1 %vm315_vm0, %v7566_v39  ;;  %1705 = vmatprep.mubr.f32.mxu0 %v7193_v0  ;;  %v2479_v39 = vld [vmem:[#allocation5 + $0x2b0] sm:$0xff] }
 0x14c   : > { %1866 = vmatprep.mubr.f32.mxu1 %v7193_v0 }
 0x14e   : > { %5699 = vmatmul.mubr.msk.f32.gmra.mrb[12].mxu0 %vm315_vm0, %v7575_v40 }
 0x14f   : > { %5715 = vmatmul.mubr.msk.f32.gmra.mrb[12].mxu1 %vm315_vm0, %v7575_v40  ;;  %1711 = vmatprep.mubr.f32.mxu0 %v7193_v0  ;;  %v2482_v40 = vld [vmem:[#allocation5 + $0x2c8] sm:$0xff] }
 0x150   : > { %1872 = vmatprep.mubr.f32.mxu1 %v7193_v0 }
 0x152   : > { %5700 = vmatmul.mubr.msk.f32.gmra.mrb[14].mxu0 %vm315_vm0, %v7584_v41 }
 0x153   : > { %5716 = vmatmul.mubr.msk.f32.gmra.mrb[14].mxu1 %vm315_vm0, %v7584_v41  ;;  %1717 = vmatprep.mubr.f32.mxu0 %v7193_v0  ;;  %v2486_v41 = vld [vmem:[#allocation5 + $0x2e8] sm:$0xff] }
 0x154   : > { %1878 = vmatprep.mubr.f32.mxu1 %v7193_v0 }
 0x156   : > { %5701 = vmatmul.mubr.msk.f32.gmra.mrb[16].mxu0 %vm315_vm0, %v7593_v42 }
 0x157   : > { %5717 = vmatmul.mubr.msk.f32.gmra.mrb[16].mxu1 %vm315_vm0, %v7593_v42  ;;  %1723 = vmatprep.mubr.f32.mxu0 %v7193_v0  ;;  %v6216_v42 = vpack.c.bf16 %v2477_v37, %v2473_v36  ;;  %v6244_v36 = vpack.c.bf16 %v2956_v22, %v2952_v20  ;;  %v6246_v37 = vpack.c.bf16 %v3413_v24, %v3409_v23  ;;  %v3882_v22 = vld [vmem:[#allocation5 + $0x440] sm:$0xff]  ;;  %v3884_v24 = vld [vmem:[#allocation5 + $0x450] sm:$0xff] }
 0x158   : > { %1884 = vmatprep.mubr.f32.mxu1 %v7193_v0  ;;  %v3886_v23 = vld [vmem:[#allocation5 + $0x460] sm:$0xff] }
 0x15a   : > { %5702 = vmatmul.mubr.msk.f32.gmra.mrb[18].mxu0 %vm315_vm0, %v7602_v43 }
 0x15b   : > { %5718 = vmatmul.mubr.msk.f32.gmra.mrb[18].mxu1 %vm315_vm0, %v7602_v43  ;;  %1729 = vmatprep.mubr.f32.mxu0 %v7193_v0  ;;  %v2484_v43 = vld [vmem:[#allocation5 + $0x2d8] sm:$0xff] }
 0x15c   : > { %1890 = vmatprep.mubr.f32.mxu1 %v7193_v0 }
 0x15e   : > { %5703 = vmatmul.mubr.msk.f32.gmra.mrb[20].mxu0 %vm315_vm0, %v7611_v44 }
 0x15f   : > { %5719 = vmatmul.mubr.msk.f32.gmra.mrb[20].mxu1 %vm315_vm0, %v7611_v44  ;;  %1735 = vmatprep.mubr.f32.mxu0 %v7193_v0  ;;  %v2488_v44 = vld [vmem:[#allocation5 + $0x2f8] sm:$0xff] }
 0x160   : > { %1896 = vmatprep.mubr.f32.mxu1 %v7193_v0  ;;  %v6226_v9 = vpack.c.bf16 %v2488_v44, %v2484_v43  ;;  %v3422_v43 = vld [vmem:[#allocation5 + $0x3f0] sm:$0xff]  ;;  %v3875_v44 = vld [vmem:[#allocation5 + $0x408] sm:$0xff] }
 0x162   : > { %5704 = vmatmul.mubr.msk.f32.gmra.mrb[22].mxu0 %vm315_vm0, %v7620_v45 }
 0x163   : > { %5720 = vmatmul.mubr.msk.f32.gmra.mrb[22].mxu1 %vm315_vm0, %v7620_v45  ;;  %1741 = vmatprep.mubr.f32.mxu0 %v7193_v0  ;;  %v6224_v45 = vpack.c.bf16 %v2479_v39, %v2475_v38  ;;  %v6254_v38 = vpack.c.bf16 %v3415_v55, %v3411_v54  ;;  %v3416_v39 = vld [vmem:[#allocation5 + $0x3c0] sm:$0xff]  ;;  %v3888_v55 = vld [vmem:[#allocation5 + $0x470] sm:$0xff] }
 0x164   : > { %1902 = vmatprep.mubr.f32.mxu1 %v7193_v0 }
 0x166   : > { %5705 = vmatmul.mubr.msk.f32.gmra.mrb[24].mxu0 %vm315_vm0, %v7629_v46 }
 0x167   : > { %5721 = vmatmul.mubr.msk.f32.gmra.mrb[24].mxu1 %vm315_vm0, %v7629_v46  ;;  %1747 = vmatprep.mubr.f32.mxu0 %v7193_v0  ;;  %v6218_v46 = vpack.c.bf16 %v2486_v41, %v2482_v40  ;;  %v3420_v40 = vld [vmem:[#allocation5 + $0x3e0] sm:$0xff]  ;;  %v3418_v41 = vld [vmem:[#allocation5 + $0x3d0] sm:$0xff] }
 0x168   : > { %1908 = vmatprep.mubr.f32.mxu1 %v7193_v0  ;;  %v6252_v8 = vpack.c.bf16 %v3420_v40, %v3416_v39  ;;  %v5880_v39 = vld [vmem:[%s7373_s30 + $0x99] sm:$0xff]  ;;  %v5881_v40 = vld [vmem:[%s7373_s30 + $0xa9] sm:$0xff] }
 0x16a   : > { %5706 = vmatmul.mubr.msk.f32.gmra.mrb[26].mxu0 %vm315_vm0, %v7638_v47 }
 0x16b   : > { %5722 = vmatmul.mubr.msk.f32.gmra.mrb[26].mxu1 %vm315_vm0, %v7638_v47  ;;  %1753 = vmatprep.mubr.f32.mxu0 %v7193_v0  ;;  %v2481_v47 = vld [vmem:[#allocation5 + $0x2c0] sm:$0xff] }
 0x16c   : > { %1914 = vmatprep.mubr.f32.mxu1 %v7193_v0  ;;  %v6220_v15 = vpack.c.bf16 %v2485_v57, %v2481_v47  ;;  %v3877_v47 = vld [vmem:[#allocation5 + $0x418] sm:$0xff] }
 0x16d   : > { %v3881_v57 = vld [vmem:[#allocation5 + $0x438] sm:$0xff] }
 0x16e   : > { %5707 = vmatmul.mubr.msk.f32.gmra.mrb[28].mxu0 %vm315_vm0, %v7867_v34  ;;  %v6270_v11 = vpack.c.bf16 %v3881_v57, %v3877_v47  ;;  %v4493_v47 = vld [vmem:[#allocation7 + $0x98] sm:$0xff]  ;;  %v5919_v57 = vld [vmem:[%s7373_s30 + $0x32] sm:$0xff] }
 0x16f   : > { %5723 = vmatmul.mubr.msk.f32.gmra.mrb[28].mxu1 %vm315_vm0, %v7867_v34  ;;  %1759 = vmatprep.mubr.f32.mxu0 %v7193_v0 }
 0x170   : > { %1920 = vmatprep.mubr.f32.mxu1 %v7193_v0 }
 0x172   : > { %5708 = vmatmul.mubr.msk.f32.gmra.mrb[30].mxu0 %vm315_vm0, %v7876_v35 }
 0x173   : > { %5724 = vmatmul.mubr.msk.f32.gmra.mrb[30].mxu1 %vm315_vm0, %v7876_v35  ;;  %2135 = vmatprep.mubr.f32.mxu0 %v7193_v0 }
 0x174   : > { %2296 = vmatprep.mubr.f32.mxu1 %v7193_v0 }
 0x176   : > { %5741 = vmatmul.mubr.msk.f32.vlgmr.msra.gmra.mrb[0].mxu0 %vm315_vm0, %v7385_v51 }
 0x177   : > { %5757 = vmatmul.mubr.msk.f32.vlgmr.msra.gmra.mrb[0].mxu1 %vm315_vm0, %v7385_v51  ;;  %6217 = vmatpush1.bf16.msra.mxu0 %v6216_v42  ;;  %v7969_v51 = vld [vmem:[%s7373_s30 + $0xc1] sm:$0xff] }
 0x178   : > { %2141 = vmatprep.mubr.f32.mxu0 %v7193_v0  ;;  %2302 = vmatprep.mubr.f32.mxu1 %v7193_v0 }
 0x179   : > { %6225 = vmatpush1.bf16.msra.mxu1 %v6224_v45  ;;  %6219 = vmatprep.subr.bf16.mxu0 %v6218_v46  ;;  %v3879_v45 = vld [vmem:[#allocation5 + $0x428] sm:$0xff] }
 0x17a   : > { %5742 = vmatmul.mubr.msk.f32.gmra.mrb[2].mxu0 %vm315_vm0, %v7394_v58  ;;  %6227 = vmatprep.subr.bf16.mxu1 %v6226_v9  ;;  %v5824_v46 = vld [vmem:[%s7373_s30 + $0x38] sm:$0xff]  ;;  %v6260_v9 = vpack.c.bf16 %v3422_v43, %v3418_v41  ;;  %v6262_v10 = vpack.c.bf16 %v3879_v45, %v3875_v44  ;;  %v4474_v43 = vld [vmem:[#allocation7] sm:$0xff] }
 0x17b   : > { %5758 = vmatmul.mubr.msk.f32.gmra.mrb[2].mxu1 %vm315_vm0, %v7394_v58  ;;  %2147 = vmatprep.mubr.f32.mxu0 %v7193_v0  ;;  %v7978_v58 = vld [vmem:[%s7373_s30 + $0xc9] sm:$0xff]  ;;  %v5882_v41 = vld [vmem:[%s7373_s30 + $0xb1] sm:$0xff] }
 0x17c   : > { %2308 = vmatprep.mubr.f32.mxu1 %v7193_v0  ;;  %6221 = vmatpush1.bf16.msra.mxu0 %v6220_v15  ;;  %v5828_v15 = vld [vmem:[%s7373_s30 + $0x68] sm:$0xff]  ;;  %v4475_v44 = vld [vmem:[#allocation7 + $0x8] sm:$0xff]  ;;  %v4506_v45 = vld [vmem:[#allocation7 + $0x100] sm:$0xff] }
 0x17d   : > { %6229 = vmatpush1.bf16.msra.mxu1 %v6228_v16  ;;  %6231 = vmatprep.subr.bf16.mxu0 %v6230_v17  ;;  %v5829_v16 = vld [vmem:[%s7373_s30 + $0x78] sm:$0xff]  ;;  %v5830_v17 = vld [vmem:[%s7373_s30 + $0x80] sm:$0xff] }
 0x17e   : > { %5743 = vmatmul.mubr.msk.f32.gmra.mrb[4].mxu0 %vm315_vm0, %v7403_v59  ;;  %6239 = vmatprep.subr.bf16.mxu1 %v6238_v18  ;;  %v5831_v18 = vld [vmem:[%s7373_s30 + $0x90] sm:$0xff] }
 0x17f   : > { %5759 = vmatmul.mubr.msk.f32.gmra.mrb[4].mxu1 %vm315_vm0, %v7403_v59  ;;  %2153 = vmatprep.mubr.f32.mxu0 %v7193_v0  ;;  %v2942_v59 = vld [vmem:[#allocation5 + $0x300] sm:$0xff] }
 0x180   : > { %2314 = vmatprep.mubr.f32.mxu1 %v7193_v0 }
 0x182   : > { %5744 = vmatmul.mubr.msk.f32.gmra.mrb[6].mxu0 %vm315_vm0, %v7412_v60 }
 0x183   : > { %5760 = vmatmul.mubr.msk.f32.gmra.mrb[6].mxu1 %vm315_vm0, %v7412_v60  ;;  %2159 = vmatprep.mubr.f32.mxu0 %v7193_v0  ;;  %v2946_v60 = vld [vmem:[#allocation5 + $0x320] sm:$0xff] }
 0x184   : > { %2320 = vmatprep.mubr.f32.mxu1 %v7193_v0 }
 0x186   : > { %5745 = vmatmul.mubr.msk.f32.gmra.mrb[8].mxu0 %vm315_vm0, %v7421_v61 }
 0x187   : > { %5761 = vmatmul.mubr.msk.f32.gmra.mrb[8].mxu1 %vm315_vm0, %v7421_v61  ;;  %2165 = vmatprep.mubr.f32.mxu0 %v7193_v0  ;;  %v2944_v61 = vld [vmem:[#allocation5 + $0x310] sm:$0xff] }
 0x188   : > { %2326 = vmatprep.mubr.f32.mxu1 %v7193_v0 }
 0x18a   : > { %5746 = vmatmul.mubr.msk.f32.gmra.mrb[10].mxu0 %vm315_vm0, %v7430_v62 }
 0x18b   : > { %5762 = vmatmul.mubr.msk.f32.gmra.mrb[10].mxu1 %vm315_vm0, %v7430_v62  ;;  %2171 = vmatprep.mubr.f32.mxu0 %v7193_v0  ;;  %v2948_v62 = vld [vmem:[#allocation5 + $0x330] sm:$0xff] }
 0x18c   : > { %2332 = vmatprep.mubr.f32.mxu1 %v7193_v0 }
 0x18e   : > { %5747 = vmatmul.mubr.msk.f32.gmra.mrb[12].mxu0 %vm315_vm0, %v7439_v63 }
 0x18f   : > { %5763 = vmatmul.mubr.msk.f32.gmra.mrb[12].mxu1 %vm315_vm0, %v7439_v63  ;;  %2177 = vmatprep.mubr.f32.mxu0 %v7193_v0  ;;  %v2951_v63 = vld [vmem:[#allocation5 + $0x348] sm:$0xff] }
 0x190   : > { %2338 = vmatprep.mubr.f32.mxu1 %v7193_v0 }
 0x192   : > { %5748 = vmatmul.mubr.msk.f32.gmra.mrb[14].mxu0 %vm315_vm0, %v7448_v1 }
 0x193   : > { %5764 = vmatmul.mubr.msk.f32.gmra.mrb[14].mxu1 %vm315_vm0, %v7448_v1  ;;  %2183 = vmatprep.mubr.f32.mxu0 %v7193_v0  ;;  %v2955_v1 = vld [vmem:[#allocation5 + $0x368] sm:$0xff] }
 0x194   : > { %2344 = vmatprep.mubr.f32.mxu1 %v7193_v0 }
 0x196   : > { %5749 = vmatmul.mubr.msk.f32.gmra.mrb[16].mxu0 %vm315_vm0, %v7457_v2 }
 0x197   : > { %5765 = vmatmul.mubr.msk.f32.gmra.mrb[16].mxu1 %vm315_vm0, %v7457_v2  ;;  %2189 = vmatprep.mubr.f32.mxu0 %v7193_v0  ;;  %v6232_v2 = vpack.c.bf16 %v2946_v60, %v2942_v59  ;;  %v5832_v59 = vld [vmem:[%s7373_s30 + $0x98] sm:$0xff]  ;;  %v5833_v60 = vld [vmem:[%s7373_s30 + $0xa8] sm:$0xff] }
 0x198   : > { %2350 = vmatprep.mubr.f32.mxu1 %v7193_v0 }
 0x19a   : > { %5750 = vmatmul.mubr.msk.f32.gmra.mrb[18].mxu0 %vm315_vm0, %v7466_v3 }
 0x19b   : > { %5766 = vmatmul.mubr.msk.f32.gmra.mrb[18].mxu1 %vm315_vm0, %v7466_v3  ;;  %2195 = vmatprep.mubr.f32.mxu0 %v7193_v0  ;;  %v2953_v3 = vld [vmem:[#allocation5 + $0x358] sm:$0xff] }
 0x19c   : > { %2356 = vmatprep.mubr.f32.mxu1 %v7193_v0 }
 0x19e   : > { %5751 = vmatmul.mubr.msk.f32.gmra.mrb[20].mxu0 %vm315_vm0, %v7475_v4 }
 0x19f   : > { %5767 = vmatmul.mubr.msk.f32.gmra.mrb[20].mxu1 %vm315_vm0, %v7475_v4  ;;  %2201 = vmatprep.mubr.f32.mxu0 %v7193_v0  ;;  %v2957_v4 = vld [vmem:[#allocation5 + $0x378] sm:$0xff] }
 0x1a0   : > { %2362 = vmatprep.mubr.f32.mxu1 %v7193_v0  ;;  %v6242_v21 = vpack.c.bf16 %v2957_v4, %v2953_v3  ;;  %v3883_v3 = vld [vmem:[#allocation5 + $0x448] sm:$0xff] }
 0x1a1   : > { %v3887_v4 = vld [vmem:[#allocation5 + $0x468] sm:$0xff] }
 0x1a2   : > { %5752 = vmatmul.mubr.msk.f32.gmra.mrb[22].mxu0 %vm315_vm0, %v7484_v5 }
 0x1a3   : > { %5768 = vmatmul.mubr.msk.f32.gmra.mrb[22].mxu1 %vm315_vm0, %v7484_v5  ;;  %2207 = vmatprep.mubr.f32.mxu0 %v7193_v0  ;;  %v6240_v5 = vpack.c.bf16 %v2948_v62, %v2944_v61  ;;  %v5834_v61 = vld [vmem:[%s7373_s30 + $0xb0] sm:$0xff]  ;;  %v5837_v62 = vld [vmem:[%s7373_s30 + $0xd8] sm:$0xff] }
 0x1a4   : > { %2368 = vmatprep.mubr.f32.mxu1 %v7193_v0 }
 0x1a6   : > { %5753 = vmatmul.mubr.msk.f32.gmra.mrb[24].mxu0 %vm315_vm0, %v7493_v6 }
 0x1a7   : > { %5769 = vmatmul.mubr.msk.f32.gmra.mrb[24].mxu1 %vm315_vm0, %v7493_v6  ;;  %2213 = vmatprep.mubr.f32.mxu0 %v7193_v0  ;;  %v6234_v6 = vpack.c.bf16 %v2955_v1, %v2951_v63  ;;  %v3874_v63 = vld [vmem:[#allocation5 + $0x400] sm:$0xff] }
 0x1a8   : > { %2374 = vmatprep.mubr.f32.mxu1 %v7193_v0  ;;  %v3878_v1 = vld [vmem:[#allocation5 + $0x420] sm:$0xff] }
 0x1aa   : > { %5754 = vmatmul.mubr.msk.f32.gmra.mrb[26].mxu0 %vm315_vm0, %v7502_v7 }
 0x1ab   : > { %5770 = vmatmul.mubr.msk.f32.gmra.mrb[26].mxu1 %vm315_vm0, %v7502_v7  ;;  %2219 = vmatprep.mubr.f32.mxu0 %v7193_v0  ;;  %v2950_v7 = vld [vmem:[#allocation5 + $0x340] sm:$0xff] }
 0x1ac   : > { %2380 = vmatprep.mubr.f32.mxu1 %v7193_v0  ;;  %v6236_v56 = vpack.c.bf16 %v2954_v19, %v2950_v7  ;;  %v3885_v7 = vld [vmem:[#allocation5 + $0x458] sm:$0xff] }
 0x1ad   : > { %v3889_v19 = vld [vmem:[#allocation5 + $0x478] sm:$0xff] }
 0x1ae   : > { %5755 = vmatmul.mubr.msk.f32.gmra.mrb[28].mxu0 %vm315_vm0, %v7969_v51  ;;  %v6274_v54 = vpack.c.bf16 %v3889_v19, %v3885_v7  ;;  %v4497_v7 = vld [vmem:[#allocation7 + $0xb8] sm:$0xff] }
 0x1af   : > { %5771 = vmatmul.mubr.msk.f32.gmra.mrb[28].mxu1 %vm315_vm0, %v7969_v51  ;;  %2225 = vmatprep.mubr.f32.mxu0 %v7193_v0  ;;  %v5921_v19 = vld [vmem:[%s7373_s30 + $0x4a] sm:$0xff] }
 0x1b0   : > { %2386 = vmatprep.mubr.f32.mxu1 %v7193_v0 }
 0x1b2   : > { %5756 = vmatmul.mubr.msk.f32.gmra.mrb[30].mxu0 %vm315_vm0, %v7978_v58 }
 0x1b3   : > { %5772 = vmatmul.mubr.msk.f32.gmra.mrb[30].mxu1 %vm315_vm0, %v7978_v58  ;;  %2601 = vmatprep.mubr.f32.mxu0 %v7193_v0 }
 0x1b4   : > { %2762 = vmatprep.mubr.f32.mxu1 %v7193_v0 }
 0x1b6   : > { %5789 = vmatmul.mubr.msk.f32.vlgmr.msra.gmra.mrb[0].mxu0 %vm315_vm0, %v7657_v25 }
 0x1b7   : > { %5805 = vmatmul.mubr.msk.f32.vlgmr.msra.gmra.mrb[0].mxu1 %vm315_vm0, %v7657_v25  ;;  %6233 = vmatpush1.bf16.msra.mxu0 %v6232_v2  ;;  %v8071_v25 = vld [vmem:[%s7373_s30 + $0xc2] sm:$0xff] }
 0x1b8   : > { %2607 = vmatprep.mubr.f32.mxu0 %v7193_v0  ;;  %2768 = vmatprep.mubr.f32.mxu1 %v7193_v0  ;;  %v3876_v2 = vld [vmem:[#allocation5 + $0x410] sm:$0xff] }
 0x1b9   : > { %6241 = vmatpush1.bf16.msra.mxu1 %v6240_v5  ;;  %6235 = vmatprep.subr.bf16.mxu0 %v6234_v6  ;;  %v5871_v5 = vld [vmem:[%s7373_s30 + $0x31] sm:$0xff]  ;;  %v6264_v6 = vpack.c.bf16 %v3878_v1, %v3874_v63 }
 0x1ba   : > { %5790 = vmatmul.mubr.msk.f32.gmra.mrb[2].mxu0 %vm315_vm0, %v7666_v26  ;;  %6243 = vmatprep.subr.bf16.mxu1 %v6242_v21  ;;  %v6266_v21 = vpack.c.bf16 %v3887_v4, %v3883_v3  ;;  %v4510_v3 = vld [vmem:[#allocation7 + $0x120] sm:$0xff] }
 0x1bb   : > { %5806 = vmatmul.mubr.msk.f32.gmra.mrb[2].mxu1 %vm315_vm0, %v7666_v26  ;;  %2613 = vmatprep.mubr.f32.mxu0 %v7193_v0  ;;  %v8080_v26 = vld [vmem:[%s7373_s30 + $0xca] sm:$0xff] }
 0x1bc   : > { %2774 = vmatprep.mubr.f32.mxu1 %v7193_v0  ;;  %6237 = vmatpush1.bf16.msra.mxu0 %v6236_v56  ;;  %v4490_v56 = vld [vmem:[#allocation7 + $0x80] sm:$0xff] }
 0x1bd   : > { %6245 = vmatpush1.bf16.msra.mxu1 %v6244_v36  ;;  %6247 = vmatprep.subr.bf16.mxu0 %v6246_v37  ;;  %v4491_v36 = vld [vmem:[#allocation7 + $0x88] sm:$0xff] }
 0x1be   : > { %5791 = vmatmul.mubr.msk.f32.gmra.mrb[4].mxu0 %vm315_vm0, %v7675_v27  ;;  %6255 = vmatprep.subr.bf16.mxu1 %v6254_v38  ;;  %v5872_v37 = vld [vmem:[%s7373_s30 + $0x39] sm:$0xff]  ;;  %v4522_v38 = vld [vmem:[#allocation7 + $0x180] sm:$0xff] }
 0x1bf   : > { %5807 = vmatmul.mubr.msk.f32.gmra.mrb[4].mxu1 %vm315_vm0, %v7675_v27  ;;  %2619 = vmatprep.mubr.f32.mxu0 %v7193_v0  ;;  %v3408_v27 = vld [vmem:[#allocation5 + $0x380] sm:$0xff] }
 0x1c0   : > { %2780 = vmatprep.mubr.f32.mxu1 %v7193_v0 }
 0x1c2   : > { %5792 = vmatmul.mubr.msk.f32.gmra.mrb[6].mxu0 %vm315_vm0, %v7684_v28 }
 0x1c3   : > { %5808 = vmatmul.mubr.msk.f32.gmra.mrb[6].mxu1 %vm315_vm0, %v7684_v28  ;;  %2625 = vmatprep.mubr.f32.mxu0 %v7193_v0  ;;  %v3412_v28 = vld [vmem:[#allocation5 + $0x3a0] sm:$0xff] }
 0x1c4   : > { %2786 = vmatprep.mubr.f32.mxu1 %v7193_v0 }
 0x1c6   : > { %5793 = vmatmul.mubr.msk.f32.gmra.mrb[8].mxu0 %vm315_vm0, %v7693_v29 }
 0x1c7   : > { %5809 = vmatmul.mubr.msk.f32.gmra.mrb[8].mxu1 %vm315_vm0, %v7693_v29  ;;  %2631 = vmatprep.mubr.f32.mxu0 %v7193_v0  ;;  %v3410_v29 = vld [vmem:[#allocation5 + $0x390] sm:$0xff] }
 0x1c8   : > { %2792 = vmatprep.mubr.f32.mxu1 %v7193_v0 }
 0x1ca   : > { %5794 = vmatmul.mubr.msk.f32.gmra.mrb[10].mxu0 %vm315_vm0, %v7702_v30 }
 0x1cb   : > { %5810 = vmatmul.mubr.msk.f32.gmra.mrb[10].mxu1 %vm315_vm0, %v7702_v30  ;;  %2637 = vmatprep.mubr.f32.mxu0 %v7193_v0  ;;  %v3414_v30 = vld [vmem:[#allocation5 + $0x3b0] sm:$0xff] }
 0x1cc   : > { %2798 = vmatprep.mubr.f32.mxu1 %v7193_v0 }
 0x1ce   : > { %5795 = vmatmul.mubr.msk.f32.gmra.mrb[12].mxu0 %vm315_vm0, %v7711_v31 }
 0x1cf   : > { %5811 = vmatmul.mubr.msk.f32.gmra.mrb[12].mxu1 %vm315_vm0, %v7711_v31  ;;  %2643 = vmatprep.mubr.f32.mxu0 %v7193_v0  ;;  %v3417_v31 = vld [vmem:[#allocation5 + $0x3c8] sm:$0xff] }
 0x1d0   : > { %2804 = vmatprep.mubr.f32.mxu1 %v7193_v0 }
 0x1d2   : > { %5796 = vmatmul.mubr.msk.f32.gmra.mrb[14].mxu0 %vm315_vm0, %v7720_v32 }
 0x1d3   : > { %5812 = vmatmul.mubr.msk.f32.gmra.mrb[14].mxu1 %vm315_vm0, %v7720_v32  ;;  %2649 = vmatprep.mubr.f32.mxu0 %v7193_v0  ;;  %v3421_v32 = vld [vmem:[#allocation5 + $0x3e8] sm:$0xff] }
 0x1d4   : > { %2810 = vmatprep.mubr.f32.mxu1 %v7193_v0 }
 0x1d6   : > { %5797 = vmatmul.mubr.msk.f32.gmra.mrb[16].mxu0 %vm315_vm0, %v7729_v33 }
 0x1d7   : > { %5813 = vmatmul.mubr.msk.f32.gmra.mrb[16].mxu1 %vm315_vm0, %v7729_v33  ;;  %2655 = vmatprep.mubr.f32.mxu0 %v7193_v0  ;;  %v5823_v33 = vld [vmem:[%s7373_s30 + $0x30] sm:$0xff] }
 0x1d8   : > { %2816 = vmatprep.mubr.f32.mxu1 %v7193_v0 }
 0x1da   : > { %5798 = vmatmul.mubr.msk.f32.gmra.mrb[18].mxu0 %vm315_vm0, %v7738_v48 }
 0x1db   : > { %5814 = vmatmul.mubr.msk.f32.gmra.mrb[18].mxu1 %vm315_vm0, %v7738_v48  ;;  %2661 = vmatprep.mubr.f32.mxu0 %v7193_v0  ;;  %v6248_v48 = vpack.c.bf16 %v3412_v28, %v3408_v27  ;;  %v4523_v27 = vld [vmem:[#allocation7 + $0x188] sm:$0xff]  ;;  %v6268_v28 = vpack.c.bf16 %v3886_v23, %v3882_v22 }
 0x1dc   : > { %2822 = vmatprep.mubr.f32.mxu1 %v7193_v0 }
 0x1de   : > { %5799 = vmatmul.mubr.msk.f32.gmra.mrb[20].mxu0 %vm315_vm0, %v7747_v49 }
 0x1df   : > { %5815 = vmatmul.mubr.msk.f32.gmra.mrb[20].mxu1 %vm315_vm0, %v7747_v49  ;;  %2667 = vmatprep.mubr.f32.mxu0 %v7193_v0  ;;  %v3419_v49 = vld [vmem:[#allocation5 + $0x3d8] sm:$0xff] }
 0x1e0   : > { %2828 = vmatprep.mubr.f32.mxu1 %v7193_v0 }
 0x1e2   : > { %5800 = vmatmul.mubr.msk.f32.gmra.mrb[22].mxu0 %vm315_vm0, %v7756_v50 }
 0x1e3   : > { %5816 = vmatmul.mubr.msk.f32.gmra.mrb[22].mxu1 %vm315_vm0, %v7756_v50  ;;  %2673 = vmatprep.mubr.f32.mxu0 %v7193_v0  ;;  %v3423_v50 = vld [vmem:[#allocation5 + $0x3f8] sm:$0xff] }
 0x1e4   : > { %2834 = vmatprep.mubr.f32.mxu1 %v7193_v0  ;;  %v6258_v42 = vpack.c.bf16 %v3423_v50, %v3419_v49  ;;  %v5876_v49 = vld [vmem:[%s7373_s30 + $0x69] sm:$0xff]  ;;  %v5877_v50 = vld [vmem:[%s7373_s30 + $0x79] sm:$0xff] }
 0x1e6   : > { %5801 = vmatmul.mubr.msk.f32.gmra.mrb[24].mxu0 %vm315_vm0, %v7765_v52 }
 0x1e7   : > { %5817 = vmatmul.mubr.msk.f32.gmra.mrb[24].mxu1 %vm315_vm0, %v7765_v52  ;;  %2679 = vmatprep.mubr.f32.mxu0 %v7193_v0  ;;  %v6256_v52 = vpack.c.bf16 %v3414_v30, %v3410_v29  ;;  %v6276_v29 = vpack.c.bf16 %v3888_v55, %v3884_v24  ;;  %v6278_v30 = vpack.c.bf16 %v4491_v36, %v4490_v56  ;;  %v4481_v55 = vld [vmem:[#allocation7 + $0x38] sm:$0xff]  ;;  %v4512_v56 = vld [vmem:[#allocation7 + $0x130] sm:$0xff] }
 0x1e8   : > { %2840 = vmatprep.mubr.f32.mxu1 %v7193_v0 }
 0x1ea   : > { %5802 = vmatmul.mubr.msk.f32.gmra.mrb[26].mxu0 %vm315_vm0, %v7774_v53 }
 0x1eb   : > { %5818 = vmatmul.mubr.msk.f32.gmra.mrb[26].mxu1 %vm315_vm0, %v7774_v53  ;;  %2685 = vmatprep.mubr.f32.mxu0 %v7193_v0  ;;  %v6250_v53 = vpack.c.bf16 %v3421_v32, %v3417_v31  ;;  %v6310_v31 = vpack.c.bf16 %v4523_v27, %v4522_v38  ;;  %v5873_v32 = vld [vmem:[%s7373_s30 + $0x49] sm:$0xff]  ;;  %v4499_v27 = vld [vmem:[#allocation7 + $0xc8] sm:$0xff] }
 0x1ec   : > { %2846 = vmatprep.mubr.f32.mxu1 %v7193_v0  ;;  %v4498_v38 = vld [vmem:[#allocation7 + $0xc0] sm:$0xff] }
 0x1ee   : > { %5803 = vmatmul.mubr.msk.f32.gmra.mrb[28].mxu0 %vm315_vm0, %v8071_v25 }
 0x1ef   : > { %5819 = vmatmul.mubr.msk.f32.gmra.mrb[28].mxu1 %vm315_vm0, %v8071_v25  ;;  %2691 = vmatprep.mubr.f32.mxu0 %v7193_v0 }
 0x1f0   : > { %2852 = vmatprep.mubr.f32.mxu1 %v7193_v0 }
 0x1f2   : > { %5804 = vmatmul.mubr.msk.f32.gmra.mrb[30].mxu0 %vm315_vm0, %v8080_v26 }
 0x1f3   : > { %5820 = vmatmul.mubr.msk.f32.gmra.mrb[30].mxu1 %vm315_vm0, %v8080_v26  ;;  %3070 = vmatprep.mubr.f32.mxu0 %v7193_v0 }
 0x1f4   : > { %3231 = vmatprep.mubr.f32.mxu1 %v7193_v0 }
 0x1f6   : > { %5839 = vmatmul.mubr.msk.f32.vlgmr.msra.gmra.mrb[0].mxu0 %vm315_vm0, %v5823_v33 }
 0x1f7   : > { %5855 = vmatmul.mubr.msk.f32.vlgmr.msra.gmra.mrb[0].mxu1 %vm315_vm0, %v5823_v33  ;;  %6249 = vmatpush1.bf16.msra.mxu0 %v6248_v48  ;;  %v5874_v33 = vld [vmem:[%s7373_s30 + $0x51] sm:$0xff]  ;;  %v5875_v48 = vld [vmem:[%s7373_s30 + $0x61] sm:$0xff] }
 0x1f8   : > { %3076 = vmatprep.mubr.f32.mxu0 %v7193_v0  ;;  %3237 = vmatprep.mubr.f32.mxu1 %v7193_v0 }
 0x1f9   : > { %6257 = vmatpush1.bf16.msra.mxu1 %v6256_v52  ;;  %6251 = vmatprep.subr.bf16.mxu0 %v6250_v53  ;;  %v5878_v52 = vld [vmem:[%s7373_s30 + $0x81] sm:$0xff]  ;;  %v5879_v53 = vld [vmem:[%s7373_s30 + $0x91] sm:$0xff] }
 0x1fa   : > { %5840 = vmatmul.mubr.msk.f32.gmra.mrb[2].mxu0 %vm315_vm0, %v5824_v46  ;;  %6259 = vmatprep.subr.bf16.mxu1 %v6258_v42  ;;  %v5885_v42 = vld [vmem:[%s7373_s30 + $0xd9] sm:$0xff] }
 0x1fb   : > { %5856 = vmatmul.mubr.msk.f32.gmra.mrb[2].mxu1 %vm315_vm0, %v5824_v46  ;;  %3082 = vmatprep.mubr.f32.mxu0 %v7193_v0  ;;  %v4492_v46 = vld [vmem:[#allocation7 + $0x90] sm:$0xff] }
 0x1fc   : > { %3243 = vmatprep.mubr.f32.mxu1 %v7193_v0  ;;  %6253 = vmatpush1.bf16.msra.mxu0 %v6252_v8  ;;  %v4524_v8 = vld [vmem:[#allocation7 + $0x190] sm:$0xff] }
 0x1fd   : > { %6261 = vmatpush1.bf16.msra.mxu1 %v6260_v9  ;;  %6263 = vmatprep.subr.bf16.mxu0 %v6262_v10  ;;  %v4525_v9 = vld [vmem:[#allocation7 + $0x198] sm:$0xff]  ;;  %v6280_v10 = vpack.c.bf16 %v4475_v44, %v4474_v43 }
 0x1fe   : > { %5841 = vmatmul.mubr.msk.f32.gmra.mrb[4].mxu0 %vm315_vm0, %v5825_v12  ;;  %6271 = vmatprep.subr.bf16.mxu1 %v6270_v11 }
 0x1ff   : > { %5857 = vmatmul.mubr.msk.f32.gmra.mrb[4].mxu1 %vm315_vm0, %v5825_v12  ;;  %3088 = vmatprep.mubr.f32.mxu0 %v7193_v0  ;;  %v6282_v12 = vpack.c.bf16 %v4493_v47, %v4492_v46  ;;  %v4485_v46 = vld [vmem:[#allocation7 + $0x58] sm:$0xff]  ;;  %v4516_v47 = vld [vmem:[#allocation7 + $0x150] sm:$0xff] }
 0x200   : > { %3249 = vmatprep.mubr.f32.mxu1 %v7193_v0 }
 0x202   : > { %5842 = vmatmul.mubr.msk.f32.gmra.mrb[6].mxu0 %vm315_vm0, %v5826_v13 }
 0x203   : > { %5858 = vmatmul.mubr.msk.f32.gmra.mrb[6].mxu1 %vm315_vm0, %v5826_v13  ;;  %3094 = vmatprep.mubr.f32.mxu0 %v7193_v0  ;;  %v4476_v13 = vld [vmem:[#allocation7 + $0x10] sm:$0xff] }
 0x204   : > { %3255 = vmatprep.mubr.f32.mxu1 %v7193_v0 }
 0x206   : > { %5843 = vmatmul.mubr.msk.f32.gmra.mrb[8].mxu0 %vm315_vm0, %v5827_v14 }
 0x207   : > { %5859 = vmatmul.mubr.msk.f32.gmra.mrb[8].mxu1 %vm315_vm0, %v5827_v14  ;;  %3100 = vmatprep.mubr.f32.mxu0 %v7193_v0  ;;  %v4477_v14 = vld [vmem:[#allocation7 + $0x18] sm:$0xff] }
 0x208   : > { %3261 = vmatprep.mubr.f32.mxu1 %v7193_v0 }
 0x20a   : > { %5844 = vmatmul.mubr.msk.f32.gmra.mrb[10].mxu0 %vm315_vm0, %v5828_v15 }
 0x20b   : > { %5860 = vmatmul.mubr.msk.f32.gmra.mrb[10].mxu1 %vm315_vm0, %v5828_v15  ;;  %3106 = vmatprep.mubr.f32.mxu0 %v7193_v0  ;;  %v4508_v15 = vld [vmem:[#allocation7 + $0x110] sm:$0xff] }
 0x20c   : > { %3267 = vmatprep.mubr.f32.mxu1 %v7193_v0 }
 0x20e   : > { %5845 = vmatmul.mubr.msk.f32.gmra.mrb[12].mxu0 %vm315_vm0, %v5829_v16 }
 0x20f   : > { %5861 = vmatmul.mubr.msk.f32.gmra.mrb[12].mxu1 %vm315_vm0, %v5829_v16  ;;  %3112 = vmatprep.mubr.f32.mxu0 %v7193_v0  ;;  %v6314_v16 = vpack.c.bf16 %v4525_v9, %v4524_v8  ;;  %v4517_v8 = vld [vmem:[#allocation7 + $0x158] sm:$0xff]  ;;  %v4502_v9 = vld [vmem:[#allocation7 + $0xe0] sm:$0xff] }
 0x210   : > { %3273 = vmatprep.mubr.f32.mxu1 %v7193_v0 }
 0x212   : > { %5846 = vmatmul.mubr.msk.f32.gmra.mrb[14].mxu0 %vm315_vm0, %v5830_v17 }
 0x213   : > { %5862 = vmatmul.mubr.msk.f32.gmra.mrb[14].mxu1 %vm315_vm0, %v5830_v17  ;;  %3118 = vmatprep.mubr.f32.mxu0 %v7193_v0  ;;  %v4509_v17 = vld [vmem:[#allocation7 + $0x118] sm:$0xff] }
 0x214   : > { %3279 = vmatprep.mubr.f32.mxu1 %v7193_v0  ;;  %v6316_v63 = vpack.c.bf16 %v4509_v17, %v4508_v15  ;;  %v6332_v15 = vpack.c.bf16 %v4517_v8, %v4516_v47  ;;  %v4486_v17 = vld [vmem:[#allocation7 + $0x60] sm:$0xff] }
 0x216   : > { %5847 = vmatmul.mubr.msk.f32.gmra.mrb[16].mxu0 %vm315_vm0, %v5831_v18 }
 0x217   : > { %5863 = vmatmul.mubr.msk.f32.gmra.mrb[16].mxu1 %vm315_vm0, %v5831_v18  ;;  %3124 = vmatprep.mubr.f32.mxu0 %v7193_v0  ;;  %v4494_v18 = vld [vmem:[#allocation7 + $0xa0] sm:$0xff] }
 0x218   : > { %3285 = vmatprep.mubr.f32.mxu1 %v7193_v0 }
 0x21a   : > { %5848 = vmatmul.mubr.msk.f32.gmra.mrb[18].mxu0 %vm315_vm0, %v5832_v59 }
 0x21b   : > { %5864 = vmatmul.mubr.msk.f32.gmra.mrb[18].mxu1 %vm315_vm0, %v5832_v59  ;;  %3130 = vmatprep.mubr.f32.mxu0 %v7193_v0  ;;  %v4495_v59 = vld [vmem:[#allocation7 + $0xa8] sm:$0xff] }
 0x21c   : > { %3291 = vmatprep.mubr.f32.mxu1 %v7193_v0  ;;  %v6286_v1 = vpack.c.bf16 %v4495_v59, %v4494_v18  ;;  %v4487_v18 = vld [vmem:[#allocation7 + $0x68] sm:$0xff]  ;;  %v4518_v59 = vld [vmem:[#allocation7 + $0x160] sm:$0xff] }
 0x21e   : > { %5849 = vmatmul.mubr.msk.f32.gmra.mrb[20].mxu0 %vm315_vm0, %v5833_v60 }
 0x21f   : > { %5865 = vmatmul.mubr.msk.f32.gmra.mrb[20].mxu1 %vm315_vm0, %v5833_v60  ;;  %3136 = vmatprep.mubr.f32.mxu0 %v7193_v0  ;;  %v5920_v60 = vld [vmem:[%s7373_s30 + $0x3a] sm:$0xff] }
 0x220   : > { %3297 = vmatprep.mubr.f32.mxu1 %v7193_v0 }
 0x222   : > { %5850 = vmatmul.mubr.msk.f32.gmra.mrb[22].mxu0 %vm315_vm0, %v5834_v61 }
 0x223   : > { %5866 = vmatmul.mubr.msk.f32.gmra.mrb[22].mxu1 %vm315_vm0, %v5834_v61  ;;  %3142 = vmatprep.mubr.f32.mxu0 %v7193_v0  ;;  %v4526_v61 = vld [vmem:[#allocation7 + $0x1a0] sm:$0xff] }
 0x224   : > { %3303 = vmatprep.mubr.f32.mxu1 %v7193_v0 }
 0x226   : > { %5851 = vmatmul.mubr.msk.f32.gmra.mrb[24].mxu0 %vm315_vm0, %v7867_v34 }
 0x227   : > { %5867 = vmatmul.mubr.msk.f32.gmra.mrb[24].mxu1 %vm315_vm0, %v7867_v34  ;;  %3148 = vmatprep.mubr.f32.mxu0 %v7193_v0  ;;  %v5838_v34 = vld [vmem:[%s7373_s30 + $0xe0] sm:$0xff] }
 0x228   : > { %3309 = vmatprep.mubr.f32.mxu1 %v7193_v0 }
 0x22a   : > { %5852 = vmatmul.mubr.msk.f32.gmra.mrb[26].mxu0 %vm315_vm0, %v7876_v35 }
 0x22b   : > { %5868 = vmatmul.mubr.msk.f32.gmra.mrb[26].mxu1 %vm315_vm0, %v7876_v35  ;;  %3154 = vmatprep.mubr.f32.mxu0 %v7193_v0  ;;  %v3880_v35 = vld [vmem:[#allocation5 + $0x430] sm:$0xff] }
 0x22c   : > { %3315 = vmatprep.mubr.f32.mxu1 %v7193_v0  ;;  %v6272_v20 = vpack.c.bf16 %v3880_v35, %v3876_v2  ;;  %v4478_v2 = vld [vmem:[#allocation7 + $0x20] sm:$0xff]  ;;  %v4479_v35 = vld [vmem:[#allocation7 + $0x28] sm:$0xff] }
 0x22d   : > { %v6288_v22 = vpack.c.bf16 %v4479_v35, %v4478_v2 }
 0x22e   : > { %5853 = vmatmul.mubr.msk.f32.gmra.mrb[28].mxu0 %vm315_vm0, %v5837_v62 }
 0x22f   : > { %5869 = vmatmul.mubr.msk.f32.gmra.mrb[28].mxu1 %vm315_vm0, %v5837_v62  ;;  %3160 = vmatprep.mubr.f32.mxu0 %v7193_v0  ;;  %v4527_v62 = vld [vmem:[#allocation7 + $0x1a8] sm:$0xff] }
 0x230   : > { %3321 = vmatprep.mubr.f32.mxu1 %v7193_v0  ;;  %v6318_v4 = vpack.c.bf16 %v4527_v62, %v4526_v61  ;;  %v4519_v61 = vld [vmem:[#allocation7 + $0x168] sm:$0xff]  ;;  %v4504_v62 = vld [vmem:[#allocation7 + $0xf0] sm:$0xff] }
 0x231   : > { %v6336_v2 = vpack.c.bf16 %v4519_v61, %v4518_v59 }
 0x232   : > { %5854 = vmatmul.mubr.msk.f32.gmra.mrb[30].mxu0 %vm315_vm0, %v5838_v34 }
 0x233   : > { %5870 = vmatmul.mubr.msk.f32.gmra.mrb[30].mxu1 %vm315_vm0, %v5838_v34  ;;  %3536 = vmatprep.mubr.f32.mxu0 %v7193_v0  ;;  %v6284_v34 = vpack.c.bf16 %v4477_v14, %v4476_v13  ;;  %v4535_v13 = vld [vmem:[#allocation7 + $0x1e8] sm:$0xff] }
 0x234   : > { %3697 = vmatprep.mubr.f32.mxu1 %v7193_v0 }
 0x236   : > { %5887 = vmatmul.mubr.msk.f32.vlgmr.msra.gmra.mrb[0].mxu0 %vm315_vm0, %v5871_v5 }
 0x237   : > { %5903 = vmatmul.mubr.msk.f32.vlgmr.msra.gmra.mrb[0].mxu1 %vm315_vm0, %v5871_v5  ;;  %6265 = vmatpush1.bf16.msra.mxu0 %v6264_v6  ;;  %v4511_v5 = vld [vmem:[#allocation7 + $0x128] sm:$0xff]  ;;  %v4496_v6 = vld [vmem:[#allocation7 + $0xb0] sm:$0xff] }
 0x238   : > { %3542 = vmatprep.mubr.f32.mxu0 %v7193_v0  ;;  %3703 = vmatprep.mubr.f32.mxu1 %v7193_v0  ;;  %v6320_v23 = vpack.c.bf16 %v4511_v5, %v4510_v3  ;;  %v6290_v24 = vpack.c.bf16 %v4497_v7, %v4496_v6  ;;  %v5926_v3 = vld [vmem:[%s7373_s30 + $0x82] sm:$0xff]  ;;  %v5928_v5 = vld [vmem:[%s7373_s30 + $0x9a] sm:$0xff]  ;;  %v5929_v6 = vld [vmem:[%s7373_s30 + $0xaa] sm:$0xff] }
 0x239   : > { %6273 = vmatpush1.bf16.msra.mxu1 %v6272_v20  ;;  %6267 = vmatprep.subr.bf16.mxu0 %v6266_v21  ;;  %v4528_v20 = vld [vmem:[#allocation7 + $0x1b0] sm:$0xff]  ;;  %v4529_v21 = vld [vmem:[#allocation7 + $0x1b8] sm:$0xff]  ;;  %v5930_v7 = vld [vmem:[%s7373_s30 + $0xb2] sm:$0xff] }
 0x23a   : > { %5888 = vmatmul.mubr.msk.f32.gmra.mrb[2].mxu0 %vm315_vm0, %v5872_v37  ;;  %6275 = vmatprep.subr.bf16.mxu1 %v6274_v54  ;;  %v4480_v54 = vld [vmem:[#allocation7 + $0x30] sm:$0xff]  ;;  %v6322_v36 = vpack.c.bf16 %v4529_v21, %v4528_v20 }
 0x23b   : > { %5904 = vmatmul.mubr.msk.f32.gmra.mrb[2].mxu1 %vm315_vm0, %v5872_v37  ;;  %3548 = vmatprep.mubr.f32.mxu0 %v7193_v0  ;;  %v4513_v37 = vld [vmem:[#allocation7 + $0x138] sm:$0xff]  ;;  %v4536_v20 = vld [vmem:[#allocation7 + $0x1f0] sm:$0xff] }
 0x23c   : > { %3709 = vmatprep.mubr.f32.mxu1 %v7193_v0  ;;  %6269 = vmatpush1.bf16.msra.mxu0 %v6268_v28  ;;  %v5922_v28 = vld [vmem:[%s7373_s30 + $0x52] sm:$0xff]  ;;  %v4488_v21 = vld [vmem:[#allocation7 + $0x70] sm:$0xff] }
 0x23d   : > { %6277 = vmatpush1.bf16.msra.mxu1 %v6276_v29  ;;  %6279 = vmatprep.subr.bf16.mxu0 %v6278_v30  ;;  %v4530_v29 = vld [vmem:[#allocation7 + $0x1c0] sm:$0xff]  ;;  %v4531_v30 = vld [vmem:[#allocation7 + $0x1c8] sm:$0xff] }
 0x23e   : > { %5889 = vmatmul.mubr.msk.f32.gmra.mrb[4].mxu0 %vm315_vm0, %v5873_v32  ;;  %6311 = vmatprep.subr.bf16.mxu1 %v6310_v31  ;;  %v6292_v31 = vpack.c.bf16 %v4481_v55, %v4480_v54  ;;  %v4521_v55 = vld [vmem:[#allocation7 + $0x178] sm:$0xff] }
 0x23f   : > { %5905 = vmatmul.mubr.msk.f32.gmra.mrb[4].mxu1 %vm315_vm0, %v5873_v32  ;;  %3554 = vmatprep.mubr.f32.mxu0 %v7193_v0  ;;  %v6324_v32 = vpack.c.bf16 %v4513_v37, %v4512_v56 }
 0x240   : > { %3715 = vmatprep.mubr.f32.mxu1 %v7193_v0 }
 0x242   : > { %5890 = vmatmul.mubr.msk.f32.gmra.mrb[6].mxu0 %vm315_vm0, %v5874_v33 }
 0x243   : > { %5906 = vmatmul.mubr.msk.f32.gmra.mrb[6].mxu1 %vm315_vm0, %v5874_v33  ;;  %3560 = vmatprep.mubr.f32.mxu0 %v7193_v0  ;;  %v6294_v33 = vpack.c.bf16 %v4499_v27, %v4498_v38 }
 0x244   : > { %3721 = vmatprep.mubr.f32.mxu1 %v7193_v0 }
 0x246   : > { %5891 = vmatmul.mubr.msk.f32.gmra.mrb[8].mxu0 %vm315_vm0, %v5875_v48 }
 0x247   : > { %5907 = vmatmul.mubr.msk.f32.gmra.mrb[8].mxu1 %vm315_vm0, %v5875_v48  ;;  %3566 = vmatprep.mubr.f32.mxu0 %v7193_v0  ;;  %v4482_v48 = vld [vmem:[#allocation7 + $0x40] sm:$0xff] }
 0x248   : > { %3727 = vmatprep.mubr.f32.mxu1 %v7193_v0 }
 0x24a   : > { %5892 = vmatmul.mubr.msk.f32.gmra.mrb[10].mxu0 %vm315_vm0, %v5876_v49 }
 0x24b   : > { %5908 = vmatmul.mubr.msk.f32.gmra.mrb[10].mxu1 %vm315_vm0, %v5876_v49  ;;  %3572 = vmatprep.mubr.f32.mxu0 %v7193_v0  ;;  %v4483_v49 = vld [vmem:[#allocation7 + $0x48] sm:$0xff] }
 0x24c   : > { %3733 = vmatprep.mubr.f32.mxu1 %v7193_v0  ;;  %v6296_v43 = vpack.c.bf16 %v4483_v49, %v4482_v48 }
 0x24e   : > { %5893 = vmatmul.mubr.msk.f32.gmra.mrb[12].mxu0 %vm315_vm0, %v5877_v50 }
 0x24f   : > { %5909 = vmatmul.mubr.msk.f32.gmra.mrb[12].mxu1 %vm315_vm0, %v5877_v50  ;;  %3578 = vmatprep.mubr.f32.mxu0 %v7193_v0  ;;  %v4514_v50 = vld [vmem:[#allocation7 + $0x140] sm:$0xff] }
 0x250   : > { %3739 = vmatprep.mubr.f32.mxu1 %v7193_v0 }
 0x252   : > { %5894 = vmatmul.mubr.msk.f32.gmra.mrb[14].mxu0 %vm315_vm0, %v5878_v52 }
 0x253   : > { %5910 = vmatmul.mubr.msk.f32.gmra.mrb[14].mxu1 %vm315_vm0, %v5878_v52  ;;  %3584 = vmatprep.mubr.f32.mxu0 %v7193_v0  ;;  %v6326_v52 = vpack.c.bf16 %v4531_v30, %v4530_v29 }
 0x254   : > { %3745 = vmatprep.mubr.f32.mxu1 %v7193_v0 }
 0x256   : > { %5895 = vmatmul.mubr.msk.f32.gmra.mrb[16].mxu0 %vm315_vm0, %v5879_v53 }
 0x257   : > { %5911 = vmatmul.mubr.msk.f32.gmra.mrb[16].mxu1 %vm315_vm0, %v5879_v53  ;;  %3590 = vmatprep.mubr.f32.mxu0 %v7193_v0  ;;  %v4515_v53 = vld [vmem:[#allocation7 + $0x148] sm:$0xff] }
 0x258   : > { %3751 = vmatprep.mubr.f32.mxu1 %v7193_v0  ;;  %v6328_v44 = vpack.c.bf16 %v4515_v53, %v4514_v50 }
 0x25a   : > { %5896 = vmatmul.mubr.msk.f32.gmra.mrb[18].mxu0 %vm315_vm0, %v5880_v39 }
 0x25b   : > { %5912 = vmatmul.mubr.msk.f32.gmra.mrb[18].mxu1 %vm315_vm0, %v5880_v39  ;;  %3596 = vmatprep.mubr.f32.mxu0 %v7193_v0  ;;  %v4500_v39 = vld [vmem:[#allocation7 + $0xd0] sm:$0xff] }
 0x25c   : > { %3757 = vmatprep.mubr.f32.mxu1 %v7193_v0 }
 0x25e   : > { %5897 = vmatmul.mubr.msk.f32.gmra.mrb[20].mxu0 %vm315_vm0, %v5881_v40 }
 0x25f   : > { %5913 = vmatmul.mubr.msk.f32.gmra.mrb[20].mxu1 %vm315_vm0, %v5881_v40  ;;  %3602 = vmatprep.mubr.f32.mxu0 %v7193_v0  ;;  %v4501_v40 = vld [vmem:[#allocation7 + $0xd8] sm:$0xff] }
 0x260   : > { %3763 = vmatprep.mubr.f32.mxu1 %v7193_v0 }
 0x262   : > { %5898 = vmatmul.mubr.msk.f32.gmra.mrb[22].mxu0 %vm315_vm0, %v5882_v41 }
 0x263   : > { %5914 = vmatmul.mubr.msk.f32.gmra.mrb[22].mxu1 %vm315_vm0, %v5882_v41  ;;  %3608 = vmatprep.mubr.f32.mxu0 %v7193_v0  ;;  %v5923_v41 = vld [vmem:[%s7373_s30 + $0x62] sm:$0xff] }
 0x264   : > { %3769 = vmatprep.mubr.f32.mxu1 %v7193_v0 }
 0x266   : > { %5899 = vmatmul.mubr.msk.f32.gmra.mrb[24].mxu0 %vm315_vm0, %v7969_v51 }
 0x267   : > { %5915 = vmatmul.mubr.msk.f32.gmra.mrb[24].mxu1 %vm315_vm0, %v7969_v51  ;;  %3614 = vmatprep.mubr.f32.mxu0 %v7193_v0  ;;  %v5886_v51 = vld [vmem:[%s7373_s30 + $0xe1] sm:$0xff] }
 0x268   : > { %3775 = vmatprep.mubr.f32.mxu1 %v7193_v0 }
 0x26a   : > { %5900 = vmatmul.mubr.msk.f32.gmra.mrb[26].mxu0 %vm315_vm0, %v7978_v58 }
 0x26b   : > { %5916 = vmatmul.mubr.msk.f32.gmra.mrb[26].mxu1 %vm315_vm0, %v7978_v58  ;;  %3620 = vmatprep.mubr.f32.mxu0 %v7193_v0  ;;  %v4507_v58 = vld [vmem:[#allocation7 + $0x108] sm:$0xff] }
 0x26c   : > { %3781 = vmatprep.mubr.f32.mxu1 %v7193_v0  ;;  %v6312_v11 = vpack.c.bf16 %v4507_v58, %v4506_v45  ;;  %v6298_v45 = vpack.c.bf16 %v4501_v40, %v4500_v39  ;;  %v4484_v58 = vld [vmem:[#allocation7 + $0x50] sm:$0xff] }
 0x26d   : > { %v6300_v14 = vpack.c.bf16 %v4485_v46, %v4484_v58 }
 0x26e   : > { %5901 = vmatmul.mubr.msk.f32.gmra.mrb[28].mxu0 %vm315_vm0, %v5885_v42 }
 0x26f   : > { %5917 = vmatmul.mubr.msk.f32.gmra.mrb[28].mxu1 %vm315_vm0, %v5885_v42  ;;  %3626 = vmatprep.mubr.f32.mxu0 %v7193_v0  ;;  %v4532_v42 = vld [vmem:[#allocation7 + $0x1d0] sm:$0xff] }
 0x270   : > { %3787 = vmatprep.mubr.f32.mxu1 %v7193_v0 }
 0x272   : > { %5902 = vmatmul.mubr.msk.f32.gmra.mrb[30].mxu0 %vm315_vm0, %v5886_v51 }
 0x273   : > { %5918 = vmatmul.mubr.msk.f32.gmra.mrb[30].mxu1 %vm315_vm0, %v5886_v51  ;;  %4002 = vmatprep.mubr.f32.mxu0 %v7193_v0  ;;  %v4533_v51 = vld [vmem:[#allocation7 + $0x1d8] sm:$0xff] }
 0x274   : > { %4163 = vmatprep.mubr.f32.mxu1 %v7193_v0 }
 0x276   : > { %5935 = vmatmul.mubr.msk.f32.vlgmr.msra.gmra.mrb[0].mxu0 %vm315_vm0, %v5919_v57 }
 0x277   : > { %5951 = vmatmul.mubr.msk.f32.vlgmr.msra.gmra.mrb[0].mxu1 %vm315_vm0, %v5919_v57  ;;  %4008 = vmatprep.mubr.f32.mxu0 %v7193_v0  ;;  %v6330_v57 = vpack.c.bf16 %v4533_v51, %v4532_v42 }
 0x278   : > { %4169 = vmatprep.mubr.f32.mxu1 %v7193_v0  ;;  %6281 = vmatpush3.bf16.msra.mxu0 %v6280_v10  ;;  %v4503_v10 = vld [vmem:[#allocation7 + $0xe8] sm:$0xff] }
 0x279   : > { %6313 = vmatpush3.bf16.msra.mxu1 %v6312_v11  ;;  %6283 = vmatprep.subr.bf16.mxu0 %v6282_v12  ;;  %v5924_v11 = vld [vmem:[%s7373_s30 + $0x6a] sm:$0xff] }
 0x27a   : > { %5936 = vmatmul.mubr.msk.f32.gmra.mrb[2].mxu0 %vm315_vm0, %v5920_v60  ;;  %6315 = vmatprep.subr.bf16.mxu1 %v6314_v16  ;;  %v4534_v12 = vld [vmem:[#allocation7 + $0x1e0] sm:$0xff]  ;;  %v6302_v16 = vpack.c.bf16 %v4503_v10, %v4502_v9 }
 0x27b   : > { %5952 = vmatmul.mubr.msk.f32.gmra.mrb[2].mxu1 %vm315_vm0, %v5920_v60  ;;  %4014 = vmatprep.mubr.f32.mxu0 %v7193_v0  ;;  %v6334_v60 = vpack.c.bf16 %v4535_v13, %v4534_v12 }
 0x27c   : > { %4175 = vmatprep.mubr.f32.mxu1 %v7193_v0  ;;  %6285 = vmatpush3.bf16.msra.mxu0 %v6284_v34  ;;  %v4505_v34 = vld [vmem:[#allocation7 + $0xf8] sm:$0xff] }
 0x27d   : > { %6317 = vmatpush3.bf16.msra.mxu1 %v6316_v63  ;;  %6287 = vmatprep.subr.bf16.mxu0 %v6286_v1  ;;  %v5925_v63 = vld [vmem:[%s7373_s30 + $0x7a] sm:$0xff]  ;;  %v6304_v1 = vpack.c.bf16 %v4487_v18, %v4486_v17  ;;  %v6306_v35 = vpack.c.bf16 %v4505_v34, %v4504_v62 }
 0x27e   : > { %5937 = vmatmul.mubr.msk.f32.gmra.mrb[4].mxu0 %vm315_vm0, %v5921_v19  ;;  %6319 = vmatprep.subr.bf16.mxu1 %v6318_v4  ;;  %v5927_v4 = vld [vmem:[%s7373_s30 + $0x92] sm:$0xff] }
 0x27f   : > { %5953 = vmatmul.mubr.msk.f32.gmra.mrb[4].mxu1 %vm315_vm0, %v5921_v19  ;;  %4020 = vmatprep.mubr.f32.mxu0 %v7193_v0  ;;  %v5933_v19 = vld [vmem:[%s7373_s30 + $0xda] sm:$0xff] }
 0x280   : > { %4181 = vmatprep.mubr.f32.mxu1 %v7193_v0  ;;  %6289 = vmatpush3.bf16.msra.mxu0 %v6288_v22  ;;  %v4489_v22 = vld [vmem:[#allocation7 + $0x78] sm:$0xff] }
 0x281   : > { %6321 = vmatpush3.bf16.msra.mxu1 %v6320_v23  ;;  %6291 = vmatprep.subr.bf16.mxu0 %v6290_v24  ;;  %v4520_v24 = vld [vmem:[#allocation7 + $0x170] sm:$0xff]  ;;  %v6308_v54 = vpack.c.bf16 %v4489_v22, %v4488_v21 }
 0x282   : > { %5938 = vmatmul.mubr.msk.f32.gmra.mrb[6].mxu0 %vm315_vm0, %v5922_v28  ;;  %6323 = vmatprep.subr.bf16.mxu1 %v6322_v36  ;;  %v6340_v56 = vpack.c.bf16 %v4521_v55, %v4520_v24  ;;  %v4326_v36 = vlaneseq }
 0x283   : > { %5954 = vmatmul.mubr.msk.f32.gmra.mrb[6].mxu1 %vm315_vm0, %v5922_v28  ;;  %4026 = vmatprep.mubr.f32.mxu0 %v7193_v0 }
 0x284   : > { %4187 = vmatprep.mubr.f32.mxu1 %v7193_v0  ;;  %6293 = vmatpush3.bf16.msra.mxu0 %v6292_v31  ;;  %v4327_v37 = vshrl.u32 %v4326_v36, 7 }
 0x285   : > { %6325 = vmatpush3.bf16.msra.mxu1 %v6324_v32  ;;  %6295 = vmatprep.subr.bf16.mxu0 %v6294_v33 }
 0x286   : > { %5939 = vmatmul.mubr.msk.f32.gmra.mrb[8].mxu0 %vm315_vm0, %v5923_v41  ;;  %6327 = vmatprep.subr.bf16.mxu1 %v6326_v52  ;;  %v4328_v38 = vsub.s32 0, %v4327_v37  ;;  %v4336_v27 = vsub.s32 2, %v4327_v37  ;;  %v4332_v28 = vsub.s32 1, %v4327_v37  ;;  %v4340_v29 = vsub.s32 3, %v4327_v37 }
 0x287   : > { %5955 = vmatmul.mubr.msk.f32.gmra.mrb[8].mxu1 %vm315_vm0, %v5923_v41  ;;  %4032 = vmatprep.mubr.f32.mxu0 %v7193_v0 }
 0x288   : > { %4193 = vmatprep.mubr.f32.mxu1 %v7193_v0  ;;  %6297 = vmatpush3.bf16.msra.mxu0 %v6296_v43 }
 0x289   : > { %6329 = vmatpush3.bf16.msra.mxu1 %v6328_v44  ;;  %6299 = vmatprep.subr.bf16.mxu0 %v6298_v45 }
 0x28a   : > { %5940 = vmatmul.mubr.msk.f32.gmra.mrb[10].mxu0 %vm315_vm0, %v5924_v11  ;;  %6331 = vmatprep.subr.bf16.mxu1 %v6330_v57 }
 0x28b   : > { %5956 = vmatmul.mubr.msk.f32.gmra.mrb[10].mxu1 %vm315_vm0, %v5924_v11  ;;  %4038 = vmatprep.mubr.f32.mxu0 %v7193_v0 }
 0x28c   : > { %4199 = vmatprep.mubr.f32.mxu1 %v7193_v0  ;;  %6301 = vmatpush3.bf16.msra.mxu0 %v6300_v14 }
 0x28d   : > { %6333 = vmatpush3.bf16.msra.mxu1 %v6332_v15  ;;  %6303 = vmatprep.subr.bf16.mxu0 %v6302_v16 }
 0x28e   : > { %5941 = vmatmul.mubr.msk.f32.gmra.mrb[12].mxu0 %vm315_vm0, %v5925_v63  ;;  %6335 = vmatprep.subr.bf16.mxu1 %v6334_v60 }
 0x28f   : > { %5957 = vmatmul.mubr.msk.f32.gmra.mrb[12].mxu1 %vm315_vm0, %v5925_v63  ;;  %4044 = vmatprep.mubr.f32.mxu0 %v7193_v0 }
 0x290   : > { %4205 = vmatprep.mubr.f32.mxu1 %v7193_v0  ;;  %6305 = vmatpush3.bf16.msra.mxu0 %v6304_v1 }
 0x291   : > { %6337 = vmatpush3.bf16.msra.mxu1 %v6336_v2  ;;  %6307 = vmatprep.subr.bf16.mxu0 %v6306_v35 }
 0x292   : > { %5942 = vmatmul.mubr.msk.f32.gmra.mrb[14].mxu0 %vm315_vm0, %v5926_v3 }
 0x293   : > { %5958 = vmatmul.mubr.msk.f32.gmra.mrb[14].mxu1 %vm315_vm0, %v5926_v3  ;;  %4050 = vmatprep.mubr.f32.mxu0 %v7193_v0 }
 0x294   : > { %4211 = vmatprep.mubr.f32.mxu1 %v7193_v0  ;;  %6309 = vmatpush3.bf16.msra.mxu0 %v6308_v54 }
 0x296   : > { %5943 = vmatmul.mubr.msk.f32.gmra.mrb[16].mxu0 %vm315_vm0, %v5927_v4 }
 0x297   : > { %5959 = vmatmul.mubr.msk.f32.gmra.mrb[16].mxu1 %vm315_vm0, %v5927_v4  ;;  %4056 = vmatprep.mubr.f32.mxu0 %v7193_v0 }
 0x298   : > { %4217 = vmatprep.mubr.f32.mxu1 %v7193_v0 }
 0x29a   : > { %5944 = vmatmul.mubr.msk.f32.gmra.mrb[18].mxu0 %vm315_vm0, %v5928_v5 }
 0x29b   : > { %5960 = vmatmul.mubr.msk.f32.gmra.mrb[18].mxu1 %vm315_vm0, %v5928_v5  ;;  %4062 = vmatprep.mubr.f32.mxu0 %v7193_v0 }
 0x29c   : > { %4223 = vmatprep.mubr.f32.mxu1 %v7193_v0 }
 0x29e   : > { %5945 = vmatmul.mubr.msk.f32.gmra.mrb[20].mxu0 %vm315_vm0, %v5929_v6 }
 0x29f   : > { %5961 = vmatmul.mubr.msk.f32.gmra.mrb[20].mxu1 %vm315_vm0, %v5929_v6  ;;  %4068 = vmatprep.mubr.f32.mxu0 %v7193_v0 }
 0x2a0   : > { %4229 = vmatprep.mubr.f32.mxu1 %v7193_v0 }
 0x2a2   : > { %5946 = vmatmul.mubr.msk.f32.gmra.mrb[22].mxu0 %vm315_vm0, %v5930_v7 }
 0x2a3   : > { %5962 = vmatmul.mubr.msk.f32.gmra.mrb[22].mxu1 %vm315_vm0, %v5930_v7  ;;  %4074 = vmatprep.mubr.f32.mxu0 %v7193_v0 }
 0x2a4   : > { %4235 = vmatprep.mubr.f32.mxu1 %v7193_v0 }
 0x2a6   : > { %5947 = vmatmul.mubr.msk.f32.gmra.mrb[24].mxu0 %vm315_vm0, %v8071_v25 }
 0x2a7   : > { %5963 = vmatmul.mubr.msk.f32.gmra.mrb[24].mxu1 %vm315_vm0, %v8071_v25  ;;  %4080 = vmatprep.mubr.f32.mxu0 %v7193_v0  ;;  %v5934_v25 = vld [vmem:[%s7373_s30 + $0xe2] sm:$0xff]  ;;  %s7197_s30 = smov [#allocation8]  }
 0x2a8   : > { %4241 = vmatprep.mubr.f32.mxu1 %v7193_v0  ;;  %s7118_s8 = sshll.u32 %s7197_s30, 4  ;;  %s7119_s8 = int_to_ptr.vmem [resolvable:$false] %s7118_s8 }
 0x2a9   : > { %s7120_s16 = scalar_lea.vmem %s7119_s8, 4096  ;;  %p7121_p3 = scmp.lt.s32.totalorder %s8882_s7, %s7119_s8 }
 0x2aa   : > { %5948 = vmatmul.mubr.msk.f32.gmra.mrb[26].mxu0 %vm315_vm0, %v8080_v26  ;;  %p7122_p4 = scmp.lt.s32.totalorder %s7120_s16, %s7114_s1 }
 0x2ab   : > { %5964 = vmatmul.mubr.msk.f32.gmra.mrb[26].mxu1 %vm315_vm0, %v8080_v26  ;;  %4086 = vmatprep.mubr.f32.mxu0 %v7193_v0  ;;  %v4537_v26 = vld [vmem:[#allocation7 + $0x1f8] sm:$0xff] }
 0x2ac   : > { %4247 = vmatprep.mubr.f32.mxu1 %v7193_v0  ;;  %v6338_v23 = vpack.c.bf16 %v4537_v26, %v4536_v20  ;;  %p7123_p7 = por %p7122_p4, %p7121_p3 }
 0x2ae   : > { %5949 = vmatmul.mubr.msk.f32.gmra.mrb[28].mxu0 %vm315_vm0, %v5933_v19  ;;  %6339 = vmatprep.subr.bf16.mxu1 %v6338_v23  ;;  %p7124_p8 = pnand %p7123_p7, %p7117_p2 }
 0x2af   : > { %5965 = vmatmul.mubr.msk.f32.gmra.mrb[28].mxu1 %vm315_vm0, %v5933_v19  ;;  %4092 = vmatprep.mubr.f32.mxu0 %v7193_v0 }
 0x2b0   : > { %4253 = vmatprep.mubr.f32.mxu1 %v7193_v0  ;;  %6341 = vmatpush3.bf16.msra.mxu1 %v6340_v56  ;;  %v4324_v0 = vld [vmem:[%s8932_s2] sm:$0xf] }
 0x2b1   : > { %v8336_v30 = vrot.slane %v4324_v0, %v4328_v38  ;;  %v8338_v31 = vrot.slane %v4324_v0, %v4336_v27  ;;  %v8340_v32 = vrot.slane %v4324_v0, %v4332_v28  ;;  %v8342_v33 = vrot.slane %v4324_v0, %v4340_v29 }
 0x2b2   : > { %5950 = vmatmul.mubr.msk.f32.gmra.mrb[30].mxu0 %vm315_vm0, %v5934_v25 }
 0x2b3   : > { %5966 = vmatmul.mubr.msk.f32.gmra.mrb[30].mxu1 %vm315_vm0, %v5934_v25 }
 0x349   : > { %v4004_v48 = vpop.f32.mrb[0].mxu0 }
 0x34a   : > { %v4346_v49 = vadd.f32 %v8336_v30, %v4004_v48  ;;  %v4165_v50 = vpop.f32.mrb[0].mxu1  ;;  %v4006_v52 = vpop.f32.mrb[1].mxu0 }
 0x34b   : > { %v4348_v53 = vadd.f32 %v8338_v31, %v4165_v50  ;;  %v4347_v39 = vadd.f32 %v8340_v32, %v4006_v52  ;;  %v4167_v40 = vpop.f32.mrb[1].mxu1 }
 0x34c   : > { %v4349_v41 = vadd.f32 %v8342_v33, %v4167_v40  ;;  %v4410_v43 = vmax.f32 %v4346_v49, 0.0 }
 0x34d   : > { %v4411_v42 = vmax.f32 %v4347_v39, 0.0  ;;  %v4010_v51 = vpop.f32.mrb[2].mxu0  ;;  %v4412_v47 = vmax.f32 %v4348_v53, 0.0 }
 0x34e   : > { %v4413_v44 = vmax.f32 %v4349_v41, 0.0  ;;  %v4350_v45 = vadd.f32 %v8336_v30, %v4010_v51  ;;  %v4171_v58 = vpop.f32.mrb[2].mxu1  ;;  %v4012_v46 = vpop.f32.mrb[3].mxu0 }
 0x34f   : > { %v4352_v57 = vadd.f32 %v8338_v31, %v4171_v58  ;;  %v4351_v8 = vadd.f32 %v8340_v32, %v4012_v46  ;;  %v4173_v9 = vpop.f32.mrb[3].mxu1  ;;  %4609 = vmatprep.mubr.f32.mxu0 %v4411_v42 }
 0x350   : > { %v4353_v10 = vadd.f32 %v8342_v33, %v4173_v9  ;;  %4754 = vmatprep.mubr.f32.mxu1 %v4413_v44  ;;  %4610 = vmatmul.mubr.f32.vlgmr.msra.gmra.mrb[32].mxu0 %v4410_v43  ;;  %v4414_v13 = vmax.f32 %v4350_v45, 0.0 }
 0x351   : > { %v4415_v11 = vmax.f32 %v4351_v8, 0.0  ;;  %4755 = vmatmul.mubr.f32.vlgmr.msra.gmra.mrb[32].mxu1 %v4412_v47  ;;  %v4016_v12 = vpop.f32.mrb[4].mxu0  ;;  %v4416_v18 = vmax.f32 %v4352_v57, 0.0 }
 0x352   : > { %v4417_v14 = vmax.f32 %v4353_v10, 0.0  ;;  %v4354_v15 = vadd.f32 %v8336_v30, %v4016_v12  ;;  %v4177_v16 = vpop.f32.mrb[4].mxu1  ;;  %v4018_v17 = vpop.f32.mrb[5].mxu0 }
 0x353   : > { %v4356_v59 = vadd.f32 %v8338_v31, %v4177_v16  ;;  %v4355_v60 = vadd.f32 %v8340_v32, %v4018_v17  ;;  %v4179_v61 = vpop.f32.mrb[5].mxu1  ;;  %4614 = vmatprep.mubr.f32.mxu0 %v4415_v11 }
 0x354   : > { %v4357_v62 = vadd.f32 %v8342_v33, %v4179_v61  ;;  %4759 = vmatprep.mubr.f32.mxu1 %v4417_v14  ;;  %4615 = vmatmul.mubr.f32.gmra.mrb[34].mxu0 %v4414_v13  ;;  %v4418_v1 = vmax.f32 %v4354_v15, 0.0 }
 0x355   : > { %v4419_v34 = vmax.f32 %v4355_v60, 0.0  ;;  %4760 = vmatmul.mubr.f32.gmra.mrb[34].mxu1 %v4416_v18  ;;  %v4022_v63 = vpop.f32.mrb[6].mxu0  ;;  %v4420_v5 = vmax.f32 %v4356_v59, 0.0 }
 0x356   : > { %v4421_v2 = vmax.f32 %v4357_v62, 0.0  ;;  %v4358_v35 = vadd.f32 %v8336_v30, %v4022_v63  ;;  %v4183_v3 = vpop.f32.mrb[6].mxu1  ;;  %v4024_v4 = vpop.f32.mrb[7].mxu0 }
 0x357   : > { %v4360_v6 = vadd.f32 %v8338_v31, %v4183_v3  ;;  %v4359_v7 = vadd.f32 %v8340_v32, %v4024_v4  ;;  %v4185_v19 = vpop.f32.mrb[7].mxu1  ;;  %4619 = vmatprep.mubr.f32.mxu0 %v4419_v34 }
 0x358   : > { %v4361_v25 = vadd.f32 %v8342_v33, %v4185_v19  ;;  %4764 = vmatprep.mubr.f32.mxu1 %v4421_v2  ;;  %4620 = vmatmul.mubr.f32.gmra.mrb[36].mxu0 %v4418_v1  ;;  %v4422_v21 = vmax.f32 %v4358_v35, 0.0 }
 0x359   : > { %v4423_v20 = vmax.f32 %v4359_v7, 0.0  ;;  %4765 = vmatmul.mubr.f32.gmra.mrb[36].mxu1 %v4420_v5  ;;  %v4028_v26 = vpop.f32.mrb[8].mxu0  ;;  %v4424_v55 = vmax.f32 %v4360_v6, 0.0 }
 0x35a   : > { %v4425_v22 = vmax.f32 %v4361_v25, 0.0  ;;  %v4362_v23 = vadd.f32 %v8336_v30, %v4028_v26  ;;  %v4189_v24 = vpop.f32.mrb[8].mxu1  ;;  %v4030_v54 = vpop.f32.mrb[9].mxu0 }
 0x35b   : > { %v4364_v56 = vadd.f32 %v8338_v31, %v4189_v24  ;;  %v4363_v36 = vadd.f32 %v8340_v32, %v4030_v54  ;;  %v4191_v37 = vpop.f32.mrb[9].mxu1  ;;  %4624 = vmatprep.mubr.f32.mxu0 %v4423_v20 }
 0x35c   : > { %v4365_v38 = vadd.f32 %v8342_v33, %v4191_v37  ;;  %4769 = vmatprep.mubr.f32.mxu1 %v4425_v22  ;;  %4625 = vmatmul.mubr.f32.gmra.mrb[38].mxu0 %v4422_v21  ;;  %v4426_v28 = vmax.f32 %v4362_v23, 0.0 }
 0x35d   : > { %v4427_v0 = vmax.f32 %v4363_v36, 0.0  ;;  %4770 = vmatmul.mubr.f32.gmra.mrb[38].mxu1 %v4424_v55  ;;  %v4034_v27 = vpop.f32.mrb[10].mxu0  ;;  %v4428_v52 = vmax.f32 %v4364_v56, 0.0 }
 0x35e   : > { %v4429_v29 = vmax.f32 %v4365_v38, 0.0  ;;  %v4366_v48 = vadd.f32 %v8336_v30, %v4034_v27  ;;  %v4195_v49 = vpop.f32.mrb[10].mxu1  ;;  %v4036_v50 = vpop.f32.mrb[11].mxu0 }
 0x35f   : > { %v4368_v53 = vadd.f32 %v8338_v31, %v4195_v49  ;;  %v4367_v39 = vadd.f32 %v8340_v32, %v4036_v50  ;;  %v4197_v40 = vpop.f32.mrb[11].mxu1  ;;  %4629 = vmatprep.mubr.f32.mxu0 %v4427_v0 }
 0x360   : > { %v4369_v41 = vadd.f32 %v8342_v33, %v4197_v40  ;;  %4774 = vmatprep.mubr.f32.mxu1 %v4429_v29  ;;  %4630 = vmatmul.mubr.f32.gmra.mrb[40].mxu0 %v4426_v28  ;;  %v4430_v43 = vmax.f32 %v4366_v48, 0.0 }
 0x361   : > { %v4431_v42 = vmax.f32 %v4367_v39, 0.0  ;;  %4775 = vmatmul.mubr.f32.gmra.mrb[40].mxu1 %v4428_v52  ;;  %v4040_v51 = vpop.f32.mrb[12].mxu0  ;;  %v4432_v47 = vmax.f32 %v4368_v53, 0.0 }
 0x362   : > { %v4433_v44 = vmax.f32 %v4369_v41, 0.0  ;;  %v4370_v45 = vadd.f32 %v8336_v30, %v4040_v51  ;;  %v4201_v58 = vpop.f32.mrb[12].mxu1  ;;  %v4042_v46 = vpop.f32.mrb[13].mxu0 }
 0x363   : > { %v4372_v57 = vadd.f32 %v8338_v31, %v4201_v58  ;;  %v4371_v8 = vadd.f32 %v8340_v32, %v4042_v46  ;;  %v4203_v9 = vpop.f32.mrb[13].mxu1  ;;  %4634 = vmatprep.mubr.f32.mxu0 %v4431_v42 }
 0x364   : > { %v4373_v10 = vadd.f32 %v8342_v33, %v4203_v9  ;;  %4779 = vmatprep.mubr.f32.mxu1 %v4433_v44  ;;  %4635 = vmatmul.mubr.f32.gmra.mrb[42].mxu0 %v4430_v43  ;;  %v4434_v13 = vmax.f32 %v4370_v45, 0.0 }
 0x365   : > { %v4435_v11 = vmax.f32 %v4371_v8, 0.0  ;;  %4780 = vmatmul.mubr.f32.gmra.mrb[42].mxu1 %v4432_v47  ;;  %v4046_v12 = vpop.f32.mrb[14].mxu0  ;;  %v4436_v18 = vmax.f32 %v4372_v57, 0.0 }
 0x366   : > { %v4437_v14 = vmax.f32 %v4373_v10, 0.0  ;;  %v4374_v15 = vadd.f32 %v8336_v30, %v4046_v12  ;;  %v4207_v16 = vpop.f32.mrb[14].mxu1  ;;  %v4048_v17 = vpop.f32.mrb[15].mxu0 }
 0x367   : > { %v4376_v59 = vadd.f32 %v8338_v31, %v4207_v16  ;;  %v4375_v60 = vadd.f32 %v8340_v32, %v4048_v17  ;;  %v4209_v61 = vpop.f32.mrb[15].mxu1  ;;  %4639 = vmatprep.mubr.f32.mxu0 %v4435_v11 }
 0x368   : > { %v4377_v62 = vadd.f32 %v8342_v33, %v4209_v61  ;;  %4784 = vmatprep.mubr.f32.mxu1 %v4437_v14  ;;  %4640 = vmatmul.mubr.f32.gmra.mrb[44].mxu0 %v4434_v13  ;;  %v4438_v1 = vmax.f32 %v4374_v15, 0.0 }
 0x369   : > { %v4439_v34 = vmax.f32 %v4375_v60, 0.0  ;;  %4785 = vmatmul.mubr.f32.gmra.mrb[44].mxu1 %v4436_v18  ;;  %v4052_v63 = vpop.f32.mrb[16].mxu0  ;;  %v4440_v5 = vmax.f32 %v4376_v59, 0.0 }
 0x36a   : > { %v4441_v2 = vmax.f32 %v4377_v62, 0.0  ;;  %v4378_v35 = vadd.f32 %v8336_v30, %v4052_v63  ;;  %v4213_v3 = vpop.f32.mrb[16].mxu1  ;;  %v4054_v4 = vpop.f32.mrb[17].mxu0 }
 0x36b   : > { %v4380_v6 = vadd.f32 %v8338_v31, %v4213_v3  ;;  %v4379_v7 = vadd.f32 %v8340_v32, %v4054_v4  ;;  %v4215_v19 = vpop.f32.mrb[17].mxu1  ;;  %4644 = vmatprep.mubr.f32.mxu0 %v4439_v34 }
 0x36c   : > { %v4381_v25 = vadd.f32 %v8342_v33, %v4215_v19  ;;  %4789 = vmatprep.mubr.f32.mxu1 %v4441_v2  ;;  %4645 = vmatmul.mubr.f32.gmra.mrb[46].mxu0 %v4438_v1  ;;  %v4442_v21 = vmax.f32 %v4378_v35, 0.0 }
 0x36d   : > { %v4443_v20 = vmax.f32 %v4379_v7, 0.0  ;;  %4790 = vmatmul.mubr.f32.gmra.mrb[46].mxu1 %v4440_v5  ;;  %v4058_v26 = vpop.f32.mrb[18].mxu0  ;;  %v4444_v55 = vmax.f32 %v4380_v6, 0.0 }
 0x36e   : > { %v4445_v22 = vmax.f32 %v4381_v25, 0.0  ;;  %v4382_v23 = vadd.f32 %v8336_v30, %v4058_v26  ;;  %v4219_v24 = vpop.f32.mrb[18].mxu1  ;;  %v4060_v54 = vpop.f32.mrb[19].mxu0 }
 0x36f   : > { %v4384_v56 = vadd.f32 %v8338_v31, %v4219_v24  ;;  %v4383_v36 = vadd.f32 %v8340_v32, %v4060_v54  ;;  %v4221_v37 = vpop.f32.mrb[19].mxu1  ;;  %4649 = vmatprep.mubr.f32.mxu0 %v4443_v20 }
 0x370   : > { %v4385_v38 = vadd.f32 %v8342_v33, %v4221_v37  ;;  %4794 = vmatprep.mubr.f32.mxu1 %v4445_v22  ;;  %4650 = vmatmul.mubr.f32.gmra.mrb[48].mxu0 %v4442_v21  ;;  %v4446_v28 = vmax.f32 %v4382_v23, 0.0 }
 0x371   : > { %v4447_v0 = vmax.f32 %v4383_v36, 0.0  ;;  %4795 = vmatmul.mubr.f32.gmra.mrb[48].mxu1 %v4444_v55  ;;  %v4064_v27 = vpop.f32.mrb[20].mxu0  ;;  %v4448_v52 = vmax.f32 %v4384_v56, 0.0 }
 0x372   : > { %v4449_v29 = vmax.f32 %v4385_v38, 0.0  ;;  %v4386_v48 = vadd.f32 %v8336_v30, %v4064_v27  ;;  %v4225_v49 = vpop.f32.mrb[20].mxu1  ;;  %v4066_v50 = vpop.f32.mrb[21].mxu0 }
 0x373   : > { %v4388_v53 = vadd.f32 %v8338_v31, %v4225_v49  ;;  %v4387_v39 = vadd.f32 %v8340_v32, %v4066_v50  ;;  %v4227_v40 = vpop.f32.mrb[21].mxu1  ;;  %4654 = vmatprep.mubr.f32.mxu0 %v4447_v0 }
 0x374   : > { %v4389_v41 = vadd.f32 %v8342_v33, %v4227_v40  ;;  %4799 = vmatprep.mubr.f32.mxu1 %v4449_v29  ;;  %4655 = vmatmul.mubr.f32.gmra.mrb[50].mxu0 %v4446_v28  ;;  %v4450_v43 = vmax.f32 %v4386_v48, 0.0 }
 0x375   : > { %v4451_v42 = vmax.f32 %v4387_v39, 0.0  ;;  %4800 = vmatmul.mubr.f32.gmra.mrb[50].mxu1 %v4448_v52  ;;  %v4070_v51 = vpop.f32.mrb[22].mxu0  ;;  %v4452_v47 = vmax.f32 %v4388_v53, 0.0 }
 0x376   : > { %v4453_v44 = vmax.f32 %v4389_v41, 0.0  ;;  %v4390_v45 = vadd.f32 %v8336_v30, %v4070_v51  ;;  %v4231_v58 = vpop.f32.mrb[22].mxu1  ;;  %v4072_v46 = vpop.f32.mrb[23].mxu0 }
 0x377   : > { %v4392_v57 = vadd.f32 %v8338_v31, %v4231_v58  ;;  %v4391_v8 = vadd.f32 %v8340_v32, %v4072_v46  ;;  %v4233_v9 = vpop.f32.mrb[23].mxu1  ;;  %4659 = vmatprep.mubr.f32.mxu0 %v4451_v42 }
 0x378   : > { %v4393_v10 = vadd.f32 %v8342_v33, %v4233_v9  ;;  %4804 = vmatprep.mubr.f32.mxu1 %v4453_v44  ;;  %4660 = vmatmul.mubr.f32.gmra.mrb[52].mxu0 %v4450_v43  ;;  %v4454_v13 = vmax.f32 %v4390_v45, 0.0 }
 0x379   : > { %v4455_v11 = vmax.f32 %v4391_v8, 0.0  ;;  %4805 = vmatmul.mubr.f32.gmra.mrb[52].mxu1 %v4452_v47  ;;  %v4076_v12 = vpop.f32.mrb[24].mxu0  ;;  %v4456_v18 = vmax.f32 %v4392_v57, 0.0 }
 0x37a   : > { %v4457_v14 = vmax.f32 %v4393_v10, 0.0  ;;  %v4394_v15 = vadd.f32 %v8336_v30, %v4076_v12  ;;  %v4237_v16 = vpop.f32.mrb[24].mxu1  ;;  %v4078_v17 = vpop.f32.mrb[25].mxu0 }
 0x37b   : > { %v4396_v59 = vadd.f32 %v8338_v31, %v4237_v16  ;;  %v4395_v60 = vadd.f32 %v8340_v32, %v4078_v17  ;;  %v4239_v61 = vpop.f32.mrb[25].mxu1  ;;  %4664 = vmatprep.mubr.f32.mxu0 %v4455_v11 }
 0x37c   : > { %v4397_v62 = vadd.f32 %v8342_v33, %v4239_v61  ;;  %4809 = vmatprep.mubr.f32.mxu1 %v4457_v14  ;;  %4665 = vmatmul.mubr.f32.gmra.mrb[54].mxu0 %v4454_v13  ;;  %v4458_v1 = vmax.f32 %v4394_v15, 0.0 }
 0x37d   : > { %v4459_v34 = vmax.f32 %v4395_v60, 0.0  ;;  %4810 = vmatmul.mubr.f32.gmra.mrb[54].mxu1 %v4456_v18  ;;  %v4082_v63 = vpop.f32.mrb[26].mxu0  ;;  %v4460_v5 = vmax.f32 %v4396_v59, 0.0 }
 0x37e   : > { %v4461_v2 = vmax.f32 %v4397_v62, 0.0  ;;  %v4398_v35 = vadd.f32 %v8336_v30, %v4082_v63  ;;  %v4243_v3 = vpop.f32.mrb[26].mxu1  ;;  %v4084_v4 = vpop.f32.mrb[27].mxu0 }
 0x37f   : > { %v4400_v6 = vadd.f32 %v8338_v31, %v4243_v3  ;;  %v4399_v7 = vadd.f32 %v8340_v32, %v4084_v4  ;;  %v4245_v19 = vpop.f32.mrb[27].mxu1  ;;  %4669 = vmatprep.mubr.f32.mxu0 %v4459_v34 }
 0x380   : > { %v4401_v25 = vadd.f32 %v8342_v33, %v4245_v19  ;;  %4814 = vmatprep.mubr.f32.mxu1 %v4461_v2  ;;  %4670 = vmatmul.mubr.f32.gmra.mrb[56].mxu0 %v4458_v1  ;;  %v4462_v21 = vmax.f32 %v4398_v35, 0.0 }
 0x381   : > { %v4463_v20 = vmax.f32 %v4399_v7, 0.0  ;;  %4815 = vmatmul.mubr.f32.gmra.mrb[56].mxu1 %v4460_v5  ;;  %v4088_v26 = vpop.f32.mrb[28].mxu0  ;;  %v4464_v55 = vmax.f32 %v4400_v6, 0.0 }
 0x382   : > { %v4465_v22 = vmax.f32 %v4401_v25, 0.0  ;;  %v4402_v23 = vadd.f32 %v8336_v30, %v4088_v26  ;;  %v4249_v24 = vpop.f32.mrb[28].mxu1  ;;  %v4090_v54 = vpop.f32.mrb[29].mxu0 }
 0x383   : > { %v4404_v56 = vadd.f32 %v8338_v31, %v4249_v24  ;;  %v4403_v36 = vadd.f32 %v8340_v32, %v4090_v54  ;;  %v4251_v37 = vpop.f32.mrb[29].mxu1  ;;  %4674 = vmatprep.mubr.f32.mxu0 %v4463_v20 }
 0x384   : > { %v4405_v38 = vadd.f32 %v8342_v33, %v4251_v37  ;;  %4819 = vmatprep.mubr.f32.mxu1 %v4465_v22  ;;  %4675 = vmatmul.mubr.f32.gmra.mrb[58].mxu0 %v4462_v21  ;;  %v4466_v28 = vmax.f32 %v4402_v23, 0.0 }
 0x385   : > { %v4467_v0 = vmax.f32 %v4403_v36, 0.0  ;;  %4820 = vmatmul.mubr.f32.gmra.mrb[58].mxu1 %v4464_v55  ;;  %v4094_v27 = vpop.f32.mrb[30].mxu0  ;;  %v4468_v52 = vmax.f32 %v4404_v56, 0.0 }
 0x386   : > { %v4469_v29 = vmax.f32 %v4405_v38, 0.0  ;;  %v4406_v48 = vadd.f32 %v8336_v30, %v4094_v27  ;;  %v4255_v49 = vpop.f32.mrb[30].mxu1  ;;  %v4096_v50 = vpop.f32.mrb[31].mxu0 }
 0x387   : > { %v4408_v53 = vadd.f32 %v8338_v31, %v4255_v49  ;;  %v4407_v39 = vadd.f32 %v8340_v32, %v4096_v50  ;;  %v4257_v40 = vpop.f32.mrb[31].mxu1  ;;  %4679 = vmatprep.mubr.f32.mxu0 %v4467_v0  ;;  %v8411_v31 = vld [vmem:[%s8934_s4] ss:$0 sm:$0xff] }
 0x388   : > { %v4409_v41 = vadd.f32 %v8342_v33, %v4257_v40  ;;  %4824 = vmatprep.mubr.f32.mxu1 %v4469_v29  ;;  %4680 = vmatmul.mubr.f32.gmra.mrb[60].mxu0 %v4466_v28  ;;  %v4470_v51 = vmax.f32 %v4406_v48, 0.0 }
 0x389   : > { %v4471_v42 = vmax.f32 %v4407_v39, 0.0  ;;  %4825 = vmatmul.mubr.f32.gmra.mrb[60].mxu1 %v4468_v52  ;;  %v4472_v44 = vmax.f32 %v4408_v53, 0.0 }
 0x38a   : > { %v4473_v43 = vmax.f32 %v4409_v41, 0.0 }
 0x38b   : > { %4684 = vmatprep.mubr.f32.mxu0 %v4471_v42 }
 0x38c   : > { %4829 = vmatprep.mubr.f32.mxu1 %v4473_v43  ;;  %4685 = vmatmul.mubr.f32.gmra.mrb[62].mxu0 %v4470_v51 }
 0x38d   : > { %4830 = vmatmul.mubr.f32.gmra.mrb[62].mxu1 %v4472_v44 }
 0x423   : > { %v6006_v30 = vpop.f32.mrb[32].mxu0 }
 0x424   : > { %v6086_v45 = vpop.f32.mrb[32].mxu1  ;;  %v6007_v32 = vpop.f32.mrb[33].mxu0 }
 0x425   : > { %v6008_v33 = vadd.f32 %v6007_v32, %v6006_v30  ;;  %v6087_v58 = vpop.f32.mrb[33].mxu1 }
 0x426   : > { %v6088_v46 = vadd.f32 %v6087_v58, %v6086_v45 }
 0x427   : > { %v4612_v47 = vadd.f32 %v6008_v33, %v8411_v31  ;;  %v6009_v57 = vpop.f32.mrb[34].mxu0 }
 0x428   : > { %v6089_v8 = vpop.f32.mrb[34].mxu1  ;;  %v6010_v9 = vpop.f32.mrb[35].mxu0 }
 0x429   : > { %v8414_v10 = vadd.f32 %v6088_v46, %v4612_v47  ;;  %v6011_v11 = vadd.f32 %v6010_v9, %v6009_v57  ;;  %v6090_v12 = vpop.f32.mrb[35].mxu1 }
 0x42a   : > { %v6091_v13 = vadd.f32 %v6090_v12, %v6089_v8 }
 0x42b   : > { %v4617_v14 = vadd.f32 %v6011_v11, %v8411_v31  ;;  %v6012_v15 = vpop.f32.mrb[36].mxu0  ;;  %4851 = vrot.lane.b32.xlu0 %v8414_v10, %s7194_s12 }
 0x42c   : > { %v6092_v16 = vpop.f32.mrb[36].mxu1  ;;  %v6013_v17 = vpop.f32.mrb[37].mxu0 }
 0x42d   : > { %v8419_v18 = vadd.f32 %v6091_v13, %v4617_v14  ;;  %v6014_v59 = vadd.f32 %v6013_v17, %v6012_v15  ;;  %v6093_v60 = vpop.f32.mrb[37].mxu1 }
 0x42e   : > { %v6094_v61 = vadd.f32 %v6093_v60, %v6092_v16 }
 0x42f   : > { %v4622_v62 = vadd.f32 %v6014_v59, %v8411_v31  ;;  %v6015_v34 = vpop.f32.mrb[38].mxu0  ;;  %4853 = vrot.lane.b32.xlu0 %v8419_v18, %s7194_s12 }
 0x430   : > { %v6095_v63 = vpop.f32.mrb[38].mxu1  ;;  %v6016_v1 = vpop.f32.mrb[39].mxu0 }
 0x431   : > { %v8424_v2 = vadd.f32 %v6094_v61, %v4622_v62  ;;  %v6017_v35 = vadd.f32 %v6016_v1, %v6015_v34  ;;  %v6096_v3 = vpop.f32.mrb[39].mxu1 }
 0x432   : > { %v6097_v4 = vadd.f32 %v6096_v3, %v6095_v63 }
 0x433   : > { %v4627_v5 = vadd.f32 %v6017_v35, %v8411_v31  ;;  %v6018_v6 = vpop.f32.mrb[40].mxu0  ;;  %4855 = vrot.lane.b32.xlu1 %v8424_v2, %s7194_s12 }
 0x434   : > { %v6098_v7 = vpop.f32.mrb[40].mxu1  ;;  %v6019_v19 = vpop.f32.mrb[41].mxu0 }
 0x435   : > { %v8429_v25 = vadd.f32 %v6097_v4, %v4627_v5  ;;  %v6020_v20 = vadd.f32 %v6019_v19, %v6018_v6  ;;  %v6099_v26 = vpop.f32.mrb[41].mxu1 }
 0x436   : > { %v6100_v21 = vadd.f32 %v6099_v26, %v6098_v7 }
 0x437   : > { %v4632_v22 = vadd.f32 %v6020_v20, %v8411_v31  ;;  %v6021_v23 = vpop.f32.mrb[42].mxu0  ;;  %4857 = vrot.lane.b32.xlu1 %v8429_v25, %s7194_s12 }
 0x438   : > { %v6101_v24 = vpop.f32.mrb[42].mxu1  ;;  %v6022_v54 = vpop.f32.mrb[43].mxu0 }
 0x439   : > { %v8434_v55 = vadd.f32 %v6100_v21, %v4632_v22  ;;  %v6023_v56 = vadd.f32 %v6022_v54, %v6021_v23  ;;  %v6102_v36 = vpop.f32.mrb[43].mxu1 }
 0x43a   : > { %v6103_v37 = vadd.f32 %v6102_v36, %v6101_v24 }
 0x43b   : > { %v4637_v38 = vadd.f32 %v6023_v56, %v8411_v31  ;;  %v6024_v0 = vpop.f32.mrb[44].mxu0  ;;  %4859 = vrot.lane.b32.xlu0 %v8434_v55, %s7194_s12 }
 0x43c   : > { %v6104_v27 = vpop.f32.mrb[44].mxu1  ;;  %v6025_v28 = vpop.f32.mrb[45].mxu0 }
 0x43d   : > { %v8439_v29 = vadd.f32 %v6103_v37, %v4637_v38  ;;  %v6026_v48 = vadd.f32 %v6025_v28, %v6024_v0  ;;  %v6105_v49 = vpop.f32.mrb[45].mxu1 }
 0x43e   : > { %v6106_v50 = vadd.f32 %v6105_v49, %v6104_v27 }
 0x43f   : > { %v4642_v52 = vadd.f32 %v6026_v48, %v8411_v31  ;;  %v6027_v53 = vpop.f32.mrb[46].mxu0  ;;  %4861 = vrot.lane.b32.xlu1 %v8439_v29, %s7194_s12 }
 0x440   : > { %v6107_v39 = vpop.f32.mrb[46].mxu1  ;;  %v6028_v40 = vpop.f32.mrb[47].mxu0 }
 0x441   : > { %v8444_v41 = vadd.f32 %v6106_v50, %v4642_v52  ;;  %v6029_v42 = vadd.f32 %v6028_v40, %v6027_v53  ;;  %v6108_v51 = vpop.f32.mrb[47].mxu1 }
 0x442   : > { %v6109_v43 = vadd.f32 %v6108_v51, %v6107_v39 }
 0x443   : > { %v4647_v44 = vadd.f32 %v6029_v42, %v8411_v31  ;;  %v6030_v30 = vpop.f32.mrb[48].mxu0  ;;  %4863 = vrot.lane.b32.xlu0 %v8444_v41, %s7194_s12 }
 0x444   : > { %v6110_v45 = vpop.f32.mrb[48].mxu1  ;;  %v6031_v32 = vpop.f32.mrb[49].mxu0 }
 0x445   : > { %v8449_v33 = vadd.f32 %v6109_v43, %v4647_v44  ;;  %v6032_v58 = vadd.f32 %v6031_v32, %v6030_v30  ;;  %v6111_v46 = vpop.f32.mrb[49].mxu1 }
 0x446   : > { %v6112_v47 = vadd.f32 %v6111_v46, %v6110_v45 }
 0x447   : > { %v4652_v57 = vadd.f32 %v6032_v58, %v8411_v31  ;;  %v6033_v8 = vpop.f32.mrb[50].mxu0  ;;  %4865 = vrot.lane.b32.xlu1 %v8449_v33, %s7194_s12 }
 0x448   : > { %v6113_v9 = vpop.f32.mrb[50].mxu1  ;;  %v6034_v11 = vpop.f32.mrb[51].mxu0 }
 0x449   : > { %v8454_v12 = vadd.f32 %v6112_v47, %v4652_v57  ;;  %v6035_v13 = vadd.f32 %v6034_v11, %v6033_v8  ;;  %v6114_v14 = vpop.f32.mrb[51].mxu1 }
 0x44a   : > { %v6115_v15 = vadd.f32 %v6114_v14, %v6113_v9 }
 0x44b   : > { %v4657_v16 = vadd.f32 %v6035_v13, %v8411_v31  ;;  %v6036_v17 = vpop.f32.mrb[52].mxu0  ;;  %4867 = vrot.lane.b32.xlu0 %v8454_v12, %s7194_s12 }
 0x44c   : > { %v6116_v59 = vpop.f32.mrb[52].mxu1  ;;  %v6037_v60 = vpop.f32.mrb[53].mxu0 }
 0x44d   : > { %v8459_v61 = vadd.f32 %v6115_v15, %v4657_v16  ;;  %v6038_v62 = vadd.f32 %v6037_v60, %v6036_v17  ;;  %v6117_v34 = vpop.f32.mrb[53].mxu1 }
 0x44e   : > { %v6118_v63 = vadd.f32 %v6117_v34, %v6116_v59 }
 0x44f   : > { %v4662_v1 = vadd.f32 %v6038_v62, %v8411_v31  ;;  %v6039_v35 = vpop.f32.mrb[54].mxu0  ;;  %4869 = vrot.lane.b32.xlu1 %v8459_v61, %s7194_s12 }
 0x450   : > { %v6119_v3 = vpop.f32.mrb[54].mxu1  ;;  %v6040_v4 = vpop.f32.mrb[55].mxu0 }
 0x451   : > { %v8464_v5 = vadd.f32 %v6118_v63, %v4662_v1  ;;  %v6041_v6 = vadd.f32 %v6040_v4, %v6039_v35  ;;  %v6120_v7 = vpop.f32.mrb[55].mxu1 }
 0x452   : > { %v6121_v19 = vadd.f32 %v6120_v7, %v6119_v3 }
 0x453   : > { %v4667_v20 = vadd.f32 %v6041_v6, %v8411_v31  ;;  %v6042_v26 = vpop.f32.mrb[56].mxu0  ;;  %4871 = vrot.lane.b32.xlu0 %v8464_v5, %s7194_s12 }
 0x454   : > { %v6122_v21 = vpop.f32.mrb[56].mxu1  ;;  %v6043_v22 = vpop.f32.mrb[57].mxu0 }
 0x455   : > { %v8469_v23 = vadd.f32 %v6121_v19, %v4667_v20  ;;  %v6044_v24 = vadd.f32 %v6043_v22, %v6042_v26  ;;  %v6123_v54 = vpop.f32.mrb[57].mxu1 }
 0x456   : > { %v6124_v56 = vadd.f32 %v6123_v54, %v6122_v21 }
 0x457   : > { %v4672_v36 = vadd.f32 %v6044_v24, %v8411_v31  ;;  %v6045_v37 = vpop.f32.mrb[58].mxu0  ;;  %4873 = vrot.lane.b32.xlu1 %v8469_v23, %s7194_s12 }
 0x458   : > { %v6125_v38 = vpop.f32.mrb[58].mxu1  ;;  %v6046_v0 = vpop.f32.mrb[59].mxu0 }
 0x459   : > { %v8474_v27 = vadd.f32 %v6124_v56, %v4672_v36  ;;  %v6047_v28 = vadd.f32 %v6046_v0, %v6045_v37  ;;  %v6126_v48 = vpop.f32.mrb[59].mxu1 }
 0x45a   : > { %v6127_v49 = vadd.f32 %v6126_v48, %v6125_v38 }
 0x45b   : > { %v4677_v50 = vadd.f32 %v6047_v28, %v8411_v31  ;;  %v6048_v52 = vpop.f32.mrb[60].mxu0  ;;  %4875 = vrot.lane.b32.xlu0 %v8474_v27, %s7194_s12 }
 0x45c   : > { %v6128_v53 = vpop.f32.mrb[60].mxu1  ;;  %v6049_v39 = vpop.f32.mrb[61].mxu0 }
 0x45d   : > { %v8479_v40 = vadd.f32 %v6127_v49, %v4677_v50  ;;  %v6050_v42 = vadd.f32 %v6049_v39, %v6048_v52  ;;  %v6129_v51 = vpop.f32.mrb[61].mxu1 }
 0x45e   : > { %v6130_v43 = vadd.f32 %v6129_v51, %v6128_v53 }
 0x45f   : > { %v4682_v44 = vadd.f32 %v6050_v42, %v8411_v31  ;;  %4877 = vrot.lane.b32.xlu1 %v8479_v40, %s7194_s12  ;;  %v6051_v30 = vpop.f32.mrb[62].mxu0 }
 0x460   : > { %v6131_v45 = vpop.f32.mrb[62].mxu1  ;;  %v6052_v32 = vpop.f32.mrb[63].mxu0 }
 0x461   : > { %v8484_v58 = vadd.f32 %v6130_v43, %v4682_v44  ;;  %v6053_v46 = vadd.f32 %v6052_v32, %v6051_v30  ;;  %v6132_v47 = vpop.f32.mrb[63].mxu1 }
 0x462   : > { %v6133_v57 = vadd.f32 %v6132_v47, %v6131_v45 }
 0x463   : > { %v4687_v8 = vadd.f32 %v6053_v46, %v8411_v31  ;;  %4879 = vrot.lane.b32.xlu0 %v8484_v58, %s7194_s12 }
 0x465   : > { %v8489_v9 = vadd.f32 %v6133_v57, %v4687_v8 }
 0x467   : > { %4881 = vrot.lane.b32.xlu1 %v8489_v9, %s7194_s12 }
 0x49d   : > { %v4852_v11 = vpop.permute.xlu0 %4851 }
 0x49e   : > { %v8494_v13 = vmax.f32 %v8414_v10, %v4852_v11 }
 0x4a0   : > { %4979 = vrot.lane.b32.xlu0 %v8494_v13, %s7195_s13 }
 0x4a1   : > { %v4854_v14 = vpop.permute.xlu0 %4853 }
 0x4a2   : > { %v8499_v15 = vmax.f32 %v8419_v18, %v4854_v14 }
 0x4a4   : > { %4981 = vrot.lane.b32.xlu1 %v8499_v15, %s7195_s13 }
 0x4a5   : > { %v4856_v31 = vpop.permute.xlu1 %4855 }
 0x4a6   : > { %v8504_v16 = vmax.f32 %v8424_v2, %v4856_v31 }
 0x4a8   : > { %4983 = vrot.lane.b32.xlu0 %v8504_v16, %s7195_s13 }
 0x4a9   : > { %v4858_v17 = vpop.permute.xlu1 %4857 }
 0x4aa   : > { %v8509_v59 = vmax.f32 %v8429_v25, %v4858_v17 }
 0x4ac   : > { %4985 = vrot.lane.b32.xlu1 %v8509_v59, %s7195_s13 }
 0x4ad   : > { %v4860_v60 = vpop.permute.xlu0 %4859 }
 0x4ae   : > { %v8514_v62 = vmax.f32 %v8434_v55, %v4860_v60 }
 0x4b0   : > { %4987 = vrot.lane.b32.xlu0 %v8514_v62, %s7195_s13 }
 0x4b1   : > { %v4862_v34 = vpop.permute.xlu1 %4861 }
 0x4b2   : > { %v8519_v63 = vmax.f32 %v8439_v29, %v4862_v34 }
 0x4b4   : > { %4989 = vrot.lane.b32.xlu1 %v8519_v63, %s7195_s13 }
 0x4b5   : > { %v4864_v1 = vpop.permute.xlu0 %4863 }
 0x4b6   : > { %v8524_v35 = vmax.f32 %v8444_v41, %v4864_v1 }
 0x4b8   : > { %4991 = vrot.lane.b32.xlu0 %v8524_v35, %s7195_s13 }
 0x4b9   : > { %v4866_v3 = vpop.permute.xlu1 %4865 }
 0x4ba   : > { %v8529_v4 = vmax.f32 %v8449_v33, %v4866_v3 }
 0x4bc   : > { %4993 = vrot.lane.b32.xlu1 %v8529_v4, %s7195_s13 }
 0x4bd   : > { %v4868_v6 = vpop.permute.xlu0 %4867 }
 0x4be   : > { %v8534_v7 = vmax.f32 %v8454_v12, %v4868_v6 }
 0x4c0   : > { %4995 = vrot.lane.b32.xlu0 %v8534_v7, %s7195_s13 }
 0x4c1   : > { %v4870_v19 = vpop.permute.xlu1 %4869 }
 0x4c2   : > { %v8539_v20 = vmax.f32 %v8459_v61, %v4870_v19 }
 0x4c4   : > { %4997 = vrot.lane.b32.xlu1 %v8539_v20, %s7195_s13 }
 0x4c5   : > { %v4872_v26 = vpop.permute.xlu0 %4871 }
 0x4c6   : > { %v8544_v21 = vmax.f32 %v8464_v5, %v4872_v26 }
 0x4c8   : > { %4999 = vrot.lane.b32.xlu0 %v8544_v21, %s7195_s13 }
 0x4c9   : > { %v4874_v22 = vpop.permute.xlu1 %4873 }
 0x4ca   : > { %v8549_v24 = vmax.f32 %v8469_v23, %v4874_v22 }
 0x4cc   : > { %5001 = vrot.lane.b32.xlu1 %v8549_v24, %s7195_s13 }
 0x4cd   : > { %v4876_v54 = vpop.permute.xlu0 %4875 }
 0x4ce   : > { %v8554_v56 = vmax.f32 %v8474_v27, %v4876_v54 }
 0x4d0   : > { %5003 = vrot.lane.b32.xlu0 %v8554_v56, %s7195_s13 }
 0x4d1   : > { %v4878_v36 = vpop.permute.xlu1 %4877 }
 0x4d2   : > { %v8559_v37 = vmax.f32 %v8479_v40, %v4878_v36 }
 0x4d4   : > { %5005 = vrot.lane.b32.xlu1 %v8559_v37, %s7195_s13 }
 0x4d5   : > { %v4880_v38 = vpop.permute.xlu0 %4879 }
 0x4d6   : > { %v8564_v0 = vmax.f32 %v8484_v58, %v4880_v38 }
 0x4d8   : > { %5007 = vrot.lane.b32.xlu0 %v8564_v0, %s7195_s13 }
 0x4d9   : > { %v4882_v28 = vpop.permute.xlu1 %4881 }
 0x4da   : > { %v8569_v48 = vmax.f32 %v8489_v9, %v4882_v28 }
 0x4dc   : > { %5009 = vrot.lane.b32.xlu1 %v8569_v48, %s7195_s13 }
 0x512   : > { %v4980_v49 = vpop.permute.xlu0 %4979 }
 0x513   : > { %v5027_v50 = vsub.f32 %v8414_v10, %v4980_v49 }
 0x515   : > { %v5043_v52 = vmul.f32 1.442695, %v5027_v50 }
 0x516   : > { %v4982_v53 = vpop.permute.xlu1 %4981 }
 0x517   : > { %6934 = vpow2.f32 %v5043_v52  ;;  %v5028_v39 = vsub.f32 %v8419_v18, %v4982_v53 }
 0x519   : > { %v5045_v42 = vmul.f32 1.442695, %v5028_v39 }
 0x51a   : > { %v4984_v51 = vpop.permute.xlu0 %4983 }
 0x51b   : > { %6936 = vpow2.f32 %v5045_v42  ;;  %v5029_v43 = vsub.f32 %v8424_v2, %v4984_v51 }
 0x51d   : > { %v5047_v44 = vmul.f32 1.442695, %v5029_v43 }
 0x51e   : > { %v4986_v30 = vpop.permute.xlu1 %4985 }
 0x51f   : > { %6938 = vpow2.f32 %v5047_v44  ;;  %v5030_v45 = vsub.f32 %v8429_v25, %v4986_v30 }
 0x521   : > { %v8577_v32 = vpop.eup %6934  ;;  %v5049_v46 = vmul.f32 1.442695, %v5030_v45 }
 0x522   : > { %5091 = vrot.lane.b32.xlu0 %v8577_v32, %s7194_s12  ;;  %v4988_v47 = vpop.permute.xlu0 %4987 }
 0x523   : > { %6940 = vpow2.f32 %v5049_v46  ;;  %v5031_v57 = vsub.f32 %v8434_v55, %v4988_v47 }
 0x525   : > { %v8582_v8 = vpop.eup %6936  ;;  %v5051_v11 = vmul.f32 1.442695, %v5031_v57 }
 0x526   : > { %5093 = vrot.lane.b32.xlu1 %v8582_v8, %s7194_s12  ;;  %v4990_v14 = vpop.permute.xlu1 %4989 }
 0x527   : > { %6942 = vpow2.f32 %v5051_v11  ;;  %v5032_v31 = vsub.f32 %v8439_v29, %v4990_v14 }
 0x529   : > { %v8587_v17 = vpop.eup %6938  ;;  %v5053_v60 = vmul.f32 1.442695, %v5032_v31 }
 0x52a   : > { %5095 = vrot.lane.b32.xlu0 %v8587_v17, %s7194_s12  ;;  %v4992_v34 = vpop.permute.xlu0 %4991 }
 0x52b   : > { %6944 = vpow2.f32 %v5053_v60  ;;  %v5033_v1 = vsub.f32 %v8444_v41, %v4992_v34 }
 0x52d   : > { %v8592_v3 = vpop.eup %6940  ;;  %v5055_v6 = vmul.f32 1.442695, %v5033_v1 }
 0x52e   : > { %5097 = vrot.lane.b32.xlu1 %v8592_v3, %s7194_s12  ;;  %v4994_v19 = vpop.permute.xlu1 %4993 }
 0x52f   : > { %6946 = vpow2.f32 %v5055_v6  ;;  %v5034_v26 = vsub.f32 %v8449_v33, %v4994_v19 }
 0x531   : > { %v8597_v22 = vpop.eup %6942  ;;  %v5057_v54 = vmul.f32 1.442695, %v5034_v26 }
 0x532   : > { %5099 = vrot.lane.b32.xlu0 %v8597_v22, %s7194_s12  ;;  %v4996_v36 = vpop.permute.xlu0 %4995 }
 0x533   : > { %6948 = vpow2.f32 %v5057_v54  ;;  %v5035_v38 = vsub.f32 %v8454_v12, %v4996_v36 }
 0x535   : > { %v8602_v28 = vpop.eup %6944  ;;  %v5059_v49 = vmul.f32 1.442695, %v5035_v38 }
 0x536   : > { %5101 = vrot.lane.b32.xlu1 %v8602_v28, %s7194_s12  ;;  %v4998_v50 = vpop.permute.xlu1 %4997 }
 0x537   : > { %6950 = vpow2.f32 %v5059_v49  ;;  %v5036_v52 = vsub.f32 %v8459_v61, %v4998_v50 }
 0x539   : > { %v8607_v53 = vpop.eup %6946  ;;  %v5061_v39 = vmul.f32 1.442695, %v5036_v52 }
 0x53a   : > { %5103 = vrot.lane.b32.xlu0 %v8607_v53, %s7194_s12  ;;  %v5000_v42 = vpop.permute.xlu0 %4999 }
 0x53b   : > { %6952 = vpow2.f32 %v5061_v39  ;;  %v5037_v51 = vsub.f32 %v8464_v5, %v5000_v42 }
 0x53d   : > { %v8612_v43 = vpop.eup %6948  ;;  %v5063_v44 = vmul.f32 1.442695, %v5037_v51 }
 0x53e   : > { %5105 = vrot.lane.b32.xlu1 %v8612_v43, %s7194_s12  ;;  %v5002_v30 = vpop.permute.xlu1 %5001 }
 0x53f   : > { %6954 = vpow2.f32 %v5063_v44  ;;  %v5038_v45 = vsub.f32 %v8469_v23, %v5002_v30  ;;  %v4915_v44 = vsub.f32 %v8414_v10, %v8494_v13 }
 0x541   : > { %v8617_v46 = vpop.eup %6950  ;;  %v5065_v47 = vmul.f32 1.442695, %v5038_v45  ;;  %v4931_v30 = vmul.f32 1.442695, %v4915_v44  ;;  %v4916_v45 = vsub.f32 %v8419_v18, %v8499_v15 }
 0x542   : > { %5107 = vrot.lane.b32.xlu0 %v8617_v46, %s7194_s12  ;;  %v5004_v57 = vpop.permute.xlu0 %5003 }
 0x543   : > { %6956 = vpow2.f32 %v5065_v47  ;;  %v5039_v11 = vsub.f32 %v8474_v27, %v5004_v57  ;;  %v4933_v47 = vmul.f32 1.442695, %v4916_v45  ;;  %v4917_v57 = vsub.f32 %v8424_v2, %v8504_v16 }
 0x544   : > { %v4922_v45 = vsub.f32 %v8449_v33, %v8529_v4 }
 0x545   : > { %v8622_v14 = vpop.eup %6952  ;;  %v5067_v31 = vmul.f32 1.442695, %v5039_v11  ;;  %v4935_v11 = vmul.f32 1.442695, %v4917_v57 }
 0x546   : > { %5109 = vrot.lane.b32.xlu1 %v8622_v14, %s7194_s12  ;;  %v5006_v60 = vpop.permute.xlu1 %5005 }
 0x547   : > { %6958 = vpow2.f32 %v5067_v31  ;;  %v5040_v34 = vsub.f32 %v8479_v40, %v5006_v60  ;;  %v4918_v31 = vsub.f32 %v8429_v25, %v8509_v59  ;;  %v4921_v59 = vsub.f32 %v8444_v41, %v8524_v35 }
 0x549   : > { %v8627_v1 = vpop.eup %6954  ;;  %v5069_v6 = vmul.f32 1.442695, %v5040_v34  ;;  %v4937_v60 = vmul.f32 1.442695, %v4918_v31  ;;  %v4919_v34 = vsub.f32 %v8434_v55, %v8514_v62  ;;  %v4945_v31 = vmul.f32 1.442695, %v4922_v45 }
 0x54a   : > { %5111 = vrot.lane.b32.xlu0 %v8627_v1, %s7194_s12  ;;  %v5008_v19 = vpop.permute.xlu0 %5007 }
 0x54b   : > { %6960 = vpow2.f32 %v5069_v6  ;;  %v5041_v26 = vsub.f32 %v8484_v58, %v5008_v19  ;;  %v4939_v15 = vmul.f32 1.442695, %v4919_v34 }
 0x54d   : > { %v8632_v54 = vpop.eup %6956  ;;  %v5071_v36 = vmul.f32 1.442695, %v5041_v26  ;;  %v4920_v26 = vsub.f32 %v8439_v29, %v8519_v63 }
 0x54e   : > { %5113 = vrot.lane.b32.xlu1 %v8632_v54, %s7194_s12  ;;  %v5010_v38 = vpop.permute.xlu1 %5009 }
 0x54f   : > { %6962 = vpow2.f32 %v5071_v36  ;;  %v5042_v49 = vsub.f32 %v8489_v9, %v5010_v38 }
 0x551   : > { %v8637_v50 = vpop.eup %6958  ;;  %v5073_v52 = vmul.f32 1.442695, %v5042_v49  ;;  %v4941_v49 = vmul.f32 1.442695, %v4920_v26  ;;  %v4924_v26 = vsub.f32 %v8459_v61, %v8539_v20 }
 0x552   : > { %5115 = vrot.lane.b32.xlu0 %v8637_v50, %s7194_s12 }
 0x553   : > { %6964 = vpow2.f32 %v5073_v52 }
 0x554   : > { %6966 = vpow2.f32 %v4931_v30  ;;  %v4943_v30 = vmul.f32 1.442695, %v4921_v59 }
 0x555   : > { %v8641_v39 = vpop.eup %6960  ;;  %6968 = vpow2.f32 %v4933_v47 }
 0x556   : > { %5117 = vrot.lane.b32.xlu1 %v8641_v39, %s7194_s12  ;;  %6970 = vpow2.f32 %v4935_v11 }
 0x557   : > { %6972 = vpow2.f32 %v4937_v60  ;;  %v4923_v60 = vsub.f32 %v8454_v12, %v8534_v7 }
 0x559   : > { %v8645_v42 = vpop.eup %6962  ;;  %v4947_v4 = vmul.f32 1.442695, %v4923_v60 }
 0x55a   : > { %5119 = vrot.lane.b32.xlu0 %v8645_v42, %s7194_s12 }
 0x55d   : > { %v8649_v51 = vpop.eup %6964 }
 0x55e   : > { %5121 = vrot.lane.b32.xlu1 %v8649_v51, %s7194_s12  ;;  %v6967_v13 = vpop.eup %6966 }
 0x55f   : > { %v6969_v16 = vpop.eup %6968 }
 0x560   : > { %v6971_v52 = vpop.eup %6970 }
 0x561   : > { %v6973_v63 = vpop.eup %6972 }
 0x594   : > { %v5092_v6 = vpop.permute.xlu0 %5091 }
 0x595   : > { %v5139_v19 = vadd.f32 %v6967_v13, %v5092_v6 }
 0x597   : > { %6974 = vrcp.f32 %v5139_v19 }
 0x598   : > { %v5094_v36 = vpop.permute.xlu1 %5093  ;;  %6976 = vpow2.f32 %v4939_v15 }
 0x599   : > { %v5140_v38 = vadd.f32 %v6969_v16, %v5094_v36 }
 0x59b   : > { %6978 = vrcp.f32 %v5140_v38 }
 0x59c   : > { %v5096_v62 = vpop.permute.xlu0 %5095  ;;  %6980 = vpow2.f32 %v4941_v49 }
 0x59d   : > { %v5141_v44 = vadd.f32 %v6971_v52, %v5096_v62  ;;  %v4925_v62 = vsub.f32 %v8464_v5, %v8544_v21 }
 0x59f   : > { %6982 = vrcp.f32 %v5141_v44 }
 0x5a0   : > { %v5098_v47 = vpop.permute.xlu1 %5097  ;;  %6984 = vpow2.f32 %v4943_v30 }
 0x5a1   : > { %v6975_v57 = vpop.eup %6974  ;;  %v5142_v11 = vadd.f32 %v6973_v63, %v5098_v47 }
 0x5a2   : > { %5203 = vrot.lane.b32.xlu0 %v6975_v57, %s7195_s13  ;;  %v6977_v35 = vpop.eup %6976  ;;  %v5171_v6 = vmul.f32 %v6975_v57, %v6967_v13  ;;  %v4949_v13 = vmul.f32 1.442695, %v4924_v26  ;;  %v4926_v57 = vsub.f32 %v8469_v23, %v8549_v24 }
 0x5a3   : > { %6986 = vrcp.f32 %v5142_v11 }
 0x5a4   : > { %v5100_v34 = vpop.permute.xlu0 %5099  ;;  %6988 = vpow2.f32 %v4945_v31 }
 0x5a5   : > { %v6979_v19 = vpop.eup %6978  ;;  %v5143_v15 = vadd.f32 %v6977_v35, %v5100_v34  ;;  %v4953_v34 = vmul.f32 1.442695, %v4926_v57  ;;  %v4930_v57 = vsub.f32 %v8489_v9, %v8569_v48 }
 0x5a6   : > { %5283 = vrot.lane.b32.xlu0 %v5171_v6, %s7196_s14  ;;  %5205 = vrot.lane.b32.xlu1 %v6979_v19, %s7195_s13  ;;  %v6981_v7 = vpop.eup %6980  ;;  %v5172_v38 = vmul.f32 %v6979_v19, %v6969_v16  ;;  %v4951_v16 = vmul.f32 1.442695, %v4925_v62  ;;  %v4927_v6 = vsub.f32 %v8474_v27, %v8554_v56  ;;  %v4929_v62 = vsub.f32 %v8484_v58, %v8564_v0 }
 0x5a7   : > { %6990 = vrcp.f32 %v5143_v15 }
 0x5a8   : > { %v5102_v36 = vpop.permute.xlu1 %5101  ;;  %6992 = vpow2.f32 %v4947_v4  ;;  %v4955_v26 = vmul.f32 1.442695, %v4927_v6 }
 0x5a9   : > { %v6983_v49 = vpop.eup %6982  ;;  %v5144_v59 = vadd.f32 %v6981_v7, %v5102_v36  ;;  %v4928_v36 = vsub.f32 %v8479_v40, %v8559_v37 }
 0x5aa   : > { %5207 = vrot.lane.b32.xlu0 %v6983_v49, %s7195_s13  ;;  %5285 = vrot.lane.b32.xlu1 %v5172_v38, %s7196_s14  ;;  %v8680_v20 = vmul.f32 %v6983_v49, %v6971_v52  ;;  %v6985_v44 = vpop.eup %6984 }
 0x5ab   : > { %6994 = vrcp.f32 %v5144_v59 }
 0x5ac   : > { %v5104_v30 = vpop.permute.xlu0 %5103  ;;  %6996 = vpow2.f32 %v4949_v13  ;;  %v4957_v13 = vmul.f32 1.442695, %v4928_v36 }
 0x5ad   : > { %v6987_v45 = vpop.eup %6986  ;;  %v5145_v47 = vadd.f32 %v6985_v44, %v5104_v30 }
 0x5ae   : > { %5209 = vrot.lane.b32.xlu1 %v6987_v45, %s7195_s13  ;;  %v8685_v11 = vmul.f32 %v6987_v45, %v6973_v63  ;;  %v6989_v21 = vpop.eup %6988 }
 0x5af   : > { %6998 = vrcp.f32 %v5145_v47 }
 0x5b0   : > { %v5106_v31 = vpop.permute.xlu1 %5105  ;;  %7000 = vpow2.f32 %v4951_v16  ;;  %v4959_v16 = vmul.f32 1.442695, %v4929_v62 }
 0x5b1   : > { %v6991_v60 = vpop.eup %6990  ;;  %v5146_v52 = vadd.f32 %v6989_v21, %v5106_v31 }
 0x5b2   : > { %5211 = vrot.lane.b32.xlu0 %v6991_v60, %s7195_s13  ;;  %v8690_v19 = vmul.f32 %v6991_v60, %v6977_v35  ;;  %v8692_v24 = vpop.eup %6992 }
 0x5b3   : > { %7002 = vrcp.f32 %v5146_v52 }
 0x5b4   : > { %v5108_v15 = vpop.permute.xlu0 %5107  ;;  %7004 = vpow2.f32 %v4953_v34 }
 0x5b5   : > { %v6995_v63 = vpop.eup %6994  ;;  %v5147_v4 = vadd.f32 %v8692_v24, %v5108_v15 }
 0x5b6   : > { %5213 = vrot.lane.b32.xlu1 %v6995_v63, %s7195_s13  ;;  %v8698_v38 = vmul.f32 %v6995_v63, %v6981_v7  ;;  %v8700_v56 = vpop.eup %6996 }
 0x5b7   : > { %7006 = vrcp.f32 %v5147_v4 }
 0x5b8   : > { %v5110_v35 = vpop.permute.xlu1 %5109  ;;  %7008 = vpow2.f32 %v4955_v26 }
 0x5b9   : > { %v6999_v49 = vpop.eup %6998  ;;  %v5148_v59 = vadd.f32 %v8700_v56, %v5110_v35 }
 0x5ba   : > { %5215 = vrot.lane.b32.xlu0 %v6999_v49, %s7195_s13  ;;  %v5177_v30 = vmul.f32 %v6999_v49, %v6985_v44  ;;  %v7001_v37 = vpop.eup %7000  ;;  %v4961_v44 = vmul.f32 1.442695, %v4930_v57 }
 0x5bb   : > { %7010 = vrcp.f32 %v5148_v59 }
 0x5bc   : > { %v5112_v45 = vpop.permute.xlu0 %5111  ;;  %7012 = vpow2.f32 %v4957_v13 }
 0x5bd   : > { %v7003_v7 = vpop.eup %7002  ;;  %v5149_v47 = vadd.f32 %v7001_v37, %v5112_v45 }
 0x5be   : > { %5217 = vrot.lane.b32.xlu1 %v7003_v7, %s7195_s13  ;;  %v5178_v31 = vmul.f32 %v7003_v7, %v6989_v21  ;;  %v7005_v60 = vpop.eup %7004 }
 0x5bf   : > { %7014 = vrcp.f32 %v5149_v47 }
 0x5c0   : > { %v5114_v52 = vpop.permute.xlu1 %5113  ;;  %7016 = vpow2.f32 %v4959_v16 }
 0x5c1   : > { %v7007_v0 = vpop.eup %7006  ;;  %v5150_v34 = vadd.f32 %v7005_v60, %v5114_v52 }
 0x5c2   : > { %5219 = vrot.lane.b32.xlu0 %v7007_v0, %s7195_s13  ;;  %v7009_v6 = vpop.eup %7008 }
 0x5c3   : > { %7018 = vrcp.f32 %v5150_v34  ;;  %v5179_v34 = vmul.f32 %v7007_v0, %v8692_v24 }
 0x5c4   : > { %v5116_v15 = vpop.permute.xlu0 %5115  ;;  %7020 = vpow2.f32 %v4961_v44 }
 0x5c5   : > { %v7011_v63 = vpop.eup %7010  ;;  %v5151_v4 = vadd.f32 %v7009_v6, %v5116_v15 }
 0x5c6   : > { %5221 = vrot.lane.b32.xlu1 %v7011_v63, %s7195_s13  ;;  %v7013_v48 = vpop.eup %7012  ;;  %v5180_v44 = vmul.f32 %v7011_v63, %v8700_v56 }
 0x5c7   : > { %7022 = vrcp.f32 %v5151_v4 }
 0x5c8   : > { %v5118_v21 = vpop.permute.xlu1 %5117 }
 0x5c9   : > { %v7015_v26 = vpop.eup %7014  ;;  %v5152_v36 = vadd.f32 %v7013_v48, %v5118_v21 }
 0x5ca   : > { %5223 = vrot.lane.b32.xlu0 %v7015_v26, %s7195_s13  ;;  %v7017_v35 = vpop.eup %7016 }
 0x5cb   : > { %7024 = vrcp.f32 %v5152_v36 }
 0x5cc   : > { %v5120_v49 = vpop.permute.xlu0 %5119 }
 0x5cd   : > { %v7019_v59 = vpop.eup %7018  ;;  %v5153_v13 = vadd.f32 %v7017_v35, %v5120_v49 }
 0x5ce   : > { %5225 = vrot.lane.b32.xlu1 %v7019_v59, %s7195_s13  ;;  %v7021_v62 = vpop.eup %7020 }
 0x5cf   : > { %7026 = vrcp.f32 %v5153_v13 }
 0x5d0   : > { %v5122_v45 = vpop.permute.xlu1 %5121 }
 0x5d1   : > { %v7023_v7 = vpop.eup %7022  ;;  %v5154_v47 = vadd.f32 %v7021_v62, %v5122_v45 }
 0x5d2   : > { %5227 = vrot.lane.b32.xlu0 %v7023_v7, %s7195_s13 }
 0x5d3   : > { %7028 = vrcp.f32 %v5154_v47 }
 0x5d5   : > { %v7025_v16 = vpop.eup %7024 }
 0x5d6   : > { %5229 = vrot.lane.b32.xlu1 %v7025_v16, %s7195_s13 }
 0x5d9   : > { %v7027_v57 = vpop.eup %7026 }
 0x5da   : > { %5231 = vrot.lane.b32.xlu0 %v7027_v57, %s7195_s13 }
 0x5dd   : > { %v7029_v52 = vpop.eup %7028 }
 0x5de   : > { %5287 = vrot.lane.b32.xlu0 %v8680_v20, %s7196_s14  ;;  %5233 = vrot.lane.b32.xlu1 %v7029_v52, %s7195_s13  ;;  %v5181_v20 = vmul.f32 %v7015_v26, %v7001_v37  ;;  %v5186_v24 = vmul.f32 %v7029_v52, %v7021_v62 }
 0x5e2   : > { %5291 = vrot.lane.b32.xlu0 %v8690_v19, %s7196_s14  ;;  %5289 = vrot.lane.b32.xlu1 %v8685_v11, %s7196_s14  ;;  %v5183_v19 = vmul.f32 %v7023_v7, %v7009_v6  ;;  %v5182_v11 = vmul.f32 %v7019_v59, %v7005_v60 }
 0x5e6   : > { %5295 = vrot.lane.b32.xlu0 %v5177_v30, %s7196_s14  ;;  %5293 = vrot.lane.b32.xlu1 %v8698_v38, %s7196_s14  ;;  %v5185_v38 = vmul.f32 %v7027_v57, %v7017_v35  ;;  %v5184_v30 = vmul.f32 %v7025_v16, %v7013_v48 }
 0x5ea   : > { %5299 = vrot.lane.b32.xlu0 %v5179_v34, %s7196_s14  ;;  %5297 = vrot.lane.b32.xlu1 %v5178_v31, %s7196_s14 }
 0x5ee   : > { %5303 = vrot.lane.b32.xlu0 %v5181_v20, %s7196_s14  ;;  %5301 = vrot.lane.b32.xlu1 %v5180_v44, %s7196_s14 }
 0x5f2   : > { %5307 = vrot.lane.b32.xlu0 %v5183_v19, %s7196_s14  ;;  %5305 = vrot.lane.b32.xlu1 %v5182_v11, %s7196_s14 }
 0x5f6   : > { %5311 = vrot.lane.b32.xlu0 %v5185_v38, %s7196_s14  ;;  %5309 = vrot.lane.b32.xlu1 %v5184_v30, %s7196_s14 }
 0x5fa   : > { %5313 = vrot.lane.b32.xlu1 %v5186_v24, %s7196_s14 }
 0x614   : > { %v5204_v56 = vpop.permute.xlu0 %5203 }
 0x615   : > { %v5251_v37 = vmul.f32 %v8577_v32, %v5204_v56 }
 0x617   : > { %5347 = vrot.lane.b32.xlu0 %v5251_v37, %s7196_s14 }
 0x618   : > { %v8739_v31 = vpop.permute.xlu0 %5283  ;;  %v5206_v60 = vpop.permute.xlu1 %5205 }
 0x619   : > { %v5252_v0 = vmul.f32 %v8582_v8, %v5206_v60  ;;  %v5396_v24 = vsel %vm5395_vm1, %v8414_v10, %v8739_v31 }
 0x61b   : > { %5349 = vrot.lane.b32.xlu1 %v5252_v0, %s7196_s14 }
 0x61c   : > { %v5208_v6 = vpop.permute.xlu0 %5207  ;;  %v8743_v15 = vpop.permute.xlu1 %5285 }
 0x61d   : > { %v5253_v63 = vmul.f32 %v8587_v17, %v5208_v6  ;;  %v5397_v6 = vsel %vm5395_vm1, %v8419_v18, %v8743_v15 }
 0x61f   : > { %5351 = vrot.lane.b32.xlu0 %v5253_v63, %s7196_s14 }
 0x620   : > { %v5210_v4 = vpop.permute.xlu1 %5209 }
 0x621   : > { %v5254_v48 = vmul.f32 %v8592_v3, %v5210_v4 }
 0x623   : > { %5353 = vrot.lane.b32.xlu1 %v5254_v48, %s7196_s14 }
 0x624   : > { %v5212_v32 = vpop.permute.xlu0 %5211 }
 0x625   : > { %v5255_v21 = vmul.f32 %v8597_v22, %v5212_v32 }
 0x627   : > { %5355 = vrot.lane.b32.xlu0 %v5255_v21, %s7196_s14 }
 0x628   : > { %v5214_v8 = vpop.permute.xlu1 %5213 }
 0x629   : > { %v5256_v26 = vmul.f32 %v8602_v28, %v5214_v8 }
 0x62b   : > { %5357 = vrot.lane.b32.xlu1 %v5256_v26, %s7196_s14 }
 0x62c   : > { %v5216_v36 = vpop.permute.xlu0 %5215 }
 0x62d   : > { %v5257_v17 = vmul.f32 %v8607_v53, %v5216_v36 }
 0x62f   : > { %5359 = vrot.lane.b32.xlu0 %v5257_v17, %s7196_s14 }
 0x630   : > { %v5218_v35 = vpop.permute.xlu1 %5217 }
 0x631   : > { %v5258_v3 = vmul.f32 %v8612_v43, %v5218_v35 }
 0x633   : > { %5361 = vrot.lane.b32.xlu1 %v5258_v3, %s7196_s14 }
 0x634   : > { %v5220_v49 = vpop.permute.xlu0 %5219 }
 0x635   : > { %v5259_v22 = vmul.f32 %v8617_v46, %v5220_v49 }
 0x637   : > { %5363 = vrot.lane.b32.xlu0 %v5259_v22, %s7196_s14 }
 0x638   : > { %v5222_v59 = vpop.permute.xlu1 %5221 }
 0x639   : > { %v5260_v28 = vmul.f32 %v8622_v14, %v5222_v59 }
 0x63b   : > { %5365 = vrot.lane.b32.xlu1 %v5260_v28, %s7196_s14 }
 0x63c   : > { %v5224_v13 = vpop.permute.xlu0 %5223 }
 0x63d   : > { %v5261_v53 = vmul.f32 %v8627_v1, %v5224_v13 }
 0x63f   : > { %5367 = vrot.lane.b32.xlu0 %v5261_v53, %s7196_s14 }
 0x640   : > { %v5226_v62 = vpop.permute.xlu1 %5225 }
 0x641   : > { %v5262_v43 = vmul.f32 %v8632_v54, %v5226_v62 }
 0x643   : > { %5369 = vrot.lane.b32.xlu1 %v5262_v43, %s7196_s14 }
 0x644   : > { %v5228_v45 = vpop.permute.xlu0 %5227 }
 0x645   : > { %v5263_v46 = vmul.f32 %v8637_v50, %v5228_v45 }
 0x647   : > { %5371 = vrot.lane.b32.xlu0 %v5263_v46, %s7196_s14 }
 0x648   : > { %v5230_v7 = vpop.permute.xlu1 %5229 }
 0x649   : > { %v5264_v14 = vmul.f32 %v8641_v39, %v5230_v7 }
 0x64b   : > { %5373 = vrot.lane.b32.xlu1 %v5264_v14, %s7196_s14 }
 0x64c   : > { %v5232_v47 = vpop.permute.xlu0 %5231 }
 0x64d   : > { %v5265_v1 = vmul.f32 %v8645_v42, %v5232_v47 }
 0x64f   : > { %5375 = vrot.lane.b32.xlu0 %v5265_v1, %s7196_s14 }
 0x650   : > { %v5234_v16 = vpop.permute.xlu1 %5233  ;;  %v5288_v50 = vpop.permute.xlu0 %5287 }
 0x651   : > { %v5266_v54 = vmul.f32 %v8649_v51, %v5234_v16  ;;  %v5398_v4 = vsel %vm5395_vm1, %v8424_v2, %v5288_v50 }
 0x653   : > { %5377 = vrot.lane.b32.xlu1 %v5266_v54, %s7196_s14 }
 0x654   : > { %v5290_v57 = vpop.permute.xlu1 %5289  ;;  %v5292_v52 = vpop.permute.xlu0 %5291 }
 0x655   : > { %v5399_v18 = vsel %vm5395_vm1, %v8429_v25, %v5290_v57  ;;  %v5400_v2 = vsel %vm5395_vm1, %v8434_v55, %v5292_v52 }
 0x658   : > { %v5294_v34 = vpop.permute.xlu1 %5293  ;;  %v5296_v20 = vpop.permute.xlu0 %5295 }
 0x659   : > { %v5401_v25 = vsel %vm5395_vm1, %v8439_v29, %v5294_v34  ;;  %v5402_v55 = vsel %vm5395_vm1, %v8444_v41, %v5296_v20 }
 0x65c   : > { %v5298_v39 = vpop.permute.xlu1 %5297  ;;  %v5300_v44 = vpop.permute.xlu0 %5299 }
 0x65d   : > { %v5403_v29 = vsel %vm5395_vm1, %v8449_v33, %v5298_v39  ;;  %v5404_v41 = vsel %vm5395_vm1, %v8454_v12, %v5300_v44 }
 0x660   : > { %v5302_v19 = vpop.permute.xlu1 %5301  ;;  %v8773_v11 = vpop.permute.xlu0 %5303 }
 0x661   : > { %v5405_v33 = vsel %vm5395_vm1, %v8459_v61, %v5302_v19  ;;  %v5406_v12 = vsel %vm5395_vm1, %v8464_v5, %v8773_v11 }
 0x664   : > { %v8775_v42 = vpop.permute.xlu1 %5305  ;;  %v8777_v38 = vpop.permute.xlu0 %5307 }
 0x665   : > { %v5407_v61 = vsel %vm5395_vm1, %v8469_v23, %v8775_v42  ;;  %v5408_v5 = vsel %vm5395_vm1, %v8474_v27, %v8777_v38 }
 0x668   : > { %v8779_v30 = vpop.permute.xlu1 %5309  ;;  %v8782_v51 = vpop.permute.xlu0 %5311 }
 0x669   : > { %v5409_v23 = vsel %vm5395_vm1, %v8479_v40, %v8779_v30  ;;  %v5410_v27 = vsel %vm5395_vm1, %v8484_v58, %v8782_v51 }
 0x66c   : > { %v8789_v56 = vpop.permute.xlu1 %5313 }
 0x66d   : > { %v5411_v30 = vsel %vm5395_vm1, %v8489_v9, %v8789_v56 }
 0x689   : > { %v5348_v37 = vpop.permute.xlu0 %5347 }
 0x68a   : > { %v5413_v60 = vsel %vm5412_vm2, %v5396_v24, %v5348_v37 }
 0x68b   : > { %v5430_v0 = vsel %vm5429_vm3, %v5413_v60, 0.0 }
 0x68c   : > { %5446 = vst [vmem:[%s8793_s23] sm:$0xff] %v5430_v0 }
 0x68d   : > { %v5350_v63 = vpop.permute.xlu1 %5349 }
 0x68e   : > { %v5414_v10 = vsel %vm5412_vm2, %v5397_v6, %v5350_v63 }
 0x68f   : > { %v5431_v31 = vsel %vm5429_vm3, %v5414_v10, 0.0 }
 0x690   : > { %5447 = vst [vmem:[%s8793_s23 + $0x8] sm:$0xff] %v5431_v31 }
 0x691   : > { %v5352_v48 = vpop.permute.xlu0 %5351 }
 0x692   : > { %v5415_v32 = vsel %vm5412_vm2, %v5398_v4, %v5352_v48 }
 0x693   : > { %v5432_v21 = vsel %vm5429_vm3, %v5415_v32, 0.0 }
 0x694   : > { %5448 = vst [vmem:[%s8793_s23 + $0x10] sm:$0xff] %v5432_v21 }
 0x695   : > { %v5354_v15 = vpop.permute.xlu1 %5353 }
 0x696   : > { %v5416_v8 = vsel %vm5412_vm2, %v5399_v18, %v5354_v15 }
 0x697   : > { %v5433_v26 = vsel %vm5429_vm3, %v5416_v8, 0.0 }
 0x698   : > { %5449 = vst [vmem:[%s8793_s23 + $0x18] sm:$0xff] %v5433_v26 }
 0x699   : > { %v5356_v36 = vpop.permute.xlu0 %5355 }
 0x69a   : > { %v5417_v17 = vsel %vm5412_vm2, %v5400_v2, %v5356_v36 }
 0x69b   : > { %v5434_v35 = vsel %vm5429_vm3, %v5417_v17, 0.0 }
 0x69c   : > { %5450 = vst [vmem:[%s8793_s23 + $0x20] sm:$0xff] %v5434_v35 }
 0x69d   : > { %v5358_v3 = vpop.permute.xlu1 %5357 }
 0x69e   : > { %v5418_v49 = vsel %vm5412_vm2, %v5401_v25, %v5358_v3 }
 0x69f   : > { %v5435_v22 = vsel %vm5429_vm3, %v5418_v49, 0.0 }
 0x6a0   : > { %5451 = vst [vmem:[%s8793_s23 + $0x28] sm:$0xff] %v5435_v22 }
 0x6a1   : > { %v5360_v59 = vpop.permute.xlu0 %5359 }
 0x6a2   : > { %v5419_v28 = vsel %vm5412_vm2, %v5402_v55, %v5360_v59 }
 0x6a3   : > { %v5436_v13 = vsel %vm5429_vm3, %v5419_v28, 0.0 }
 0x6a4   : > { %5452 = vst [vmem:[%s8793_s23 + $0x30] sm:$0xff] %v5436_v13 }
 0x6a5   : > { %v5362_v53 = vpop.permute.xlu1 %5361 }
 0x6a6   : > { %v5420_v62 = vsel %vm5412_vm2, %v5403_v29, %v5362_v53 }
 0x6a7   : > { %v5437_v43 = vsel %vm5429_vm3, %v5420_v62, 0.0 }
 0x6a8   : > { %5453 = vst [vmem:[%s8793_s23 + $0x38] sm:$0xff] %v5437_v43 }
 0x6a9   : > { %v5364_v45 = vpop.permute.xlu0 %5363 }
 0x6aa   : > { %v5421_v46 = vsel %vm5412_vm2, %v5404_v41, %v5364_v45 }
 0x6ab   : > { %v5438_v7 = vsel %vm5429_vm3, %v5421_v46, 0.0 }
 0x6ac   : > { %5454 = vst [vmem:[%s8793_s23 + $0x40] sm:$0xff] %v5438_v7 }
 0x6ad   : > { %v5366_v14 = vpop.permute.xlu1 %5365 }
 0x6ae   : > { %v5422_v47 = vsel %vm5412_vm2, %v5405_v33, %v5366_v14 }
 0x6af   : > { %v5439_v1 = vsel %vm5429_vm3, %v5422_v47, 0.0 }
 0x6b0   : > { %5455 = vst [vmem:[%s8793_s23 + $0x48] sm:$0xff] %v5439_v1 }
 0x6b1   : > { %v5368_v16 = vpop.permute.xlu0 %5367 }
 0x6b2   : > { %v5423_v54 = vsel %vm5412_vm2, %v5406_v12, %v5368_v16 }
 0x6b3   : > { %v5440_v50 = vsel %vm5429_vm3, %v5423_v54, 0.0 }
 0x6b4   : > { %5456 = vst [vmem:[%s8793_s23 + $0x50] sm:$0xff] %v5440_v50 }
 0x6b5   : > { %v5370_v57 = vpop.permute.xlu1 %5369 }
 0x6b6   : > { %v5424_v52 = vsel %vm5412_vm2, %v5407_v61, %v5370_v57 }
 0x6b7   : > { %v5441_v34 = vsel %vm5429_vm3, %v5424_v52, 0.0 }
 0x6b8   : > { %5457 = vst [vmem:[%s8793_s23 + $0x58] sm:$0xff] %v5441_v34 }
 0x6b9   : > { %v5372_v20 = vpop.permute.xlu0 %5371 }
 0x6ba   : > { %v5425_v39 = vsel %vm5412_vm2, %v5408_v5, %v5372_v20 }
 0x6bb   : > { %v5442_v44 = vsel %vm5429_vm3, %v5425_v39, 0.0 }
 0x6bc   : > { %5458 = vst [vmem:[%s8793_s23 + $0x60] sm:$0xff] %v5442_v44 }
 0x6bd   : > { %v5374_v19 = vpop.permute.xlu1 %5373 }
 0x6be   : > { %v5426_v11 = vsel %vm5412_vm2, %v5409_v23, %v5374_v19 }
 0x6bf   : > { %v5443_v42 = vsel %vm5429_vm3, %v5426_v11, 0.0 }
 0x6c0   : > { %5459 = vst [vmem:[%s8793_s23 + $0x68] sm:$0xff] %v5443_v42 }
 0x6c1   : > { %v5376_v38 = vpop.permute.xlu0 %5375 }
 0x6c2   : > { %v5427_v24 = vsel %vm5412_vm2, %v5410_v27, %v5376_v38 }
 0x6c3   : > { %v5444_v40 = vsel %vm5429_vm3, %v5427_v24, 0.0 }
 0x6c4   : > { %5460 = vst [vmem:[%s8793_s23 + $0x70] sm:$0xff] %v5444_v40 }
 0x6c5   : > { %v5378_v37 = vpop.permute.xlu1 %5377 }
 0x6c6   : > { %v5428_v58 = vsel %vm5412_vm2, %v5411_v30, %v5378_v37 }
 0x6c7   : > { %v5445_v51 = vsel %vm5429_vm3, %v5428_v58, 0.0 }
 0x6c8   : > { %5461 = vst [vmem:[%s8793_s23 + $0x78] sm:$0xff] %v5445_v51 }
 0x6c9   : > { %7127 = shalt.err (!%p7124_p8)
}
 0x6ca   : > { %s7128_s26 = scalar_lea.hbm %s8880_s11, 2048  ;;  %s7132_s13 = scalar_lea.hbm %s8935_s5, 4096 }
 0x6cb   : > { %p7129_p11 = scmp.ne.s32.totalorder %s8880_s11, %s7128_s26  ;;  %p7133_p0 = scmp.lt.u32.totalorder %s8880_s11, %s8935_s5 }
 0x6cc   : > { %p7134_p6 = scmp.lt.u32.totalorder %s7132_s13, %s7128_s26  ;;  %p7136_p12 = scmp.lt.u32.totalorder %s7128_s26, %s8880_s11 }
 0x6cd   : > { %p7130_p13 = pnand %p7129_p11, %p8951_p10 }
 0x6ce   : > { %p7135_p9 = por %p7134_p6, %p7133_p0 }
 0x6cf   : > { %p7131_p5 = pneg %p7130_p13 }
 0x6d0   : > { %p7137_p1 = por %p7136_p12, %p7135_p9 }
 0x6d2   : > { %p7138_p2 = pnand %p7137_p1, %p7131_p5 }
 0x6d4   : > { %7141 = shalt.err (!%p7138_p2)
}
 0x6d5   : > { %s7198_s17 = smov 128   ;;  %s7199_s23 = smov 8  }
 0x6d6   : > { %6866 = dma.vmem_to_hbm [thread:$0]  (%p8951_p10), %s8882_s7, 2048, %s8880_s11, %s8889_s22, %s7198_s17, %s7198_s17, %s7199_s23  }
 0x6d7 PF: > { %p6888_p3 = scmp.ge.s32.totalorder %s7184_s21, 2  ;;  %s5491_s25 = sand.u32 1, %s7172_s18  }
 0x6d8   : > { %p8952_p4 = scmp.ne.s32.totalorder %s8941_s29, 0  ;;  %s5492_s10 = scalar_lea.sflag [#allocation4], %s5491_s25 }
 0x6da   : > { %p6879_p7 = pnand %p6888_p3, %p8952_p4 }
 0x6dc   : > { %7167 = dma.done.wait (!%p6879_p7), %s5492_s10, 2048  }
 0x6dd   : > { %7169 = vsyncadd (!%p6879_p7), %s5492_s10, 4294965248  ;;  %p17_p8 = scmp.ge.s32.totalorder %s7255_s24, 4   ;;  %s8953_s18 = smov %s7176_s19 }
 0x6de   : > { %s8954_s19 = smov %s7180_s20  ;;  %s8955_s20 = smov %s7266_s27 }
 0x6df   : > { %s8956_s21 = smov %s7255_s24  ;;  %19 = sbr.rel (!%p17_p8) target bundleno = 7 (0x7), region = 88 }
 0x6e6   :  { %5497 = vsyncpa [#allocation3], 1 }
 0x6e7   :  { %5499 = vsyncpa [#allocation3 + $0x1], 1 }
 0x6e8   :  { %5500 = vsyncpa [#allocation6], 1 }
 0x6e9   :  { %5501 = vsyncpa [#allocation4], 1 }
 0x6ea   :  { %5503 = vsyncpa [#allocation4 + $0x1], 1 }

</bundles_post_ra>
